<compile_context>
chip_gen: v7x
topology: tpu7x:2x2x1
jax: 0.10.0
libtpu: 0.0.40
codegen_flags: <defaults>
</compile_context>

<pallas_src>
import functools
import math

import jax
import jax.numpy as jnp
from jax import lax
from jax.experimental import pallas as pl
from jax.experimental.pallas import tpu as pltpu


def _mhsa_kernel(x_ref, g_ref, beta_ref, wqkv_ref, bqkv_ref, wo_ref, bo_ref, o_ref, *,
                 num_heads, head_dim, valid_len, compute_dtype):
    """One grid step = one batch element.

    x_ref    : (S_pad, E)   input tokens (rows >= valid_len are zero padding)
    g/beta   : (1, E)       LayerNorm gamma / beta (f32)
    wqkv_ref : (E, 3E)      fused QKV projection weight (bf16); Q columns pre-scaled
    bqkv_ref : (1, 3E)      fused QKV projection bias (f32); Q part pre-scaled
    wo_ref   : (E, E)       output projection weight, already transposed (bf16)
    bo_ref   : (1, E)       output projection bias (f32)
    o_ref    : (S_pad, E)   attention output (padded query rows zeroed)
    """
    H, Dh = num_heads, head_dim
    x = x_ref[...].astype(jnp.float32)                                  # (S, E)
    S, E = x.shape

    # --- LayerNorm over last dim, f32 (eps=1e-5, biased variance, like torch) ---
    mean = jnp.mean(x, axis=-1, keepdims=True)
    xc = x - mean
    var = jnp.mean(xc * xc, axis=-1, keepdims=True)
    xn = xc * lax.rsqrt(var + 1e-5) * g_ref[...] + beta_ref[...]        # (S, E) f32

    # --- Fused QKV projection: ONE lane-dense (S,E)x(E,3E) matmul, f32 accumulation.
    qkv = jnp.dot(xn.astype(compute_dtype), wqkv_ref[...],
                  preferred_element_type=jnp.float32) + bqkv_ref[...]   # (S, 3E) f32

    # --- Head split in feature-major orientation: one 2D transpose, then
    # layout-preserving row slices/reshapes (Dh is a multiple of the sublane width).
    # K stays in (H, Dh, S) form so the q·kᵀ matmul is MXU-native (no per-head
    # transposes of K).
    qkv_t = qkv.T                                                       # (3E, S) f32
    qT = qkv_t[0 * E:1 * E].reshape(H, Dh, S)                           # (H, Dh, S)
    kT = qkv_t[1 * E:2 * E].reshape(H, Dh, S)                           # pre-transposed K
    vT = qkv_t[2 * E:3 * E].reshape(H, Dh, S)
    q = jnp.swapaxes(qT, 1, 2).astype(compute_dtype)                    # (H, S, Dh)
    v = jnp.swapaxes(vT, 1, 2).astype(compute_dtype)                    # (H, S, Dh)

    # --- head-batched scaled dot-product attention (scale pre-folded into Q weights) ---
    dn = (((2,), (1,)), ((0,), (0,)))       # contract lhs last dim with rhs 2nd-to-last
    s = lax.dot_general(q, kT.astype(compute_dtype), dn,
                        preferred_element_type=jnp.float32)             # (H, S, S)
    if valid_len < S:   # static branch: only emitted when the sequence was padded
        kmask = lax.broadcasted_iota(jnp.int32, (1, 1, S), 2) < valid_len
        s = jnp.where(kmask, s, jnp.float32(-1e30))

    m = jnp.max(s, axis=-1, keepdims=True)
    p = jnp.exp(s - m)
    p = p * pl.reciprocal(jnp.sum(p, axis=-1, keepdims=True), approx=True)   # EUP vrcp

    ctx = lax.dot_general(p.astype(compute_dtype), v, dn,
                          preferred_element_type=jnp.float32)           # (H, S, Dh) f32

    # --- collapse heads to (S, E); output projection is ONE K=E lane-dense matmul ---
    ctx_flat = jnp.swapaxes(ctx, 1, 2).reshape(E, S).T                  # (S, E) f32
    out = jnp.dot(ctx_flat.astype(compute_dtype), wo_ref[...],
                  preferred_element_type=jnp.float32) + bo_ref[...]     # (S, E) f32

    if valid_len < S:   # zero padded query rows so the padded output slab is clean
        qmask = lax.broadcasted_iota(jnp.int32, (S, 1), 0) < valid_len
        out = jnp.where(qmask, out, 0.0)

    o_ref[...] = out.astype(o_ref.dtype)


def prepare_mhsa_params(ln_gamma, ln_beta, w_in, b_in, w_out, b_out, *,
                        num_heads, compute_dtype=jnp.bfloat16):
    """Host-side, one-time weight preparation (cache the result; reuse across calls).

    w_in : (3E, E) torch in_proj_weight     b_in : (3E,) in_proj_bias
    w_out: (E, E)  torch out_proj.weight    b_out: (E,)  out_proj.bias
    Produces a fused, pre-scaled (E, 3E) QKV weight and a transposed (E, E) output
    weight so every matmul in the kernel is lane-dense with a K=E contraction.
    """
    w_in = jnp.asarray(w_in, jnp.float32)
    b_in = jnp.asarray(b_in, jnp.float32)
    w_out = jnp.asarray(w_out, jnp.float32)
    E = w_out.shape[0]
    H = num_heads
    assert E % H == 0
    Dh = E // H
    assert Dh % 8 == 0, "head_dim must be a multiple of 8 for the in-kernel head split"
    scale = 1.0 / math.sqrt(Dh)

    # Fold 1/sqrt(Dh) into the Q output features (rows 0..E-1) of the fused projection.
    feat_scale = jnp.concatenate([jnp.full((E,), scale, jnp.float32),
                                  jnp.ones((2 * E,), jnp.float32)])
    return dict(
        num_heads=H,
        head_dim=Dh,
        gamma=jnp.asarray(ln_gamma, jnp.float32).reshape(1, E),
        beta=jnp.asarray(ln_beta, jnp.float32).reshape(1, E),
        wqkv=(w_in * feat_scale[:, None]).T.astype(compute_dtype),      # (E, 3E)
        bqkv=(b_in * feat_scale).reshape(1, 3 * E).astype(jnp.float32),
        wo=w_out.T.astype(compute_dtype),                               # (E, E): out = ctx @ Wo.T
        bo=jnp.asarray(b_out, jnp.float32).reshape(1, E),
    )


def _vmem_capacity_bytes(default=128 * 1024 * 1024):
    """Physical VMEM of the local TPU generation (falls back to 128 MiB)."""
    try:
        return int(pltpu.get_tpu_info().vmem_capacity_bytes)
    except Exception:       # query unavailable (older runtimes, CPU tracing, ...)
        return default


def mhsa_block(x, params, *, seq_align=128):
    """x: (B, S, E), f32 or bf16.  params: output of prepare_mhsa_params.

    seq_align=128 keeps the (S,S) score/prob tiles and all stores lane-dense (ViT's
    S=197 pads to 256).  Padded keys are masked and padded query rows zeroed in-kernel.
    """
    B, S, E = x.shape
    H = params["num_heads"]
    Dh = params["head_dim"]
    compute_dtype = params["wqkv"].dtype

    S_pad = ((S + seq_align - 1) // seq_align) * seq_align
    xp = x if S_pad == S else jnp.pad(x, ((0, 0), (0, S_pad - S), (0, 0)))

    # --- VMEM budget: weights (double-buffered by the pipeliner) + activation tiles +
    # in-kernel intermediates, capped per generation (<=56 MiB on 64-MiB v7x-class
    # chips, up to ~100 MiB on 128-MiB v5e/v6e chips).
    f32b = 4
    cb = jnp.dtype(compute_dtype).itemsize
    xb = jnp.dtype(x.dtype).itemsize
    weight_bytes = 2 * (cb * (3 * E * E + E * E) + f32b * (3 * E + 3 * E))
    act_bytes = 2 * 2 * xb * S_pad * E                      # x + out, double-buffered
    interm_bytes = (f32b * (2 * S_pad * 3 * E + 2 * H * S_pad * S_pad
                            + 4 * H * S_pad * Dh + 3 * S_pad * E)
                    + cb * (S_pad * 3 * E + H * S_pad * S_pad
                            + 3 * H * S_pad * Dh + S_pad * E))
    needed = int(1.25 * (weight_bytes + act_bytes + interm_bytes))
    cap = _vmem_capacity_bytes()
    ceiling = (56 * 2 ** 20 if cap <= 64 * 2 ** 20
               else min(100 * 2 ** 20, cap - 16 * 2 ** 20))
    vmem_limit = int(max(min(max(needed, 32 * 2 ** 20), ceiling), 4 * 2 ** 20))

    kernel = functools.partial(_mhsa_kernel, num_heads=H, head_dim=Dh,
                               valid_len=S, compute_dtype=compute_dtype)

    # NOTE: the constant-index weight blocks below are candidates for single-buffering
    # (pl.BlockSpec(..., pipeline_mode=pl.Buffered(1))) on VMEM-tight chips; left at the
    # pipeliner default here pending MLIR verification (per review).
    # TODO(synk): for long sequences (S_pad >= ~512) add a query-tile grid axis with a
    # flash-style online-softmax accumulator so v7x's 64 MiB VMEM is bounded and both
    # TensorCores get work at B == 1.
    out = pl.pallas_call(
        kernel,
        out_shape=jax.ShapeDtypeStruct((B, S_pad, E), x.dtype),
        grid_spec=pltpu.PrefetchScalarGridSpec(
            num_scalar_prefetch=0,
            grid=(B,),
            in_specs=[
                pl.BlockSpec((None, S_pad, E), lambda b: (b, 0, 0)),   # x (per batch)
                pl.BlockSpec((1, E), lambda b: (0, 0)),                # ln gamma
                pl.BlockSpec((1, E), lambda b: (0, 0)),                # ln beta
                # Constant index_map -> weight blocks are resident, not re-fetched per step.
                pl.BlockSpec((E, 3 * E), lambda b: (0, 0)),            # fused Wqkv (bf16, scaled)
                pl.BlockSpec((1, 3 * E), lambda b: (0, 0)),            # fused bqkv (f32, scaled)
                pl.BlockSpec((E, E), lambda b: (0, 0)),                # Wo^T (bf16)
                pl.BlockSpec((1, E), lambda b: (0, 0)),                # bo (f32)
            ],
            out_specs=pl.BlockSpec((None, S_pad, E), lambda b: (b, 0, 0)),
        ),
        compiler_params=pltpu.CompilerParams(
            dimension_semantics=("parallel",),    # megacore / 2-TC chips shard batches
            vmem_limit_bytes=vmem_limit,
        ),
    )(xp, params["gamma"], params["beta"], params["wqkv"], params["bqkv"],
      params["wo"], params["bo"])

    return out if S_pad == S else out[:, :S, :]


def mhsa_reference(x, ln_gamma, ln_beta, w_in, b_in, w_out, b_out, *, num_heads):
    """Pure-JAX f32 reference matching torch LayerNorm + nn.MultiheadAttention."""
    B, S, E = x.shape
    Dh = E // num_heads
    x = x.astype(jnp.float32)
    mean = jnp.mean(x, axis=-1, keepdims=True)
    var = jnp.mean((x - mean) ** 2, axis=-1, keepdims=True)
    xn = (x - mean) / jnp.sqrt(var + 1e-5) * ln_gamma + ln_beta
    qkv = jnp.einsum('bse,fe->bsf', xn, w_in) + b_in
    q, k, v = jnp.split(qkv, 3, axis=-1)

    def heads(t):
        return t.reshape(B, S, num_heads, Dh).transpose(0, 2, 1, 3)

    q, k, v = heads(q), heads(k), heads(v)
    scores = jnp.einsum('bhqd,bhkd->bhqk', q, k) / jnp.sqrt(Dh)
    p = jax.nn.softmax(scores, axis=-1)
    ctx = jnp.einsum('bhqk,bhkd->bhqd', p, v).transpose(0, 2, 1, 3).reshape(B, S, E)
    return jnp.einsum('bse,fe->bsf', ctx, w_out) + b_out


if __name__ == "__main__":
    # Small shapes consistent with the module: embedding_dim=64, num_heads=4 (head_dim=16),
    # batch=2.  S=13 is deliberately ragged to exercise the pad-to-128 + key-mask path.
    B, S, E, H = 2, 13, 64, 4

    key = jax.random.PRNGKey(0)
    kx, kg, kb, kw1, kb1, kw2, kb2 = jax.random.split(key, 7)
    x = jax.random.normal(kx, (B, S, E), dtype=jnp.float32)

    ln_gamma = 1.0 + 0.1 * jax.random.normal(kg, (E,), dtype=jnp.float32)
    ln_beta = 0.1 * jax.random.normal(kb, (E,), dtype=jnp.float32)
    w_in = 0.1 * jax.random.normal(kw1, (3 * E, E), dtype=jnp.float32)   # in_proj_weight
    b_in = 0.05 * jax.random.normal(kb1, (3 * E,), dtype=jnp.float32)    # in_proj_bias
    w_out = 0.1 * jax.random.normal(kw2, (E, E), dtype=jnp.float32)      # out_proj.weight
    b_out = 0.05 * jax.random.normal(kb2, (E,), dtype=jnp.float32)       # out_proj.bias

    # One-time host-side weight prep (cached outside the per-call path).
    params = prepare_mhsa_params(ln_gamma, ln_beta, w_in, b_in, w_out, b_out, num_heads=H)

    # Case 1: ragged S (padding + masking path), f32 activations.
    out = jax.block_until_ready(mhsa_block(x, params))
    ref = mhsa_reference(x, ln_gamma, ln_beta, w_in, b_in, w_out, b_out, num_heads=H)
    assert out.shape == (B, S, E)
    err = float(jnp.max(jnp.abs(out - ref)))
    assert jnp.allclose(out, ref, atol=3e-2, rtol=3e-2), f"padded-case mismatch, max|diff|={err}"

    # Case 2: S already a multiple of 128 (no padding / no masking branches).
    x2 = jax.random.normal(jax.random.PRNGKey(1), (1, 128, E), dtype=jnp.float32)
    out2 = jax.block_until_ready(mhsa_block(x2, params))
    ref2 = mhsa_reference(x2, ln_gamma, ln_beta, w_in, b_in, w_out, b_out, num_heads=H)
    err2 = float(jnp.max(jnp.abs(out2 - ref2)))
    assert jnp.allclose(out2, ref2, atol=3e-2, rtol=3e-2), f"aligned-case mismatch, max|diff|={err2}"

    # Case 3: bf16 activations in / out (halves HBM<->VMEM activation traffic).
    x3 = x.astype(jnp.bfloat16)
    out3 = jax.block_until_ready(mhsa_block(x3, params))
    assert out3.dtype == jnp.bfloat16 and out3.shape == (B, S, E)
    out3f = out3.astype(jnp.float32)
    err3 = float(jnp.max(jnp.abs(out3f - ref)))
    assert bool(jnp.all(jnp.isfinite(out3f))) and err3 < 1.5e-1, \
        f"bf16-case mismatch, max|diff|={err3}"

    print("KERNEL_OK")
</pallas_src>

<mosaic_0001>
module attributes {stable_mosaic.version = 11 : i64} {
  func.func @_mhsa_kernel(%arg0: i32, %arg1: memref<1x128x64xf32, #tpu.memory_space<vmem>>, %arg2: memref<1x64xf32, #tpu.memory_space<vmem>>, %arg3: memref<1x64xf32, #tpu.memory_space<vmem>>, %arg4: memref<64x192xbf16, #tpu.memory_space<vmem>>, %arg5: memref<1x192xf32, #tpu.memory_space<vmem>>, %arg6: memref<64x64xbf16, #tpu.memory_space<vmem>>, %arg7: memref<1x64xf32, #tpu.memory_space<vmem>>, %arg8: memref<1x128x64xf32, #tpu.memory_space<vmem>>) attributes {dimension_semantics = [#tpu.dimension_semantics<parallel>], iteration_bounds = array<i64: 2>, scalar_prefetch = 0 : i64, scratch_operands = 0 : i64, tpu.core_type = #tpu.core_type<tc>, window_params = [{transform_indices = @transform_0, window_bounds = array<i64: 1, 128, 64>}, {pipeline_mode = #tpu.pipeline_mode<synchronous>, transform_indices = @transform_1, window_bounds = array<i64: 1, 64>}, {pipeline_mode = #tpu.pipeline_mode<synchronous>, transform_indices = @transform_2, window_bounds = array<i64: 1, 64>}, {pipeline_mode = #tpu.pipeline_mode<synchronous>, transform_indices = @transform_3, window_bounds = array<i64: 64, 192>}, {pipeline_mode = #tpu.pipeline_mode<synchronous>, transform_indices = @transform_4, window_bounds = array<i64: 1, 192>}, {pipeline_mode = #tpu.pipeline_mode<synchronous>, transform_indices = @transform_5, window_bounds = array<i64: 64, 64>}, {pipeline_mode = #tpu.pipeline_mode<synchronous>, transform_indices = @transform_6, window_bounds = array<i64: 1, 64>}, {transform_indices = @transform_7, window_bounds = array<i64: 1, 128, 64>}]} {
    %c0 = arith.constant 0 : index
    %c0_0 = arith.constant 0 : index
    %c0_1 = arith.constant 0 : index
    %0 = vector.load %arg1[%c0, %c0_0, %c0_1] : memref<1x128x64xf32, #tpu.memory_space<vmem>>, vector<1x128x64xf32>
    %1 = vector.shape_cast %0 : vector<1x128x64xf32> to vector<128x64xf32>
    %cst = arith.constant dense<0.000000e+00> : vector<128xf32>
    %2 = vector.multi_reduction <add>, %1, %cst [1] : vector<128x64xf32> to vector<128xf32>
    %3 = vector.shape_cast %2 : vector<128xf32> to vector<128x1xf32>
    %cst_2 = arith.constant 6.400000e+01 : f32
    %4 = vector.broadcast %cst_2 : f32 to vector<128x1xf32>
    %5 = arith.divf %3, %4 : vector<128x1xf32>
    %6 = vector.broadcast %5 : vector<128x1xf32> to vector<128x64xf32>
    %7 = arith.subf %1, %6 : vector<128x64xf32>
    %8 = arith.mulf %7, %7 : vector<128x64xf32>
    %cst_3 = arith.constant dense<0.000000e+00> : vector<128xf32>
    %9 = vector.multi_reduction <add>, %8, %cst_3 [1] : vector<128x64xf32> to vector<128xf32>
    %10 = vector.shape_cast %9 : vector<128xf32> to vector<128x1xf32>
    %cst_4 = arith.constant 6.400000e+01 : f32
    %11 = vector.broadcast %cst_4 : f32 to vector<128x1xf32>
    %12 = arith.divf %10, %11 : vector<128x1xf32>
    %cst_5 = arith.constant 9.99999974E-6 : f32
    %13 = vector.broadcast %cst_5 : f32 to vector<128x1xf32>
    %14 = arith.addf %12, %13 : vector<128x1xf32>
    %15 = math.rsqrt %14 : vector<128x1xf32>
    %16 = vector.broadcast %15 : vector<128x1xf32> to vector<128x64xf32>
    %17 = arith.mulf %7, %16 : vector<128x64xf32>
    %c0_6 = arith.constant 0 : index
    %c0_7 = arith.constant 0 : index
    %18 = vector.load %arg2[%c0_6, %c0_7] : memref<1x64xf32, #tpu.memory_space<vmem>>, vector<1x64xf32>
    %19 = vector.broadcast %18 : vector<1x64xf32> to vector<128x64xf32>
    %20 = arith.mulf %17, %19 : vector<128x64xf32>
    %c0_8 = arith.constant 0 : index
    %c0_9 = arith.constant 0 : index
    %21 = vector.load %arg3[%c0_8, %c0_9] : memref<1x64xf32, #tpu.memory_space<vmem>>, vector<1x64xf32>
    %22 = vector.broadcast %21 : vector<1x64xf32> to vector<128x64xf32>
    %23 = arith.addf %20, %22 : vector<128x64xf32>
    %24 = arith.truncf %23 : vector<128x64xf32> to vector<128x64xbf16>
    %c0_10 = arith.constant 0 : index
    %c0_11 = arith.constant 0 : index
    %25 = vector.load %arg4[%c0_10, %c0_11] : memref<64x192xbf16, #tpu.memory_space<vmem>>, vector<64x192xbf16>
    %cst_12 = arith.constant dense<0.000000e+00> : vector<128x192xf32>
    %26 = tpu.matmul %24, %25, %cst_12 {dimension_numbers = #tpu.dot_dimension_numbers<[1], [0], [0], [1], [0, 0, 1, 1], [], []>} : vector<128x64xbf16>, vector<64x192xbf16>, vector<128x192xf32> -> vector<128x192xf32>
    %c0_13 = arith.constant 0 : index
    %c0_14 = arith.constant 0 : index
    %27 = vector.load %arg5[%c0_13, %c0_14] : memref<1x192xf32, #tpu.memory_space<vmem>>, vector<1x192xf32>
    %28 = vector.broadcast %27 : vector<1x192xf32> to vector<128x192xf32>
    %29 = arith.addf %26, %28 : vector<128x192xf32>
    %30 = tpu.transpose %29, [1, 0] : vector<128x192xf32> -> vector<192x128xf32>
    %31 = vector.extract_strided_slice %30 {offsets = [0, 0], sizes = [64, 128], strides = [1, 1]} : vector<192x128xf32> to vector<64x128xf32>
    %32 = vector.shape_cast %31 : vector<64x128xf32> to vector<4x16x128xf32>
    %33 = vector.extract_strided_slice %30 {offsets = [64, 0], sizes = [64, 128], strides = [1, 1]} : vector<192x128xf32> to vector<64x128xf32>
    %34 = vector.shape_cast %33 : vector<64x128xf32> to vector<4x16x128xf32>
    %35 = vector.extract_strided_slice %30 {offsets = [128, 0], sizes = [64, 128], strides = [1, 1]} : vector<192x128xf32> to vector<64x128xf32>
    %36 = vector.shape_cast %35 : vector<64x128xf32> to vector<4x16x128xf32>
    %37 = tpu.transpose %32, [0, 2, 1] : vector<4x16x128xf32> -> vector<4x128x16xf32>
    %38 = arith.truncf %37 : vector<4x128x16xf32> to vector<4x128x16xbf16>
    %39 = tpu.transpose %36, [0, 2, 1] : vector<4x16x128xf32> -> vector<4x128x16xf32>
    %40 = arith.truncf %39 : vector<4x128x16xf32> to vector<4x128x16xbf16>
    %41 = arith.truncf %34 : vector<4x16x128xf32> to vector<4x16x128xbf16>
    %cst_15 = arith.constant dense<0.000000e+00> : vector<4x128x128xf32>
    %42 = tpu.matmul %38, %41, %cst_15 {dimension_numbers = #tpu.dot_dimension_numbers<[2], [1], [1], [2], [0, 0, 0, 1, 1, 2], [0], [0]>} : vector<4x128x16xbf16>, vector<4x16x128xbf16>, vector<4x128x128xf32> -> vector<4x128x128xf32>
    %43 = tpu.iota {dimensions = array<i32: 2>} : vector<1x1x128xi32>
    %c13_i32 = arith.constant 13 : i32
    %44 = vector.broadcast %c13_i32 : i32 to vector<1x1x128xi32>
    %45 = arith.cmpi slt, %43, %44 : vector<1x1x128xi32>
    %cst_16 = arith.constant -1.000000e+30 : f32
    %46 = vector.shape_cast %45 : vector<1x1x128xi1> to vector<1x1x128xi1>
    %47 = vector.broadcast %46 : vector<1x1x128xi1> to vector<4x128x128xi1>
    %48 = vector.broadcast %cst_16 : f32 to vector<4x128x128xf32>
    %49 = arith.select %47, %42, %48 : vector<4x128x128xi1>, vector<4x128x128xf32>
    %cst_17 = arith.constant dense<0xFF800000> : vector<4x128xf32>
    %50 = vector.multi_reduction <maximumf>, %49, %cst_17 [2] : vector<4x128x128xf32> to vector<4x128xf32>
    %51 = vector.shape_cast %50 : vector<4x128xf32> to vector<4x128x1xf32>
    %52 = vector.broadcast %51 : vector<4x128x1xf32> to vector<4x128x128xf32>
    %53 = arith.subf %49, %52 : vector<4x128x128xf32>
    %54 = math.exp %53 : vector<4x128x128xf32>
    %cst_18 = arith.constant dense<0.000000e+00> : vector<4x128xf32>
    %55 = vector.multi_reduction <add>, %54, %cst_18 [2] : vector<4x128x128xf32> to vector<4x128xf32>
    %56 = vector.shape_cast %55 : vector<4x128xf32> to vector<4x128x1xf32>
    %57 = tpu.reciprocal %56 {approx = true} : vector<4x128x1xf32> -> vector<4x128x1xf32>
    %58 = vector.broadcast %57 : vector<4x128x1xf32> to vector<4x128x128xf32>
    %59 = arith.mulf %54, %58 : vector<4x128x128xf32>
    %60 = arith.truncf %59 : vector<4x128x128xf32> to vector<4x128x128xbf16>
    %cst_19 = arith.constant dense<0.000000e+00> : vector<4x128x16xf32>
    %61 = tpu.matmul %60, %40, %cst_19 {dimension_numbers = #tpu.dot_dimension_numbers<[2], [1], [1], [2], [0, 0, 0, 1, 1, 2], [0], [0]>} : vector<4x128x128xbf16>, vector<4x128x16xbf16>, vector<4x128x16xf32> -> vector<4x128x16xf32>
    %62 = tpu.transpose %61, [0, 2, 1] : vector<4x128x16xf32> -> vector<4x16x128xf32>
    %63 = vector.shape_cast %62 : vector<4x16x128xf32> to vector<64x128xf32>
    %64 = tpu.transpose %63, [1, 0] : vector<64x128xf32> -> vector<128x64xf32>
    %65 = arith.truncf %64 : vector<128x64xf32> to vector<128x64xbf16>
    %c0_20 = arith.constant 0 : index
    %c0_21 = arith.constant 0 : index
    %66 = vector.load %arg6[%c0_20, %c0_21] : memref<64x64xbf16, #tpu.memory_space<vmem>>, vector<64x64xbf16>
    %cst_22 = arith.constant dense<0.000000e+00> : vector<128x64xf32>
    %67 = tpu.matmul %65, %66, %cst_22 {dimension_numbers = #tpu.dot_dimension_numbers<[1], [0], [0], [1], [0, 0, 1, 1], [], []>} : vector<128x64xbf16>, vector<64x64xbf16>, vector<128x64xf32> -> vector<128x64xf32>
    %c0_23 = arith.constant 0 : index
    %c0_24 = arith.constant 0 : index
    %68 = vector.load %arg7[%c0_23, %c0_24] : memref<1x64xf32, #tpu.memory_space<vmem>>, vector<1x64xf32>
    %69 = vector.broadcast %68 : vector<1x64xf32> to vector<128x64xf32>
    %70 = arith.addf %67, %69 : vector<128x64xf32>
    %71 = tpu.iota {dimensions = array<i32: 0>} : vector<128x1xi32>
    %c13_i32_25 = arith.constant 13 : i32
    %72 = vector.broadcast %c13_i32_25 : i32 to vector<128x1xi32>
    %73 = arith.cmpi slt, %71, %72 : vector<128x1xi32>
    %cst_26 = arith.constant 0.000000e+00 : f32
    %74 = vector.shape_cast %73 : vector<128x1xi1> to vector<128x1xi1>
    %75 = vector.broadcast %74 : vector<128x1xi1> to vector<128x64xi1>
    %76 = vector.broadcast %cst_26 : f32 to vector<128x64xf32>
    %77 = arith.select %75, %70, %76 : vector<128x64xi1>, vector<128x64xf32>
    %c0_27 = arith.constant 0 : index
    %c0_28 = arith.constant 0 : index
    %c0_29 = arith.constant 0 : index
    %78 = vector.load %arg8[%c0_27, %c0_28, %c0_29] : memref<1x128x64xf32, #tpu.memory_space<vmem>>, vector<1x128x64xf32>
    %79 = vector.shape_cast %78 : vector<1x128x64xf32> to vector<128x64xf32>
    %80 = vector.shape_cast %77 : vector<128x64xf32> to vector<1x128x64xf32>
    tpu.vector_store %arg8[%c0_27, %c0_28, %c0_29], %80 {strides = array<i32>} : memref<1x128x64xf32, #tpu.memory_space<vmem>>, vector<1x128x64xf32>,
    return
  }
  func.func @transform_0(%arg0: i32) -> (i32, i32, i32) {
    %c0_i32 = arith.constant 0 : i32
    %c0_i32_0 = arith.constant 0 : i32
    %c0_i32_1 = arith.constant 0 : i32
    return %arg0, %c0_i32, %c0_i32_0 : i32, i32, i32
  }
  func.func @transform_1(%arg0: i32) -> (i32, i32) {
    %c0_i32 = arith.constant 0 : i32
    %c0_i32_0 = arith.constant 0 : i32
    %c0_i32_1 = arith.constant 0 : i32
    return %c0_i32, %c0_i32_0 : i32, i32
  }
  func.func @transform_2(%arg0: i32) -> (i32, i32) {
    %c0_i32 = arith.constant 0 : i32
    %c0_i32_0 = arith.constant 0 : i32
    %c0_i32_1 = arith.constant 0 : i32
    return %c0_i32, %c0_i32_0 : i32, i32
  }
  func.func @transform_3(%arg0: i32) -> (i32, i32) {
    %c0_i32 = arith.constant 0 : i32
    %c0_i32_0 = arith.constant 0 : i32
    %c0_i32_1 = arith.constant 0 : i32
    return %c0_i32, %c0_i32_0 : i32, i32
  }
  func.func @transform_4(%arg0: i32) -> (i32, i32) {
    %c0_i32 = arith.constant 0 : i32
    %c0_i32_0 = arith.constant 0 : i32
    %c0_i32_1 = arith.constant 0 : i32
    return %c0_i32, %c0_i32_0 : i32, i32
  }
  func.func @transform_5(%arg0: i32) -> (i32, i32) {
    %c0_i32 = arith.constant 0 : i32
    %c0_i32_0 = arith.constant 0 : i32
    %c0_i32_1 = arith.constant 0 : i32
    return %c0_i32, %c0_i32_0 : i32, i32
  }
  func.func @transform_6(%arg0: i32) -> (i32, i32) {
    %c0_i32 = arith.constant 0 : i32
    %c0_i32_0 = arith.constant 0 : i32
    %c0_i32_1 = arith.constant 0 : i32
    return %c0_i32, %c0_i32_0 : i32, i32
  }
  func.func @transform_7(%arg0: i32) -> (i32, i32, i32) {
    %c0_i32 = arith.constant 0 : i32
    %c0_i32_0 = arith.constant 0 : i32
    %c0_i32_1 = arith.constant 0 : i32
    return %arg0, %c0_i32, %c0_i32_0 : i32, i32, i32
  }
}

</mosaic_0001>

<bundles_post_ra>
// kernel: tpu_custom_call.1
= control target key start
LH: loop header
LB: loop body
LE: loop exit
PB: predicated region body
PF: predicated region fallthrough
CT: control target
= control target key end

     0   :  { %s4373_s24 = smov 0   ;;  %s5822_s0 = inlined_call_operand.vmem [shape: f32[2,128,64], index: 0, kind: input, shape index: {}]   ;;  %s5823_s1 = inlined_call_operand.vmem [shape: f32[1,64], index: 1, kind: input, shape index: {}]   ;;  %s5824_s2 = inlined_call_operand.vmem [shape: f32[1,64], index: 2, kind: input, shape index: {}]   ;;  %s5825_s3 = inlined_call_operand.vmem [shape: bf16[64,192], index: 3, kind: input, shape index: {}]   ;;  %s5826_s4 = inlined_call_operand.vmem [shape: f32[1,192], index: 4, kind: input, shape index: {}]   ;;  %s5827_s5 = inlined_call_operand.vmem [shape: bf16[64,64], index: 5, kind: input, shape index: {}]   ;;  %s5828_s6 = inlined_call_operand.vmem [shape: f32[1,64], index: 6, kind: input, shape index: {}]   ;;  %s5829_s7 = inlined_call_operand.vmem [shape: f32[2,128,64], index: 7, kind: output, shape index: {}]  }
   0x1 LB: > { %s3175_s25 = sadd.s32 4294967295, %s4329_s24   ;;  %p3179_p0 = scmp.ge.s32.totalorder %s4329_s24, 1  ;;  %s4329_s24 = sphi %s4373_s24, %s17_s24  }
   0x2   : > { %p237_p1 = scmp.lt.s32.totalorder %s4329_s24, 3 }
   0x4   : > { %p238_p2 = pnand %p3179_p0, %p237_p1 }
   0x6   : > { %241 = sbr.rel (%p238_p2) target bundleno = 2384 (0x950), region = 48 }
   0xd   : > { %p269_p3 = scmp.lt.s32.totalorder %s3175_s25, 1  ;;  %vm296_vm0 = vcmask 523264   ;;  %v4331_v1 = vmov 0.0   ;;  %vm1145_vm1 = vcmask 130048  }
   0xf   : > { %s5917_s25 = smov (!%p269_p3, %s3175_s25), 1 }
  0x10   : > { %s3249_s26 = sshll.u32 %s5917_s25, 7 }
  0x11   : > { %s4384_s29 = scalar_lea.vmem %s5822_s0, %s3249_s26  ;;  %s4389_s9 = scalar_lea.vmem %s5829_s7, %s3249_s26 }
  0x12   : > { %v4392_v0 = vld [vmem:[%s4384_s29] sm:$0xff]  ;;  %3106 = vst.msk [vmem:[%s4389_s9 + $0x10] sm:$0xff] %vm296_vm0, %v4331_v1  ;;  %3107 = vst.msk [vmem:[%s4389_s9 + $0x18] sm:$0xff] %vm296_vm0, %v4331_v1  ;;  %v282_v2 = vld [vmem:[%s4384_s29 + $0x10] sm:$0xff] }
  0x13   : > { %3108 = vst.msk [vmem:[%s4389_s9 + $0x20] sm:$0xff] %vm296_vm0, %v4331_v1  ;;  %3109 = vst.msk [vmem:[%s4389_s9 + $0x28] sm:$0xff] %vm296_vm0, %v4331_v1  ;;  %v281_v3 = vld [vmem:[%s4384_s29 + $0x8] sm:$0xff]  ;;  %v297_v4 = vsel %vm296_vm0, %v4392_v0, 0.0  ;;  %v303_v5 = vsel %vm296_vm0, %v282_v2, 0.0  ;;  %v283_v6 = vld [vmem:[%s4384_s29 + $0x18] sm:$0xff] }
  0x14   : > { %3110 = vst.msk [vmem:[%s4389_s9 + $0x30] sm:$0xff] %vm296_vm0, %v4331_v1  ;;  %3111 = vst.msk [vmem:[%s4389_s9 + $0x38] sm:$0xff] %vm296_vm0, %v4331_v1  ;;  %298 = vadd.xlane.f32.xlu0 %v297_v4  ;;  %304 = vadd.xlane.f32.xlu1 %v303_v5  ;;  %v300_v7 = vsel %vm296_vm0, %v281_v3, 0.0  ;;  %v306_v8 = vsel %vm296_vm0, %v283_v6, 0.0  ;;  %v284_v9 = vld [vmem:[%s4384_s29 + $0x20] sm:$0xff]  ;;  %v285_v10 = vld [vmem:[%s4384_s29 + $0x28] sm:$0xff] }
  0x15   : > { %3112 = vst.msk [vmem:[%s4389_s9 + $0x40] sm:$0xff] %vm296_vm0, %v4331_v1  ;;  %3113 = vst.msk [vmem:[%s4389_s9 + $0x48] sm:$0xff] %vm296_vm0, %v4331_v1  ;;  %v309_v11 = vsel %vm296_vm0, %v284_v9, 0.0  ;;  %v312_v12 = vsel %vm296_vm0, %v285_v10, 0.0  ;;  %v4435_v13 = vld [vmem:[%s4384_s29 + $0x30] sm:$0xff]  ;;  %v4438_v14 = vld [vmem:[%s4384_s29 + $0x38] sm:$0xff] }
  0x16   : > { %3114 = vst.msk [vmem:[%s4389_s9 + $0x50] sm:$0xff] %vm296_vm0, %v4331_v1  ;;  %3115 = vst.msk [vmem:[%s4389_s9 + $0x58] sm:$0xff] %vm296_vm0, %v4331_v1  ;;  %v315_v15 = vsel %vm296_vm0, %v4435_v13, 0.0  ;;  %v318_v16 = vsel %vm296_vm0, %v4438_v14, 0.0  ;;  %v4445_v17 = vld [vmem:[%s4384_s29 + $0x40] sm:$0xff]  ;;  %v4448_v18 = vld [vmem:[%s4384_s29 + $0x48] sm:$0xff] }
  0x17   : > { %3116 = vst.msk [vmem:[%s4389_s9 + $0x60] sm:$0xff] %vm296_vm0, %v4331_v1  ;;  %3117 = vst.msk [vmem:[%s4389_s9 + $0x68] sm:$0xff] %vm296_vm0, %v4331_v1  ;;  %v321_v19 = vsel %vm296_vm0, %v4445_v17, 0.0  ;;  %v324_v20 = vsel %vm296_vm0, %v4448_v18, 0.0  ;;  %v4455_v21 = vld [vmem:[%s4384_s29 + $0x50] sm:$0xff]  ;;  %v4458_v22 = vld [vmem:[%s4384_s29 + $0x58] sm:$0xff] }
  0x18   : > { %3118 = vst.msk [vmem:[%s4389_s9 + $0x70] sm:$0xff] %vm296_vm0, %v4331_v1  ;;  %3119 = vst.msk [vmem:[%s4389_s9 + $0x78] sm:$0xff] %vm296_vm0, %v4331_v1  ;;  %301 = vadd.xlane.f32.xlu0 %v300_v7  ;;  %307 = vadd.xlane.f32.xlu1 %v306_v8  ;;  %v327_v23 = vsel %vm296_vm0, %v4455_v21, 0.0  ;;  %v330_v24 = vsel %vm296_vm0, %v4458_v22, 0.0  ;;  %v4465_v25 = vld [vmem:[%s4384_s29 + $0x60] sm:$0xff]  ;;  %v4468_v26 = vld [vmem:[%s4384_s29 + $0x68] sm:$0xff] }
  0x19   : > { %v333_v27 = vsel %vm296_vm0, %v4465_v25, 0.0  ;;  %v336_v28 = vsel %vm296_vm0, %v4468_v26, 0.0  ;;  %v4475_v29 = vld [vmem:[%s4384_s29 + $0x70] sm:$0xff]  ;;  %v4478_v30 = vld [vmem:[%s4384_s29 + $0x78] sm:$0xff] }
  0x1a   : > { %v339_v31 = vsel %vm296_vm0, %v4475_v29, 0.0  ;;  %v342_v32 = vsel %vm296_vm0, %v4478_v30, 0.0 }
  0x1c   : > { %310 = vadd.xlane.f32.xlu0 %v309_v11  ;;  %313 = vadd.xlane.f32.xlu1 %v312_v12 }
  0x20   : > { %316 = vadd.xlane.f32.xlu0 %v315_v15  ;;  %319 = vadd.xlane.f32.xlu1 %v318_v16 }
  0x24   : > { %322 = vadd.xlane.f32.xlu0 %v321_v19  ;;  %325 = vadd.xlane.f32.xlu1 %v324_v20 }
  0x28   : > { %328 = vadd.xlane.f32.xlu0 %v327_v23  ;;  %331 = vadd.xlane.f32.xlu1 %v330_v24 }
  0x2c   : > { %334 = vadd.xlane.f32.xlu0 %v333_v27  ;;  %337 = vadd.xlane.f32.xlu1 %v336_v28 }
  0x30   : > { %340 = vadd.xlane.f32.xlu0 %v339_v31  ;;  %343 = vadd.xlane.f32.xlu1 %v342_v32 }
  0xa1   : > { %v299_v33 = vpop.xlane.xlu0 %298  ;;  %v305_v34 = vpop.xlane.xlu1 %304 }
  0xa2   : > { %v346_v35 = vmul.f32 0.015625, %v299_v33  ;;  %v348_v36 = vmul.f32 0.015625, %v305_v34 }
  0xa4   : > { %v4485_v37 = vsub.f32 %v4392_v0, %v346_v35  ;;  %v4487_v38 = vsub.f32 %v282_v2, %v348_v36 }
  0xa5   : > { %v302_v39 = vpop.xlane.xlu0 %301  ;;  %v308_v40 = vpop.xlane.xlu1 %307 }
  0xa6   : > { %v347_v41 = vmul.f32 0.015625, %v302_v39  ;;  %v349_v42 = vmul.f32 0.015625, %v308_v40  ;;  %v378_v43 = vmul.f32 %v4485_v37, %v4485_v37  ;;  %v380_v44 = vmul.f32 %v4487_v38, %v4487_v38 }
  0xa8   : > { %v4493_v45 = vsub.f32 %v281_v3, %v347_v41  ;;  %v4495_v46 = vsub.f32 %v283_v6, %v349_v42  ;;  %v394_v47 = vsel %vm296_vm0, %v378_v43, 0.0  ;;  %v400_v50 = vsel %vm296_vm0, %v380_v44, 0.0 }
  0xa9   : > { %395 = vadd.xlane.f32.xlu0 %v394_v47  ;;  %v311_v48 = vpop.xlane.xlu0 %310  ;;  %v314_v49 = vpop.xlane.xlu1 %313 }
  0xaa   : > { %v350_v51 = vmul.f32 0.015625, %v311_v48  ;;  %v351_v52 = vmul.f32 0.015625, %v314_v49  ;;  %v379_v53 = vmul.f32 %v4493_v45, %v4493_v45  ;;  %v381_v54 = vmul.f32 %v4495_v46, %v4495_v46 }
  0xac   : > { %v4503_v55 = vsub.f32 %v284_v9, %v350_v51  ;;  %v4505_v56 = vsub.f32 %v285_v10, %v351_v52  ;;  %v397_v57 = vsel %vm296_vm0, %v379_v53, 0.0  ;;  %v403_v60 = vsel %vm296_vm0, %v381_v54, 0.0  ;;  %v4022_v54 = vld [vmem:[%s5825_s3 + $0x14] ss:$8 sps:$4 sm:$0xff]  }
  0xad   : > { %401 = vadd.xlane.f32.xlu0 %v400_v50  ;;  %398 = vadd.xlane.f32.xlu1 %v397_v57  ;;  %v317_v58 = vpop.xlane.xlu0 %316  ;;  %v320_v59 = vpop.xlane.xlu1 %319  ;;  %v4019_v50 = vld [vmem:[%s5825_s3 + $0x4] ss:$8 sps:$4 sm:$0xff]  }
  0xae   : > { %v352_v61 = vmul.f32 0.015625, %v317_v58  ;;  %v353_v62 = vmul.f32 0.015625, %v320_v59  ;;  %v382_v63 = vmul.f32 %v4503_v55, %v4503_v55  ;;  %v383_v0 = vmul.f32 %v4505_v56, %v4505_v56  ;;  %644 = vmatprep.subr.bf16.mxu0 %v4019_v50  ;;  %v4024_v58 = vld [vmem:[%s5825_s3 + $0x10] ss:$8 sps:$4 sm:$0xff]   ;;  %v4025_v59 = vld [vmem:[%s5825_s3 + $0x24] ss:$8 sps:$4 sm:$0xff]  }
  0xb0   : > { %v4514_v1 = vsub.f32 %v4435_v13, %v352_v61  ;;  %v4517_v2 = vsub.f32 %v4438_v14, %v353_v62  ;;  %v406_v3 = vsel %vm296_vm0, %v382_v63, 0.0  ;;  %v409_v6 = vsel %vm296_vm0, %v383_v0, 0.0  ;;  %v4028_v61 = vld [vmem:[%s5825_s3 + $0x34] ss:$8 sps:$4 sm:$0xff]   ;;  %v4030_v62 = vld [vmem:[%s5825_s3 + $0x30] ss:$8 sps:$4 sm:$0xff]  }
  0xb1   : > { %404 = vadd.xlane.f32.xlu1 %v403_v60  ;;  %407 = vadd.xlane.f32.xlu0 %v406_v3  ;;  %v323_v4 = vpop.xlane.xlu0 %322  ;;  %v326_v5 = vpop.xlane.xlu1 %325  ;;  %v4027_v60 = vld [vmem:[%s5825_s3 + $0x20] ss:$8 sps:$4 sm:$0xff]   ;;  %v4332_v63 = vmov 0  }
  0xb2   : > { %v354_v7 = vmul.f32 0.015625, %v323_v4  ;;  %v355_v8 = vmul.f32 0.015625, %v326_v5  ;;  %v384_v9 = vmul.f32 %v4514_v1, %v4514_v1  ;;  %v385_v10 = vmul.f32 %v4517_v2, %v4517_v2  ;;  %676 = vmatprep.mubr.bf16.mxu0 %v4332_v63 }
  0xb4   : > { %v4526_v11 = vsub.f32 %v4445_v17, %v354_v7  ;;  %v4529_v12 = vsub.f32 %v4448_v18, %v355_v8  ;;  %v412_v13 = vsel %vm296_vm0, %v384_v9, 0.0  ;;  %v415_v16 = vsel %vm296_vm0, %v385_v10, 0.0 }
  0xb5   : > { %410 = vadd.xlane.f32.xlu1 %v409_v6  ;;  %413 = vadd.xlane.f32.xlu0 %v412_v13  ;;  %v329_v14 = vpop.xlane.xlu0 %328  ;;  %v332_v15 = vpop.xlane.xlu1 %331 }
  0xb6   : > { %v356_v19 = vmul.f32 0.015625, %v329_v14  ;;  %v357_v20 = vmul.f32 0.015625, %v332_v15  ;;  %v386_v23 = vmul.f32 %v4526_v11, %v4526_v11  ;;  %v387_v17 = vmul.f32 %v4529_v12, %v4529_v12 }
  0xb8   : > { %v4538_v24 = vsub.f32 %v4455_v21, %v356_v19  ;;  %v4541_v18 = vsub.f32 %v4458_v22, %v357_v20  ;;  %v418_v27 = vsel %vm296_vm0, %v386_v23, 0.0  ;;  %v421_v32 = vsel %vm296_vm0, %v387_v17, 0.0 }
  0xb9   : > { %416 = vadd.xlane.f32.xlu1 %v415_v16  ;;  %419 = vadd.xlane.f32.xlu0 %v418_v27  ;;  %v335_v28 = vpop.xlane.xlu0 %334  ;;  %v338_v31 = vpop.xlane.xlu1 %337 }
  0xba   : > { %v358_v33 = vmul.f32 0.015625, %v335_v28  ;;  %v359_v34 = vmul.f32 0.015625, %v338_v31  ;;  %v388_v35 = vmul.f32 %v4538_v24, %v4538_v24  ;;  %v389_v21 = vmul.f32 %v4541_v18, %v4541_v18 }
  0xbc   : > { %v4550_v36 = vsub.f32 %v4465_v25, %v358_v33  ;;  %v4553_v22 = vsub.f32 %v4468_v26, %v359_v34  ;;  %v424_v39 = vsel %vm296_vm0, %v388_v35, 0.0  ;;  %v427_v42 = vsel %vm296_vm0, %v389_v21, 0.0  ;;  %v4604_v35 = vld [vmem:[%s5823_s1] ss:$0 sm:$0xff] }
  0xbd   : > { %422 = vadd.xlane.f32.xlu1 %v421_v32  ;;  %425 = vadd.xlane.f32.xlu0 %v424_v39  ;;  %v341_v40 = vpop.xlane.xlu0 %340  ;;  %v344_v41 = vpop.xlane.xlu1 %343 }
  0xbe   : > { %v360_v43 = vmul.f32 0.015625, %v341_v40  ;;  %v361_v44 = vmul.f32 0.015625, %v344_v41  ;;  %v390_v47 = vmul.f32 %v4550_v36, %v4550_v36  ;;  %v391_v25 = vmul.f32 %v4553_v22, %v4553_v22 }
  0xc0   : > { %v4562_v48 = vsub.f32 %v4475_v29, %v360_v43  ;;  %v4565_v26 = vsub.f32 %v4478_v30, %v361_v44  ;;  %v430_v49 = vsel %vm296_vm0, %v390_v47, 0.0  ;;  %v433_v51 = vsel %vm296_vm0, %v391_v25, 0.0  ;;  %v4021_v30 = vld [vmem:[%s5825_s3] ss:$8 sps:$4 sm:$0xff]  }
  0xc1   : > { %428 = vadd.xlane.f32.xlu1 %v427_v42  ;;  %431 = vadd.xlane.f32.xlu0 %v430_v49 }
  0xc2   : > { %v392_v52 = vmul.f32 %v4562_v48, %v4562_v48  ;;  %v393_v29 = vmul.f32 %v4565_v26, %v4565_v26  ;;  %645 = vmatpush1.bf16.msra.mxu0 %v4021_v30 }
  0xc3   : > { %646 = vmatprep.subr.bf16.mxu0 %v4022_v54 }
  0xc4   : > { %v436_v53 = vsel %vm296_vm0, %v392_v52, 0.0  ;;  %v439_v57 = vsel %vm296_vm0, %v393_v29, 0.0 }
  0xc5   : > { %434 = vadd.xlane.f32.xlu1 %v433_v51  ;;  %437 = vadd.xlane.f32.xlu0 %v436_v53 }
  0xc6   : > { %647 = vmatpush1.bf16.msra.mxu0 %v4024_v58 }
  0xc7   : > { %648 = vmatprep.subr.bf16.mxu0 %v4025_v59 }
  0xc9   : > { %440 = vadd.xlane.f32.xlu1 %v439_v57 }
  0xca   : > { %649 = vmatpush1.bf16.msra.mxu0 %v4027_v60 }
  0xcb   : > { %650 = vmatprep.subr.bf16.mxu0 %v4028_v61 }
  0xce   : > { %651 = vmatpush1.bf16.msra.mxu0 %v4030_v62 }
 0x136   : > { %v396_v0 = vpop.xlane.xlu0 %395 }
 0x137   : > { %v442_v3 = vmul.f32 0.015625, %v396_v0 }
 0x139   : > { %v458_v4 = vadd.f32 1e-05, %v442_v3 }
 0x13a   : > { %v399_v5 = vpop.xlane.xlu1 %398  ;;  %v402_v6 = vpop.xlane.xlu0 %401 }
 0x13b   : > { %4035 = vrsqrt.f32 %v458_v4  ;;  %v443_v7 = vmul.f32 0.015625, %v399_v5  ;;  %v444_v8 = vmul.f32 0.015625, %v402_v6 }
 0x13d   : > { %v459_v9 = vadd.f32 1e-05, %v443_v7  ;;  %v460_v10 = vadd.f32 1e-05, %v444_v8 }
 0x13e   : > { %v405_v13 = vpop.xlane.xlu1 %404  ;;  %v408_v14 = vpop.xlane.xlu0 %407 }
 0x13f   : > { %4037 = vrsqrt.f32 %v459_v9  ;;  %v445_v15 = vmul.f32 0.015625, %v405_v13  ;;  %v446_v19 = vmul.f32 0.015625, %v408_v14 }
 0x140   : > { %4039 = vrsqrt.f32 %v460_v10 }
 0x141   : > { %v461_v16 = vadd.f32 1e-05, %v445_v15  ;;  %v462_v27 = vadd.f32 1e-05, %v446_v19 }
 0x142   : > { %v411_v20 = vpop.xlane.xlu1 %410  ;;  %v414_v31 = vpop.xlane.xlu0 %413 }
 0x143   : > { %4041 = vrsqrt.f32 %v461_v16  ;;  %v447_v23 = vmul.f32 0.015625, %v411_v20  ;;  %v448_v39 = vmul.f32 0.015625, %v414_v31 }
 0x145   : > { %v4036_v17 = vpop.eup %4035  ;;  %v463_v28 = vadd.f32 1e-05, %v447_v23  ;;  %v464_v49 = vadd.f32 1e-05, %v448_v39 }
 0x146   : > { %v417_v32 = vpop.xlane.xlu1 %416  ;;  %v490_v33 = vmul.f32 %v4036_v17, %v4485_v37  ;;  %v4611_v37 = vld [vmem:[%s5824_s2] ss:$0 sm:$0xff]  ;;  %v420_v50 = vpop.xlane.xlu0 %419 }
 0x147   : > { %4043 = vrsqrt.f32 %v463_v28  ;;  %v449_v34 = vmul.f32 0.015625, %v417_v32  ;;  %v450_v58 = vmul.f32 0.015625, %v420_v50 }
 0x148   : > { %4045 = vrsqrt.f32 %v462_v27  ;;  %v513_v41 = vmul.f32 %v4604_v35, %v490_v33 }
 0x149   : > { %v4038_v21 = vpop.eup %4037  ;;  %v465_v43 = vadd.f32 1e-05, %v449_v34  ;;  %v466_v0 = vadd.f32 1e-05, %v450_v58 }
 0x14a   : > { %v491_v40 = vmul.f32 %v4038_v21, %v4493_v45  ;;  %v4040_v42 = vpop.eup %4039  ;;  %v423_v44 = vpop.xlane.xlu1 %422  ;;  %v536_v51 = vadd.f32 %v4611_v37, %v513_v41 }
 0x14b   : > { %v492_v45 = vmul.f32 %v4040_v42, %v4487_v38  ;;  %4047 = vrsqrt.f32 %v465_v43  ;;  %v451_v30 = vmul.f32 0.015625, %v423_v44  ;;  %v426_v3 = vpop.xlane.xlu0 %425 }
 0x14c   : > { %v514_v47 = vmul.f32 %v4604_v35, %v491_v40  ;;  %4049 = vrsqrt.f32 %v464_v49  ;;  %v452_v10 = vmul.f32 0.015625, %v426_v3 }
 0x14d   : > { %v4042_v25 = vpop.eup %4041  ;;  %v515_v59 = vmul.f32 %v4604_v35, %v492_v45  ;;  %v467_v61 = vadd.f32 1e-05, %v451_v30 }
 0x14e   : > { %v537_v52 = vadd.f32 %v4611_v37, %v514_v47  ;;  %v493_v29 = vmul.f32 %v4042_v25, %v4495_v46  ;;  %v429_v62 = vpop.xlane.xlu1 %428  ;;  %v468_v19 = vadd.f32 1e-05, %v452_v10 }
 0x14f   : > { %v538_v4 = vadd.f32 %v4611_v37, %v515_v59  ;;  %4051 = vrsqrt.f32 %v467_v61  ;;  %v453_v6 = vmul.f32 0.015625, %v429_v62  ;;  %v432_v20 = vpop.xlane.xlu0 %431 }
 0x150   : > { %v552_v53 = vpack.c.bf16 %v537_v52, %v536_v51  ;;  %v516_v54 = vmul.f32 %v4604_v35, %v493_v29  ;;  %4053 = vrsqrt.f32 %v466_v0  ;;  %v454_v33 = vmul.f32 0.015625, %v432_v20 }
 0x151   : > { %v4044_v57 = vpop.eup %4043 }
 0x152   : > { %3194 = vmatmul.mubr.msk.bf16.vlgmr.msra.gmra.mrb[0].mxu0 %vm296_vm0, %v552_v53  ;;  %v4046_v60 = vpop.eup %4045  ;;  %v539_v38 = vadd.f32 %v4611_v37, %v516_v54  ;;  %v495_v46 = vmul.f32 %v4044_v57, %v4505_v56  ;;  %v469_v56 = vadd.f32 1e-05, %v453_v6  ;;  %v435_v15 = vpop.xlane.xlu1 %434  ;;  %v470_v41 = vadd.f32 1e-05, %v454_v33 }
 0x153   : > { %686 = vmatprep.mubr.bf16.mxu0 %v4332_v63  ;;  %v494_v5 = vmul.f32 %v4046_v60, %v4503_v55  ;;  %v455_v27 = vmul.f32 0.015625, %v435_v15  ;;  %v438_v42 = vpop.xlane.xlu0 %437 }
 0x154   : > { %v553_v7 = vpack.c.bf16 %v539_v38, %v538_v4  ;;  %v518_v8 = vmul.f32 %v4604_v35, %v495_v46  ;;  %4055 = vrsqrt.f32 %v469_v56  ;;  %v456_v51 = vmul.f32 0.015625, %v438_v42 }
 0x155   : > { %v4048_v9 = vpop.eup %4047  ;;  %v517_v13 = vmul.f32 %v4604_v35, %v494_v5  ;;  %4057 = vrsqrt.f32 %v468_v19 }
 0x156   : > { %v4050_v14 = vpop.eup %4049  ;;  %v541_v16 = vadd.f32 %v4611_v37, %v518_v8  ;;  %v497_v55 = vmul.f32 %v4048_v9, %v4517_v2  ;;  %v471_v2 = vadd.f32 1e-05, %v455_v27  ;;  %v441_v39 = vpop.xlane.xlu1 %440  ;;  %v472_v30 = vadd.f32 1e-05, %v456_v51 }
 0x157   : > { %v540_v23 = vadd.f32 %v4611_v37, %v517_v13  ;;  %v496_v17 = vmul.f32 %v4050_v14, %v4514_v1  ;;  %v457_v47 = vmul.f32 0.015625, %v441_v39 }
 0x158   : > { %v520_v31 = vmul.f32 %v4604_v35, %v497_v55  ;;  %4059 = vrsqrt.f32 %v471_v2 }
 0x159   : > { %v554_v28 = vpack.c.bf16 %v541_v16, %v540_v23  ;;  %v4052_v32 = vpop.eup %4051  ;;  %v519_v34 = vmul.f32 %v4604_v35, %v496_v17  ;;  %4061 = vrsqrt.f32 %v470_v41  ;;  %v4680_v16 = vld [vmem:[%s5826_s4] sm:$0x3] }
 0x15a   : > { %3195 = vmatmul.mubr.msk.bf16.gmra.mrb[4].mxu0 %vm296_vm0, %v553_v7  ;;  %v4054_v21 = vpop.eup %4053  ;;  %v543_v40 = vadd.f32 %v4611_v37, %v520_v31  ;;  %v499_v1 = vmul.f32 %v4052_v32, %v4529_v12  ;;  %v473_v12 = vadd.f32 1e-05, %v457_v47 }
 0x15b   : > { %696 = vmatprep.mubr.bf16.mxu0 %v4332_v63  ;;  %v542_v43 = vadd.f32 %v4611_v37, %v519_v34  ;;  %v498_v44 = vmul.f32 %v4054_v21, %v4526_v11 }
 0x15c   : > { %v522_v49 = vmul.f32 %v4604_v35, %v499_v1  ;;  %4063 = vrsqrt.f32 %v473_v12 }
 0x15d   : > { %v555_v25 = vpack.c.bf16 %v543_v40, %v542_v43  ;;  %v521_v52 = vmul.f32 %v4604_v35, %v498_v44  ;;  %4065 = vrsqrt.f32 %v472_v30 }
 0x15e   : > { %v4056_v50 = vpop.eup %4055  ;;  %v545_v29 = vadd.f32 %v4611_v37, %v522_v49 }
 0x15f   : > { %v4058_v45 = vpop.eup %4057  ;;  %v501_v11 = vmul.f32 %v4056_v50, %v4541_v18  ;;  %v544_v53 = vadd.f32 %v4611_v37, %v521_v52 }
 0x160   : > { %v500_v54 = vmul.f32 %v4058_v45, %v4538_v24 }
 0x161   : > { %v556_v57 = vpack.c.bf16 %v545_v29, %v544_v53  ;;  %v524_v58 = vmul.f32 %v4604_v35, %v501_v11 }
 0x162   : > { %3196 = vmatmul.mubr.msk.bf16.gmra.mrb[8].mxu0 %vm296_vm0, %v554_v28  ;;  %v4060_v59 = vpop.eup %4059  ;;  %v523_v60 = vmul.f32 %v4604_v35, %v500_v54 }
 0x163   : > { %706 = vmatprep.mubr.bf16.mxu0 %v4332_v63  ;;  %v4062_v61 = vpop.eup %4061  ;;  %v547_v18 = vadd.f32 %v4611_v37, %v524_v58  ;;  %v503_v62 = vmul.f32 %v4060_v59, %v4553_v22 }
 0x164   : > { %v546_v38 = vadd.f32 %v4611_v37, %v523_v60  ;;  %v502_v24 = vmul.f32 %v4062_v61, %v4550_v36 }
 0x165   : > { %v526_v0 = vmul.f32 %v4604_v35, %v503_v62 }
 0x166   : > { %v557_v46 = vpack.c.bf16 %v547_v18, %v546_v38  ;;  %v4064_v3 = vpop.eup %4063  ;;  %v525_v4 = vmul.f32 %v4604_v35, %v502_v24 }
 0x167   : > { %v4066_v5 = vpop.eup %4065  ;;  %v549_v6 = vadd.f32 %v4611_v37, %v526_v0  ;;  %v505_v7 = vmul.f32 %v4064_v3, %v4565_v26  ;;  %v570_v26 = vlaneseq }
 0x168   : > { %v548_v22 = vadd.f32 %v4611_v37, %v525_v4  ;;  %v504_v8 = vmul.f32 %v4066_v5, %v4562_v48 }
 0x169   : > { %v528_v9 = vmul.f32 %v4604_v35, %v505_v7  ;;  %v4674_v15 = vshrl.u32 %v570_v26, 7 }
 0x16a   : > { %3197 = vmatmul.mubr.msk.bf16.gmra.mrb[12].mxu0 %vm296_vm0, %v555_v25  ;;  %v558_v36 = vpack.c.bf16 %v549_v6, %v548_v22  ;;  %v527_v10 = vmul.f32 %v4604_v35, %v504_v8 }
 0x16b   : > { %716 = vmatprep.mubr.bf16.mxu0 %v4332_v63  ;;  %v551_v13 = vadd.f32 %v4611_v37, %v528_v9  ;;  %5856 = vst [vmem:[#allocation2_spill] sm:$0xff] %v4674_v15  ;;  %v572_v48 = vsub.s32 0, %v4674_v15 }
 0x16c   : > { %v550_v14 = vadd.f32 %v4611_v37, %v527_v10 }
 0x16e   : > { %v559_v56 = vpack.c.bf16 %v551_v13, %v550_v14 }
 0x172   : > { %3198 = vmatmul.mubr.msk.bf16.gmra.mrb[16].mxu0 %vm296_vm0, %v556_v57 }
 0x173   : > { %726 = vmatprep.mubr.bf16.mxu0 %v4332_v63 }
 0x17a   : > { %3199 = vmatmul.mubr.msk.bf16.gmra.mrb[20].mxu0 %vm296_vm0, %v557_v46 }
 0x17b   : > { %736 = vmatprep.mubr.bf16.mxu0 %v4332_v63 }
 0x182   : > { %3200 = vmatmul.mubr.msk.bf16.gmra.mrb[24].mxu0 %vm296_vm0, %v558_v36 }
 0x183   : > { %746 = vmatprep.mubr.bf16.mxu0 %v4332_v63  ;;  %v4683_v63 = vrot.slane %v4680_v16, %v572_v48 }
 0x18a   : > { %3201 = vmatmul.mubr.msk.bf16.gmra.mrb[28].mxu0 %vm296_vm0, %v559_v56 }
 0x225   : > { %v678_v35 = vpop.f32.mrb[0].mxu0 }
 0x226   : > { %v679_v37 = vadd.f32 %v678_v35, %v4683_v63  ;;  %v4686_v55 = vpop.f32.mrb[1].mxu0 }
 0x227   : > { %v682_v19 = vpop.f32.mrb[2].mxu0 }
 0x228   : > { %v4688_v20 = vpop.f32.mrb[3].mxu0  ;;  %757 = vxpose.xlu0.b32.start [1/16] %v679_v37, 128  ;;  %v683_v23 = vadd.f32 %v682_v19, %v4683_v63 }
 0x22c   : > { %758 = vxpose.xlu0.b32.cont [2/16] %v683_v23, 128 }
 0x22d   : > { %v688_v17 = vpop.f32.mrb[4].mxu0 }
 0x22e   : > { %v689_v27 = vadd.f32 %v688_v17, %v4683_v63  ;;  %v4692_v28 = vpop.f32.mrb[5].mxu0 }
 0x22f   : > { %v692_v31 = vpop.f32.mrb[6].mxu0 }
 0x230   : > { %v4694_v32 = vpop.f32.mrb[7].mxu0  ;;  %759 = vxpose.xlu0.b32.cont [3/16] %v689_v27, 128  ;;  %v693_v33 = vadd.f32 %v692_v31, %v4683_v63 }
 0x234   : > { %760 = vxpose.xlu0.b32.cont [4/16] %v693_v33, 128 }
 0x235   : > { %v698_v34 = vpop.f32.mrb[8].mxu0 }
 0x236   : > { %v699_v21 = vadd.f32 %v698_v34, %v4683_v63  ;;  %v4698_v2 = vpop.f32.mrb[9].mxu0 }
 0x237   : > { %v702_v39 = vpop.f32.mrb[10].mxu0 }
 0x238   : > { %v4700_v40 = vpop.f32.mrb[11].mxu0  ;;  %761 = vxpose.xlu0.b32.cont [5/16] %v699_v21, 128  ;;  %v703_v1 = vadd.f32 %v702_v39, %v4683_v63  ;;  %v576_v39 = vsub.s32 1, %v4674_v15 }
 0x23c   : > { %762 = vxpose.xlu0.b32.cont [6/16] %v703_v1, 128  ;;  %v4738_v1 = vrot.slane %v4680_v16, %v576_v39 }
 0x23d   : > { %v708_v41 = vpop.f32.mrb[12].mxu0 }
 0x23e   : > { %v709_v42 = vadd.f32 %v708_v41, %v4683_v63  ;;  %v4704_v43 = vpop.f32.mrb[13].mxu0  ;;  %v681_v41 = vadd.f32 %v4686_v55, %v4738_v1 }
 0x23f   : > { %v712_v44 = vpop.f32.mrb[14].mxu0 }
 0x240   : > { %v4706_v47 = vpop.f32.mrb[15].mxu0  ;;  %763 = vxpose.xlu0.b32.cont [7/16] %v709_v42, 128  ;;  %v713_v25 = vadd.f32 %v712_v44, %v4683_v63  ;;  %v685_v42 = vadd.f32 %v4688_v20, %v4738_v1  ;;  %v691_v44 = vadd.f32 %v4692_v28, %v4738_v1  ;;  %v701_v20 = vadd.f32 %v4698_v2, %v4738_v1 }
 0x241   : > { %v705_v28 = vadd.f32 %v4700_v40, %v4738_v1  ;;  %v715_v40 = vadd.f32 %v4706_v47, %v4738_v1 }
 0x244   : > { %764 = vxpose.xlu0.b32.cont [8/16] %v713_v25, 128 }
 0x245   : > { %v718_v49 = vpop.f32.mrb[16].mxu0 }
 0x246   : > { %v719_v50 = vadd.f32 %v718_v49, %v4683_v63  ;;  %v4710_v51 = vpop.f32.mrb[17].mxu0  ;;  %v695_v49 = vadd.f32 %v4694_v32, %v4738_v1 }
 0x247   : > { %v722_v52 = vpop.f32.mrb[18].mxu0 }
 0x248   : > { %v4712_v45 = vpop.f32.mrb[19].mxu0  ;;  %765 = vxpose.xlu0.b32.cont [9/16] %v719_v50, 128  ;;  %v723_v12 = vadd.f32 %v722_v52, %v4683_v63 }
 0x24c   : > { %766 = vxpose.xlu0.b32.cont [10/16] %v723_v12, 128 }
 0x24d   : > { %v728_v29 = vpop.f32.mrb[20].mxu0 }
 0x24e   : > { %v729_v11 = vadd.f32 %v728_v29, %v4683_v63  ;;  %v4716_v30 = vpop.f32.mrb[21].mxu0 }
 0x24f   : > { %v732_v53 = vpop.f32.mrb[22].mxu0 }
 0x250   : > { %v4718_v54 = vpop.f32.mrb[23].mxu0  ;;  %767 = vxpose.xlu0.b32.cont [11/16] %v729_v11, 128  ;;  %v733_v57 = vadd.f32 %v732_v53, %v4683_v63 }
 0x254   : > { %768 = vxpose.xlu0.b32.cont [12/16] %v733_v57, 128  ;;  %v711_v57 = vadd.f32 %v4704_v43, %v4738_v1  ;;  %v721_v43 = vadd.f32 %v4710_v51, %v4738_v1  ;;  %v731_v51 = vadd.f32 %v4716_v30, %v4738_v1 }
 0x255   : > { %v738_v58 = vpop.f32.mrb[24].mxu0 }
 0x256   : > { %v739_v59 = vadd.f32 %v738_v58, %v4683_v63  ;;  %v4722_v60 = vpop.f32.mrb[25].mxu0 }
 0x257   : > { %v742_v61 = vpop.f32.mrb[26].mxu0  ;;  %v741_v30 = vadd.f32 %v4722_v60, %v4738_v1 }
 0x258   : > { %v4724_v18 = vpop.f32.mrb[27].mxu0  ;;  %769 = vxpose.xlu0.b32.cont [13/16] %v739_v59, 128  ;;  %v743_v62 = vadd.f32 %v742_v61, %v4683_v63 }
 0x25c   : > { %770 = vxpose.xlu0.b32.cont [14/16] %v743_v62, 128 }
 0x25d   : > { %v748_v38 = vpop.f32.mrb[28].mxu0 }
 0x25e   : > { %v749_v24 = vadd.f32 %v748_v38, %v4683_v63  ;;  %v4728_v46 = vpop.f32.mrb[29].mxu0 }
 0x25f   : > { %v752_v0 = vpop.f32.mrb[30].mxu0 }
 0x260   : > { %v4730_v3 = vpop.f32.mrb[31].mxu0  ;;  %771 = vxpose.xlu0.b32.cont [15/16] %v749_v24, 128  ;;  %v753_v4 = vadd.f32 %v752_v0, %v4683_v63  ;;  %v725_v24 = vadd.f32 %v4712_v45, %v4738_v1  ;;  %v735_v45 = vadd.f32 %v4718_v54, %v4738_v1 }
 0x264   : > { %772 = vxpose.xlu0.b32.end [16/16] %v753_v4, 128 }
 0x2a8   : > { %v773_v5 = vpop.trf.xlu0 }
 0x2ac   : > { %v774_v6 = vpop.trf.xlu0 }
 0x2b0   : > { %v775_v7 = vpop.trf.xlu0 }
 0x2b1   : > { %v3599_v22 = vpack.i.bf16 %v775_v7, %v773_v5 }
 0x2b3   : > { %3600 = vxpose.xlu1.b32.start [1/2] (short) %v3599_v22, 128 }
 0x2b4   : > { %v776_v8 = vpop.trf.xlu0 }
 0x2b5   : > { %v3601_v36 = vpack.i.bf16 %v776_v8, %v774_v6 }
 0x2b7   : > { %3602 = vxpose.xlu1.b32.end [2/2] (short) %v3601_v36, 128 }
 0x2b8   : > { %v777_v9 = vpop.trf.xlu0 }
 0x2bc   : > { %v778_v10 = vpop.trf.xlu0 }
 0x2c0   : > { %v779_v13 = vpop.trf.xlu0 }
 0x2c1   : > { %v3683_v27 = vpack.i.bf16 %v779_v13, %v777_v9  ;;  %v745_v13 = vadd.f32 %v4724_v18, %v4738_v1 }
 0x2c4   : > { %v780_v14 = vpop.trf.xlu0 }
 0x2c5   : > { %v3685_v33 = vpack.i.bf16 %v780_v14, %v778_v10 }
 0x2c8   : > { %v781_v56 = vpop.trf.xlu0 }
 0x2cc   : > { %v782_v48 = vpop.trf.xlu0 }
 0x2cd   : > { %v1141_v35 = vpack.c.bf16 %v782_v48, %v781_v56 }
 0x2cf   : > { %3363 = vmatprep.subr.bf16.mxu0 %v1141_v35  ;;  %3587 = vmatprep.subr.bf16.mxu1 %v1141_v35 }
 0x2d0   : > { %3364 = vmatpush3.bf16.msra.mxu0 %v1141_v35  ;;  %3588 = vmatpush3.bf16.msra.mxu1 %v1141_v35  ;;  %v783_v63 = vpop.trf.xlu0  ;;  %v751_v35 = vadd.f32 %v4728_v46, %v4738_v1 }
 0x2d4   : > { %v784_v37 = vpop.trf.xlu0 }
 0x2d5   : > { %v4733_v19 = vpack.c.bf16 %v784_v37, %v783_v63  ;;  %v755_v63 = vadd.f32 %v4730_v3, %v4738_v1 }
 0x2d7   : > { %3381 = vmatprep.subr.bf16.mxu1 %v4733_v19 }
 0x2d8   : > { %v785_v23 = vpop.trf.xlu0 }
 0x2dc   : > { %v786_v17 = vpop.trf.xlu0 }
 0x2dd   : > { %v1143_v6 = vpack.c.bf16 %v786_v17, %v785_v23 }
 0x2e0   : > { %v787_v31 = vpop.trf.xlu0 }
 0x2e4   : > { %v788_v34 = vpop.trf.xlu0 }
 0x2e5   : > { %v1144_v21 = vpack.c.bf16 %v788_v34, %v787_v31 }
 0x2e7   : > { %3417 = vmatprep.subr.bf16.mxu0 %v1144_v21 }
 0x2f0   : > { %3684 = vxpose.xlu1.b32.start [1/2] (short) %v3683_v27, 128 }
 0x2f4   : > { %3686 = vxpose.xlu1.b32.end [2/2] (short) %v3685_v33, 128 }
 0x32d   : > { %789 = vxpose.xlu1.b32.start [1/16] (narrow) %v681_v41, 64 }
 0x331   : > { %790 = vxpose.xlu1.b32.cont [2/16] (narrow) %v685_v42, 64 }
 0x333   : > { %v4746_v25 = vpop.trf.xlu1 }
 0x334   : > { %v3604_v16 = vunpack.i.l.bf16 %v4746_v25  ;;  %v3607_v34 = vunpack.i.h.bf16 %v4746_v25 }
 0x335   : > { %791 = vxpose.xlu1.b32.cont [3/16] (narrow) %v691_v44, 64 }
 0x337   : > { %v4750_v50 = vpop.trf.xlu1 }
 0x338   : > { %v3609_v55 = vunpack.i.l.bf16 %v4750_v50  ;;  %v3612_v27 = vunpack.i.h.bf16 %v4750_v50 }
 0x339   : > { %792 = vxpose.xlu1.b32.cont [4/16] (narrow) %v695_v49, 64 }
 0x33a   : > { %v949_v52 = vpack.c.bf16 %v3609_v55, %v3604_v16  ;;  %v957_v3 = vpack.c.bf16 %v3612_v27, %v3607_v34 }
 0x33b   : > { %v4756_v12 = vpop.trf.xlu1 }
 0x33c   : > { %3365 = vmatprep.mubr.msk.bf16.mxu0 %vm1145_vm1, %v949_v52  ;;  %v3614_v29 = vunpack.i.l.bf16 %v4756_v12  ;;  %v3617_v41 = vunpack.i.h.bf16 %v4756_v12 }
 0x33d   : > { %793 = vxpose.xlu1.b32.cont [5/16] (narrow) %v701_v20, 64 }
 0x33f   : > { %v4761_v32 = vpop.trf.xlu1 }
 0x340   : > { %v3619_v11 = vunpack.i.l.bf16 %v4761_v32  ;;  %v3622_v1 = vunpack.i.h.bf16 %v4761_v32 }
 0x341   : > { %794 = vxpose.xlu1.b32.cont [6/16] (narrow) %v705_v28, 64 }
 0x342   : > { %v950_v53 = vpack.c.bf16 %v3619_v11, %v3614_v29  ;;  %v958_v55 = vpack.c.bf16 %v3622_v1, %v3617_v41 }
 0x343   : > { %v4767_v2 = vpop.trf.xlu1 }
 0x344   : > { %3366 = vmatmul.mubr.msk.bf16.vlgmr.msra.gmra.mrb[32].mxu0 %vm1145_vm1, %v950_v53  ;;  %v3624_v61 = vunpack.i.l.bf16 %v4767_v2  ;;  %v3627_v16 = vunpack.i.h.bf16 %v4767_v2 }
 0x345   : > { %795 = vxpose.xlu1.b32.cont [7/16] (narrow) %v711_v57, 64  ;;  %3418 = vmatpush3.bf16.msra.mxu0 %v1144_v21 }
 0x347   : > { %v4772_v58 = vpop.trf.xlu1 }
 0x348   : > { %v3629_v59 = vunpack.i.l.bf16 %v4772_v58  ;;  %v3632_v42 = vunpack.i.h.bf16 %v4772_v58 }
 0x349   : > { %796 = vxpose.xlu1.b32.cont [8/16] (narrow) %v715_v40, 64 }
 0x34a   : > { %v951_v62 = vpack.c.bf16 %v3629_v59, %v3624_v61  ;;  %v959_v20 = vpack.c.bf16 %v3632_v42, %v3627_v16 }
 0x34b   : > { %v4778_v38 = vpop.trf.xlu1 }
 0x34c   : > { %3369 = vmatprep.mubr.msk.bf16.mxu1 %vm1145_vm1, %v951_v62  ;;  %v3634_v0 = vunpack.i.l.bf16 %v4778_v38  ;;  %v3637_v28 = vunpack.i.h.bf16 %v4778_v38 }
 0x34d   : > { %797 = vxpose.xlu1.b32.cont [9/16] (narrow) %v721_v43, 64 }
 0x34f   : > { %v4783_v47 = vpop.trf.xlu1 }
 0x350   : > { %v3639_v4 = vunpack.i.l.bf16 %v4783_v47  ;;  %v3642_v12 = vunpack.i.h.bf16 %v4783_v47 }
 0x351   : > { %798 = vxpose.xlu1.b32.cont [10/16] (narrow) %v725_v24, 64 }
 0x352   : > { %v952_v5 = vpack.c.bf16 %v3639_v4, %v3634_v0  ;;  %v960_v40 = vpack.c.bf16 %v3642_v12, %v3637_v28 }
 0x353   : > { %v4789_v7 = vpop.trf.xlu1 }
 0x354   : > { %3370 = vmatmul.mubr.msk.bf16.vlgmr.msra.gmra.mrb[0].mxu1 %vm1145_vm1, %v952_v5  ;;  %v3644_v8 = vunpack.i.l.bf16 %v4789_v7  ;;  %v3647_v57 = vunpack.i.h.bf16 %v4789_v7 }
 0x355   : > { %799 = vxpose.xlu1.b32.cont [11/16] (narrow) %v731_v51, 64  ;;  %3382 = vmatpush3.bf16.msra.mxu1 %v4733_v19 }
 0x356   : > { %3399 = vmatprep.subr.bf16.mxu1 %v1143_v6 }
 0x357   : > { %v4795_v22 = vpop.trf.xlu1 }
 0x358   : > { %v3649_v36 = vunpack.i.l.bf16 %v4795_v22  ;;  %v3652_v32 = vunpack.i.h.bf16 %v4795_v22 }
 0x359   : > { %800 = vxpose.xlu1.b32.cont [12/16] (narrow) %v735_v45, 64 }
 0x35a   : > { %v953_v9 = vpack.c.bf16 %v3649_v36, %v3644_v8  ;;  %v961_v59 = vpack.c.bf16 %v3652_v32, %v3647_v57 }
 0x35b   : > { %v4801_v10 = vpop.trf.xlu1 }
 0x35c   : > { %3373 = vmatprep.mubr.msk.bf16.mxu1 %vm1145_vm1, %v953_v9  ;;  %v3654_v14 = vunpack.i.l.bf16 %v4801_v10  ;;  %v3657_v24 = vunpack.i.h.bf16 %v4801_v10 }
 0x35d   : > { %801 = vxpose.xlu1.b32.cont [13/16] (narrow) %v741_v30, 64 }
 0x35f   : > { %v4806_v54 = vpop.trf.xlu1 }
 0x360   : > { %v3659_v56 = vunpack.i.l.bf16 %v4806_v54  ;;  %v3662_v61 = vunpack.i.h.bf16 %v4806_v54 }
 0x361   : > { %802 = vxpose.xlu1.b32.cont [14/16] (narrow) %v745_v13, 64 }
 0x362   : > { %v954_v48 = vpack.c.bf16 %v3659_v56, %v3654_v14  ;;  %v962_v4 = vpack.c.bf16 %v3662_v61, %v3657_v24 }
 0x363   : > { %v3663_v60 = vpop.trf.xlu1 }
 0x364   : > { %3374 = vmatmul.mubr.msk.bf16.gmra.mrb[4].mxu1 %vm1145_vm1, %v954_v48  ;;  %v3664_v18 = vunpack.i.l.bf16 %v3663_v60  ;;  %v3667_v0 = vunpack.i.h.bf16 %v3663_v60 }
 0x365   : > { %803 = vxpose.xlu1.b32.cont [15/16] (narrow) %v751_v35, 64 }
 0x367   : > { %v3668_v37 = vpop.trf.xlu1 }
 0x368   : > { %v3669_v19 = vunpack.i.l.bf16 %v3668_v37  ;;  %v3672_v43 = vunpack.i.h.bf16 %v3668_v37 }
 0x369   : > { %804 = vxpose.xlu1.b32.end [16/16] (narrow) %v755_v63, 64 }
 0x36a   : > { %v955_v23 = vpack.c.bf16 %v3669_v19, %v3664_v18  ;;  %v963_v51 = vpack.c.bf16 %v3672_v43, %v3667_v0  ;;  %v4858_v0 = vand.u32 127, %v570_v26 }
 0x36b   : > { %v4815_v17 = vpop.trf.xlu1 }
 0x36c   : > { %3377 = vmatprep.mubr.msk.bf16.mxu1 %vm1145_vm1, %v955_v23  ;;  %v3674_v46 = vunpack.i.l.bf16 %v4815_v17  ;;  %v3677_v36 = vunpack.i.h.bf16 %v4815_v17  ;;  %vm1632_vm2 = vcmp.lt.s32.totalorder %v4858_v0, 13 }
 0x36f   : > { %v3678_v31 = vpop.trf.xlu1 }
 0x370   : > { %v3679_v33 = vunpack.i.l.bf16 %v3678_v31  ;;  %v3682_v7 = vunpack.i.h.bf16 %v3678_v31 }
 0x372   : > { %v956_v21 = vpack.c.bf16 %v3679_v33, %v3674_v46  ;;  %v964_v10 = vpack.c.bf16 %v3682_v7, %v3677_v36 }
 0x373   : > { %v3687_v39 = vpop.trf.xlu1 }
 0x374   : > { %3378 = vmatmul.mubr.msk.bf16.gmra.mrb[8].mxu1 %vm1145_vm1, %v956_v21  ;;  %v3691_v49 = vunpack.i.h.bf16 %v3687_v39  ;;  %v3688_v30 = vunpack.i.l.bf16 %v3687_v39 }
 0x375   : > { %3383 = vmatprep.mubr.msk.bf16.mxu1 %vm1145_vm1, %v957_v3 }
 0x377   : > { %v3692_v44 = vpop.trf.xlu1 }
 0x378   : > { %v3696_v50 = vunpack.i.h.bf16 %v3692_v44  ;;  %v3693_v22 = vunpack.i.l.bf16 %v3692_v44 }
 0x37a   : > { %v973_v25 = vpack.c.bf16 %v3696_v50, %v3691_v49  ;;  %v965_v14 = vpack.c.bf16 %v3693_v22, %v3688_v30 }
 0x37b   : > { %v3697_v52 = vpop.trf.xlu1 }
 0x37c   : > { %3384 = vmatmul.mubr.msk.bf16.vlgmr.msra.gmra.mrb[12].mxu1 %vm1145_vm1, %v958_v55  ;;  %3419 = vmatprep.mubr.msk.bf16.mxu0 %vm1145_vm1, %v973_v25  ;;  %v3701_v11 = vunpack.i.h.bf16 %v3697_v52  ;;  %v3698_v37 = vunpack.i.l.bf16 %v3697_v52 }
 0x37d   : > { %3400 = vmatpush3.bf16.msra.mxu1 %v1143_v6  ;;  %3387 = vmatprep.mubr.msk.bf16.mxu1 %vm1145_vm1, %v959_v20 }
 0x37f   : > { %v3702_v29 = vpop.trf.xlu1 }
 0x380   : > { %v3706_v53 = vunpack.i.h.bf16 %v3702_v29  ;;  %v3703_v56 = vunpack.i.l.bf16 %v3702_v29 }
 0x382   : > { %v974_v2 = vpack.c.bf16 %v3706_v53, %v3701_v11  ;;  %v966_v19 = vpack.c.bf16 %v3703_v56, %v3698_v37 }
 0x383   : > { %v3707_v58 = vpop.trf.xlu1 }
 0x384   : > { %3388 = vmatmul.mubr.msk.bf16.gmra.mrb[16].mxu1 %vm1145_vm1, %v960_v40  ;;  %3420 = vmatmul.mubr.msk.bf16.vlgmr.msra.gmra.mrb[36].mxu0 %vm1145_vm1, %v974_v2  ;;  %v3711_v62 = vunpack.i.h.bf16 %v3707_v58  ;;  %v3708_v35 = vunpack.i.l.bf16 %v3707_v58 }
 0x385   : > { %3391 = vmatprep.mubr.msk.bf16.mxu1 %vm1145_vm1, %v961_v59 }
 0x387   : > { %v3712_v38 = vpop.trf.xlu1 }
 0x388   : > { %v3716_v47 = vunpack.i.h.bf16 %v3712_v38  ;;  %v3713_v60 = vunpack.i.l.bf16 %v3712_v38 }
 0x38a   : > { %v975_v5 = vpack.c.bf16 %v3716_v47, %v3711_v62  ;;  %v967_v27 = vpack.c.bf16 %v3713_v60, %v3708_v35 }
 0x38b   : > { %v3717_v6 = vpop.trf.xlu1 }
 0x38c   : > { %3392 = vmatmul.mubr.msk.bf16.gmra.mrb[20].mxu1 %vm1145_vm1, %v962_v4  ;;  %3423 = vmatprep.mubr.msk.bf16.mxu0 %vm1145_vm1, %v975_v5  ;;  %v3721_v45 = vunpack.i.h.bf16 %v3717_v6  ;;  %v3718_v33 = vunpack.i.l.bf16 %v3717_v6 }
 0x38d   : > { %3395 = vmatprep.mubr.msk.bf16.mxu1 %vm1145_vm1, %v963_v51 }
 0x38f   : > { %v3722_v8 = vpop.trf.xlu1 }
 0x390   : > { %v3726_v9 = vunpack.i.h.bf16 %v3722_v8  ;;  %v3723_v34 = vunpack.i.l.bf16 %v3722_v8 }
 0x392   : > { %v976_v13 = vpack.c.bf16 %v3726_v9, %v3721_v45  ;;  %v968_v41 = vpack.c.bf16 %v3723_v34, %v3718_v33 }
 0x393   : > { %v3727_v54 = vpop.trf.xlu1 }
 0x394   : > { %3396 = vmatmul.mubr.msk.bf16.gmra.mrb[24].mxu1 %vm1145_vm1, %v964_v10  ;;  %3424 = vmatmul.mubr.msk.bf16.gmra.mrb[40].mxu0 %vm1145_vm1, %v976_v13  ;;  %v3731_v48 = vunpack.i.h.bf16 %v3727_v54  ;;  %v3728_v31 = vunpack.i.l.bf16 %v3727_v54 }
 0x395   : > { %3401 = vmatprep.mubr.msk.bf16.mxu1 %vm1145_vm1, %v965_v14 }
 0x397   : > { %v3732_v63 = vpop.trf.xlu1 }
 0x398   : > { %v3736_v18 = vunpack.i.h.bf16 %v3732_v63  ;;  %v3733_v46 = vunpack.i.l.bf16 %v3732_v63 }
 0x39a   : > { %v977_v23 = vpack.c.bf16 %v3736_v18, %v3731_v48  ;;  %v969_v1 = vpack.c.bf16 %v3733_v46, %v3728_v31 }
 0x39b   : > { %v3737_v17 = vpop.trf.xlu1 }
 0x39c   : > { %3402 = vmatmul.mubr.msk.bf16.vlgmr.msra.gmra.mrb[28].mxu1 %vm1145_vm1, %v966_v19  ;;  %3427 = vmatprep.mubr.msk.bf16.mxu0 %vm1145_vm1, %v977_v23  ;;  %v3741_v21 = vunpack.i.h.bf16 %v3737_v17  ;;  %v3738_v44 = vunpack.i.l.bf16 %v3737_v17 }
 0x39d   : > { %3405 = vmatprep.mubr.msk.bf16.mxu1 %vm1145_vm1, %v967_v27 }
 0x39f   : > { %v3742_v39 = vpop.trf.xlu1 }
 0x3a0   : > { %v3746_v3 = vunpack.i.h.bf16 %v3742_v39  ;;  %v3743_v49 = vunpack.i.l.bf16 %v3742_v39 }
 0x3a2   : > { %v978_v42 = vpack.c.bf16 %v3746_v3, %v3741_v21  ;;  %v970_v52 = vpack.c.bf16 %v3743_v49, %v3738_v44 }
 0x3a3   : > { %v3747_v50 = vpop.trf.xlu1 }
 0x3a4   : > { %3406 = vmatmul.mubr.msk.bf16.gmra.mrb[32].mxu1 %vm1145_vm1, %v968_v41  ;;  %3428 = vmatmul.mubr.msk.bf16.gmra.mrb[44].mxu0 %vm1145_vm1, %v978_v42  ;;  %v3751_v16 = vunpack.i.h.bf16 %v3747_v50  ;;  %v3748_v55 = vunpack.i.l.bf16 %v3747_v50 }
 0x3a5   : > { %3409 = vmatprep.mubr.msk.bf16.mxu1 %vm1145_vm1, %v969_v1 }
 0x3a7   : > { %v3752_v25 = vpop.trf.xlu1 }
 0x3a8   : > { %v3756_v20 = vunpack.i.h.bf16 %v3752_v25  ;;  %v3753_v12 = vunpack.i.l.bf16 %v3752_v25 }
 0x3aa   : > { %v979_v28 = vpack.c.bf16 %v3756_v20, %v3751_v16  ;;  %v971_v32 = vpack.c.bf16 %v3753_v12, %v3748_v55 }
 0x3ab   : > { %v3757_v29 = vpop.trf.xlu1 }
 0x3ac   : > { %3410 = vmatmul.mubr.msk.bf16.gmra.mrb[36].mxu1 %vm1145_vm1, %v970_v52  ;;  %3431 = vmatprep.mubr.msk.bf16.mxu0 %vm1145_vm1, %v979_v28  ;;  %v3761_v11 = vunpack.i.h.bf16 %v3757_v29  ;;  %v3758_v53 = vunpack.i.l.bf16 %v3757_v29 }
 0x3ad   : > { %3413 = vmatprep.mubr.msk.bf16.mxu1 %vm1145_vm1, %v971_v32 }
 0x3af   : > { %v3762_v57 = vpop.trf.xlu1 }
 0x3b0   : > { %v3766_v2 = vunpack.i.h.bf16 %v3762_v57  ;;  %v3763_v40 = vunpack.i.l.bf16 %v3762_v57 }
 0x3b2   : > { %v980_v58 = vpack.c.bf16 %v3766_v2, %v3761_v11  ;;  %v972_v59 = vpack.c.bf16 %v3763_v40, %v3758_v53 }
 0x3b3   : > { %v805_v61 = vpop.trf.xlu1 }
 0x3b4   : > { %3432 = vmatmul.mubr.msk.bf16.gmra.mrb[48].mxu0 %vm1145_vm1, %v980_v58  ;;  %3414 = vmatmul.mubr.msk.bf16.gmra.mrb[40].mxu1 %vm1145_vm1, %v972_v59 }
 0x3b7   : > { %v806_v62 = vpop.trf.xlu1 }
 0x3bb   : > { %v807_v43 = vpop.trf.xlu1 }
 0x3bc   : > { %v3767_v38 = vpack.i.bf16 %v807_v43, %v805_v61 }
 0x3be   : > { %3768 = vxpose.xlu0.b32.start [1/2] (short) %v3767_v38, 128 }
 0x3bf   : > { %v808_v24 = vpop.trf.xlu1 }
 0x3c0   : > { %v3769_v47 = vpack.i.bf16 %v808_v24, %v806_v62 }
 0x3c2   : > { %3770 = vxpose.xlu0.b32.end [2/2] (short) %v3769_v47, 128 }
 0x417   : > { %v3367_v4 = vpop.f32.mrb[32].mxu0 }
 0x418   : > { %v1204_v5 = vpop.f32.mrb[33].mxu0  ;;  %v4868_v45 = vsel %vm1632_vm2, %v3367_v4, -1e+30 }
 0x419   : > { %v3368_v6 = vpop.f32.mrb[34].mxu0  ;;  %v4873_v36 = vsel %vm1632_vm2, %v1204_v5, -1e+30 }
 0x41a   : > { %v1207_v51 = vpop.f32.mrb[35].mxu0  ;;  %v4878_v30 = vsel %vm1632_vm2, %v3368_v6, -1e+30 }
 0x41b   : > { %v4863_v7 = vsel %vm1632_vm2, %v1207_v51, -1e+30 }
 0x41c   : > { %1701 = vmax.xlane.f32.xlu1 %v4863_v7 }
 0x427   : > { %v3371_v22 = vpop.f32.mrb[0].mxu1  ;;  %1703 = vmax.xlane.f32.xlu0 %v4868_v45 }
 0x428   : > { %v1220_v26 = vpop.f32.mrb[1].mxu1  ;;  %v4883_v10 = vsel %vm1632_vm2, %v3371_v22, -1e+30 }
 0x429   : > { %v3372_v8 = vpop.f32.mrb[2].mxu1  ;;  %v4888_v13 = vsel %vm1632_vm2, %v1220_v26, -1e+30 }
 0x42a   : > { %v1223_v9 = vpop.f32.mrb[3].mxu1  ;;  %v4899_v48 = vsel %vm1632_vm2, %v3372_v8, -1e+30 }
 0x42b   : > { %1699 = vmax.xlane.f32.xlu0 %v4873_v36  ;;  %v4906_v60 = vsel %vm1632_vm2, %v1223_v9, -1e+30 }
 0x42f   : > { %1705 = vmax.xlane.f32.xlu0 %v4878_v30 }
 0x433   : > { %1711 = vmax.xlane.f32.xlu0 %v4883_v10 }
 0x437   : > { %v4890_v54 = vpop.f32.mrb[4].mxu1  ;;  %1707 = vmax.xlane.f32.xlu0 %v4888_v13 }
 0x438   : > { %v4893_v14 = vpop.f32.mrb[5].mxu1 }
 0x439   : > { %v4895_v56 = vpop.f32.mrb[6].mxu1 }
 0x43a   : > { %v4901_v35 = vpop.f32.mrb[7].mxu1 }
 0x43b   : > { %1713 = vmax.xlane.f32.xlu0 %v4899_v48 }
 0x43e   : > { %v3771_v63 = vpop.trf.xlu0 }
 0x43f   : > { %1709 = vmax.xlane.f32.xlu0 %v4906_v60  ;;  %v3772_v37 = vunpack.i.l.bf16 %v3771_v63  ;;  %v3775_v18 = vunpack.i.h.bf16 %v3771_v63 }
 0x442   : > { %v3776_v19 = vpop.trf.xlu0 }
 0x443   : > { %v3777_v23 = vunpack.i.l.bf16 %v3776_v19  ;;  %v3780_v17 = vunpack.i.h.bf16 %v3776_v19 }
 0x445   : > { %v1109_v27 = vpack.c.bf16 %v3777_v23, %v3772_v37  ;;  %v1117_v31 = vpack.c.bf16 %v3780_v17, %v3775_v18  ;;  %v4958_v23 = vsel %vm1632_vm2, %v4890_v54, -1e+30 }
 0x446   : > { %v3781_v46 = vpop.trf.xlu0 }
 0x447   : > { %v4909_v33 = vpop.f32.mrb[8].mxu1  ;;  %3435 = vmatprep.subr.bf16.mxu1 %v1109_v27  ;;  %3467 = vmatprep.subr.bf16.mxu0 %v1117_v31  ;;  %v3782_v39 = vunpack.i.l.bf16 %v3781_v46  ;;  %v3785_v41 = vunpack.i.h.bf16 %v3781_v46 }
 0x448   : > { %v4911_v34 = vpop.f32.mrb[9].mxu1  ;;  %3436 = vmatpush3.bf16.msra.mxu1 %v1109_v27  ;;  %3468 = vmatpush3.bf16.msra.mxu0 %v1117_v31  ;;  %v4968_v31 = vsel %vm1632_vm2, %v4893_v14, -1e+30 }
 0x449   : > { %v4913_v21 = vpop.f32.mrb[10].mxu1 }
 0x44a   : > { %v4915_v3 = vpop.f32.mrb[11].mxu1  ;;  %v3786_v1 = vpop.trf.xlu0 }
 0x44b   : > { %v3787_v42 = vunpack.i.l.bf16 %v3786_v1  ;;  %v3790_v44 = vunpack.i.h.bf16 %v3786_v1 }
 0x44d   : > { %v1110_v49 = vpack.c.bf16 %v3787_v42, %v3782_v39  ;;  %v1118_v16 = vpack.c.bf16 %v3790_v44, %v3785_v41  ;;  %v4976_v44 = vsel %vm1632_vm2, %v4895_v56, -1e+30 }
 0x44e   : > { %v3791_v50 = vpop.trf.xlu0 }
 0x44f   : > { %v4917_v55 = vpop.f32.mrb[12].mxu1  ;;  %3437 = vmatprep.subr.bf16.mxu1 %v1110_v49  ;;  %3469 = vmatprep.subr.bf16.mxu0 %v1118_v16  ;;  %v3792_v20 = vunpack.i.l.bf16 %v3791_v50  ;;  %v3795_v32 = vunpack.i.h.bf16 %v3791_v50 }
 0x450   : > { %v4919_v25 = vpop.f32.mrb[13].mxu1  ;;  %3438 = vmatpush3.bf16.msra.mxu1 %v1110_v49  ;;  %3470 = vmatpush3.bf16.msra.mxu0 %v1118_v16 }
 0x451   : > { %v4921_v52 = vpop.f32.mrb[14].mxu1 }
 0x452   : > { %v4923_v12 = vpop.f32.mrb[15].mxu1  ;;  %v3796_v28 = vpop.trf.xlu0 }
 0x453   : > { %v3797_v29 = vunpack.i.l.bf16 %v3796_v28  ;;  %v3800_v11 = vunpack.i.h.bf16 %v3796_v28 }
 0x455   : > { %v1111_v53 = vpack.c.bf16 %v3797_v29, %v3792_v20  ;;  %v1119_v2 = vpack.c.bf16 %v3800_v11, %v3795_v32  ;;  %v4993_v11 = vsel %vm1632_vm2, %v4901_v35, -1e+30 }
 0x456   : > { %v3801_v57 = vpop.trf.xlu0 }
 0x457   : > { %v4925_v40 = vpop.f32.mrb[16].mxu1  ;;  %v3421_v58 = vpop.f32.mrb[36].mxu0  ;;  %3439 = vmatprep.subr.bf16.mxu1 %v1111_v53  ;;  %3471 = vmatprep.subr.bf16.mxu0 %v1119_v2  ;;  %v3802_v5 = vunpack.i.l.bf16 %v3801_v57  ;;  %v3805_v6 = vunpack.i.h.bf16 %v3801_v57 }
 0x458   : > { %v4929_v59 = vsel %vm1632_vm2, %v3421_v58, -1e+30  ;;  %v4931_v61 = vpop.f32.mrb[17].mxu1  ;;  %v1567_v62 = vpop.f32.mrb[37].mxu0  ;;  %3440 = vmatpush3.bf16.msra.mxu1 %v1111_v53  ;;  %3472 = vmatpush3.bf16.msra.mxu0 %v1119_v2 }
 0x459   : > { %v4933_v43 = vpop.f32.mrb[18].mxu1  ;;  %1799 = vmax.xlane.f32.xlu1 %v4929_v59  ;;  %v3422_v38 = vpop.f32.mrb[38].mxu0  ;;  %v4944_v51 = vsel %vm1632_vm2, %v1567_v62, -1e+30 }
 0x45a   : > { %v4938_v24 = vsel %vm1632_vm2, %v3422_v38, -1e+30  ;;  %v4940_v47 = vpop.f32.mrb[19].mxu1  ;;  %v1570_v4 = vpop.f32.mrb[39].mxu0 }
 0x45b   : > { %1801 = vmax.xlane.f32.xlu0 %v4938_v24  ;;  %v3806_v22 = vpop.trf.xlu0  ;;  %v4950_v9 = vsel %vm1632_vm2, %v1570_v4, -1e+30 }
 0x45c   : > { %v3807_v26 = vunpack.i.l.bf16 %v3806_v22  ;;  %v3810_v8 = vunpack.i.h.bf16 %v3806_v22 }
 0x45d   : > { %1795 = vmax.xlane.f32.xlu1 %v4944_v51 }
 0x45e   : > { %v1112_v63 = vpack.c.bf16 %v3807_v26, %v3802_v5  ;;  %v1120_v37 = vpack.c.bf16 %v3810_v8, %v3805_v6  ;;  %v5013_v6 = vsel %vm1632_vm2, %v4909_v33, -1e+30 }
 0x45f   : > { %v4952_v18 = vpop.f32.mrb[20].mxu1  ;;  %1797 = vmax.xlane.f32.xlu0 %v4950_v9  ;;  %v3811_v19 = vpop.trf.xlu0 }
 0x460   : > { %v4960_v17 = vpop.f32.mrb[21].mxu1  ;;  %3441 = vmatprep.subr.bf16.mxu1 %v1112_v63  ;;  %3473 = vmatprep.subr.bf16.mxu0 %v1120_v37  ;;  %v3812_v39 = vunpack.i.l.bf16 %v3811_v19  ;;  %v3815_v54 = vunpack.i.h.bf16 %v3811_v19 }
 0x461   : > { %v4962_v27 = vpop.f32.mrb[22].mxu1  ;;  %1719 = vmax.xlane.f32.xlu1 %v4958_v23  ;;  %3442 = vmatpush3.bf16.msra.mxu1 %v1112_v63 }
 0x462   : > { %v4970_v46 = vpop.f32.mrb[23].mxu1  ;;  %3474 = vmatpush3.bf16.msra.mxu0 %v1120_v37 }
 0x463   : > { %1715 = vmax.xlane.f32.xlu0 %v4968_v31  ;;  %v3816_v1 = vpop.trf.xlu0 }
 0x464   : > { %v3817_v41 = vunpack.i.l.bf16 %v3816_v1  ;;  %v3820_v42 = vunpack.i.h.bf16 %v3816_v1  ;;  %v5030_v1 = vsel %vm1632_vm2, %v4911_v34, -1e+30 }
 0x466   : > { %v1113_v49 = vpack.c.bf16 %v3817_v41, %v3812_v39  ;;  %v1121_v50 = vpack.c.bf16 %v3820_v42, %v3815_v54  ;;  %v5036_v41 = vsel %vm1632_vm2, %v4913_v21, -1e+30 }
 0x467   : > { %v4978_v16 = vpop.f32.mrb[24].mxu1  ;;  %1721 = vmax.xlane.f32.xlu0 %v4976_v44  ;;  %v3425_v14 = vpop.f32.mrb[40].mxu0 }
 0x468   : > { %v4983_v20 = vsel %vm1632_vm2, %v3425_v14, -1e+30  ;;  %v4985_v28 = vpop.f32.mrb[25].mxu1  ;;  %v1583_v32 = vpop.f32.mrb[41].mxu0  ;;  %3443 = vmatprep.subr.bf16.mxu1 %v1113_v49  ;;  %3475 = vmatprep.subr.bf16.mxu0 %v1121_v50 }
 0x469   : > { %v4987_v29 = vpop.f32.mrb[26].mxu1  ;;  %1807 = vmax.xlane.f32.xlu1 %v4983_v20  ;;  %v3426_v56 = vpop.f32.mrb[42].mxu0  ;;  %3444 = vmatpush3.bf16.msra.mxu1 %v1113_v49  ;;  %v5000_v58 = vsel %vm1632_vm2, %v1583_v32, -1e+30 }
 0x46a   : > { %v4995_v53 = vpop.f32.mrb[27].mxu1  ;;  %v1586_v57 = vpop.f32.mrb[43].mxu0  ;;  %3476 = vmatpush3.bf16.msra.mxu0 %v1121_v50  ;;  %v5005_v62 = vsel %vm1632_vm2, %v3426_v56, -1e+30  ;;  %v5053_v56 = vsel %vm1632_vm2, %v4915_v3, -1e+30 }
 0x46b   : > { %1717 = vmax.xlane.f32.xlu0 %v4993_v11  ;;  %v3821_v2 = vpop.trf.xlu0  ;;  %v5022_v37 = vsel %vm1632_vm2, %v1586_v57, -1e+30  ;;  %5858 = vst [vmem:[#allocation4_spill] sm:$0xff] %v5053_v56  ;;  %v5066_v3 = vsel %vm1632_vm2, %v4917_v55, -1e+30 }
 0x46c   : > { %v3822_v38 = vunpack.i.l.bf16 %v3821_v2  ;;  %v3825_v5 = vunpack.i.h.bf16 %v3821_v2  ;;  %5860 = vst [vmem:[#allocation6_spill] sm:$0xff] %v5066_v3 }
 0x46d   : > { %1803 = vmax.xlane.f32.xlu1 %v5000_v58 }
 0x46f   : > { %v5007_v35 = vpop.f32.mrb[28].mxu1  ;;  %1809 = vmax.xlane.f32.xlu0 %v5005_v62  ;;  %v3826_v4 = vpop.trf.xlu0 }
 0x470   : > { %v5015_v22 = vpop.f32.mrb[29].mxu1  ;;  %v3827_v26 = vunpack.i.l.bf16 %v3826_v4  ;;  %v3830_v63 = vunpack.i.h.bf16 %v3826_v4 }
 0x471   : > { %v5017_v8 = vpop.f32.mrb[30].mxu1  ;;  %1727 = vmax.xlane.f32.xlu1 %v5013_v6 }
 0x472   : > { %v5024_v19 = vpop.f32.mrb[31].mxu1  ;;  %v1114_v39 = vpack.c.bf16 %v3827_v26, %v3822_v38  ;;  %v1122_v33 = vpack.c.bf16 %v3830_v63, %v3825_v5 }
 0x473   : > { %1805 = vmax.xlane.f32.xlu0 %v5022_v37  ;;  %v3831_v54 = vpop.trf.xlu0 }
 0x474   : > { %3445 = vmatprep.subr.bf16.mxu1 %v1114_v39  ;;  %3477 = vmatprep.subr.bf16.mxu0 %v1122_v33  ;;  %v3832_v4 = vunpack.i.l.bf16 %v3831_v54  ;;  %v3835_v5 = vunpack.i.h.bf16 %v3831_v54  ;;  %v5074_v54 = vsel %vm1632_vm2, %v4952_v18, -1e+30 }
 0x475   : > { %1723 = vmax.xlane.f32.xlu1 %v5030_v1  ;;  %3446 = vmatpush3.bf16.msra.mxu1 %v1114_v39  ;;  %5861 = vst [vmem:[#allocation7_spill] sm:$0xff] %v5074_v54 }
 0x476   : > { %3478 = vmatpush3.bf16.msra.mxu0 %v1122_v33 }
 0x477   : > { %v5038_v42 = vpop.f32.mrb[32].mxu1  ;;  %1729 = vmax.xlane.f32.xlu0 %v5036_v41  ;;  %v3429_v49 = vpop.f32.mrb[44].mxu0 }
 0x478   : > { %v5043_v34 = vsel %vm1632_vm2, %v3429_v49, -1e+30  ;;  %v5045_v50 = vpop.f32.mrb[33].mxu1  ;;  %v1599_v14 = vpop.f32.mrb[45].mxu0 }
 0x479   : > { %5857 = vst [vmem:[#allocation3_spill] sm:$0xff] %v5043_v34  ;;  %v5047_v32 = vpop.f32.mrb[34].mxu1  ;;  %1815 = vmax.xlane.f32.xlu1 %v5043_v34  ;;  %v3430_v21 = vpop.f32.mrb[46].mxu0  ;;  %v5059_v2 = vsel %vm1632_vm2, %v1599_v14, -1e+30 }
 0x47a   : > { %v5055_v57 = vpop.f32.mrb[35].mxu1  ;;  %5859 = vst [vmem:[#allocation5_spill] sm:$0xff] %v5059_v2  ;;  %v1602_v38 = vpop.f32.mrb[47].mxu0 }
 0x47b   : > { %1725 = vmax.xlane.f32.xlu0 %v5053_v56  ;;  %v3836_v26 = vpop.trf.xlu0 }
 0x47c   : > { %v3837_v63 = vunpack.i.l.bf16 %v3836_v26  ;;  %v3840_v39 = vunpack.i.h.bf16 %v3836_v26 }
 0x47d   : > { %1811 = vmax.xlane.f32.xlu1 %v5059_v2 }
 0x47e   : > { %v1115_v33 = vpack.c.bf16 %v3837_v63, %v3832_v4  ;;  %v1123_v49 = vpack.c.bf16 %v3840_v39, %v3835_v5  ;;  %v5084_v4 = vsel %vm1632_vm2, %v4919_v25, -1e+30 }
 0x47f   : > { %1735 = vmax.xlane.f32.xlu0 %v5066_v3  ;;  %v5069_v14 = vpop.f32.mrb[36].mxu1  ;;  %v3841_v15 = vpop.trf.xlu0  ;;  %5862 = vst [vmem:[#allocation8_spill] sm:$0xff] %v5084_v4 }
 0x480   : > { %v5076_v26 = vpop.f32.mrb[37].mxu1  ;;  %3447 = vmatprep.subr.bf16.mxu1 %v1115_v33  ;;  %3479 = vmatprep.subr.bf16.mxu0 %v1123_v49  ;;  %v3842_v63 = vunpack.i.l.bf16 %v3841_v15  ;;  %v3845_v18 = vunpack.i.h.bf16 %v3841_v15 }
 0x481   : > { %1751 = vmax.xlane.f32.xlu1 %v5074_v54  ;;  %v5079_v55 = vpop.f32.mrb[38].mxu1  ;;  %3448 = vmatpush3.bf16.msra.mxu1 %v1115_v33  ;;  %v5092_v54 = vsel %vm1632_vm2, %v4921_v52, -1e+30 }
 0x482   : > { %v5086_v5 = vpop.f32.mrb[39].mxu1  ;;  %3480 = vmatpush3.bf16.msra.mxu0 %v1123_v49 }
 0x483   : > { %1731 = vmax.xlane.f32.xlu0 %v5084_v4  ;;  %v3846_v39 = vpop.trf.xlu0 }
 0x484   : > { %v3847_v34 = vunpack.i.l.bf16 %v3846_v39  ;;  %v3850_v2 = vunpack.i.h.bf16 %v3846_v39 }
 0x486   : > { %v1116_v33 = vpack.c.bf16 %v3847_v34, %v3842_v63  ;;  %v1124_v3 = vpack.c.bf16 %v3850_v2, %v3845_v18  ;;  %v5104_v34 = vsel %vm1632_vm2, %v3430_v21, -1e+30  ;;  %v5112_v18 = vsel %vm1632_vm2, %v4960_v17, -1e+30 }
 0x487   : > { %1737 = vmax.xlane.f32.xlu0 %v5092_v54  ;;  %v3433_v25 = vpop.f32.mrb[48].mxu0  ;;  %v3415_v56 = vpop.f32.mrb[40].mxu1  ;;  %v5134_v17 = vsel %vm1632_vm2, %v4978_v16, -1e+30  ;;  %v5152_v16 = vsel %vm1632_vm2, %v4931_v61, -1e+30 }
 0x488   : > { %v5097_v49 = vsel %vm1632_vm2, %v3433_v25, -1e+30  ;;  %v1615_v15 = vpop.f32.mrb[49].mxu0  ;;  %v1494_v4 = vpop.f32.mrb[41].mxu1  ;;  %3449 = vmatprep.subr.bf16.mxu1 %v1116_v33  ;;  %3481 = vmatprep.subr.bf16.mxu0 %v1124_v3  ;;  %v5170_v61 = vsel %vm1632_vm2, %v5015_v22, -1e+30 }
 0x489   : > { %5863 = vst [vmem:[#allocation9_spill] sm:$0xff] %v5097_v49  ;;  %1823 = vmax.xlane.f32.xlu1 %v5097_v49  ;;  %v5100_v39 = vpop.f32.mrb[42].mxu1  ;;  %v3434_v52 = vpop.f32.mrb[50].mxu0  ;;  %3450 = vmatpush3.bf16.msra.mxu1 %v1116_v33  ;;  %v5118_v33 = vsel %vm1632_vm2, %v4923_v12, -1e+30 }
 0x48a   : > { %v5106_v2 = vpop.f32.mrb[43].mxu1  ;;  %v1618_v63 = vpop.f32.mrb[51].mxu0  ;;  %3482 = vmatpush3.bf16.msra.mxu0 %v1124_v3  ;;  %v5122_v21 = vsel %vm1632_vm2, %v1615_v15, -1e+30  ;;  %v5128_v3 = vsel %vm1632_vm2, %v1602_v38, -1e+30 }
 0x48b   : > { %1817 = vmax.xlane.f32.xlu0 %v5104_v34  ;;  %v5140_v12 = vsel %vm1632_vm2, %v4925_v40, -1e+30  ;;  %v5146_v38 = vsel %vm1632_vm2, %v4985_v28, -1e+30  ;;  %v5158_v40 = vsel %vm1632_vm2, %v5007_v35, -1e+30 }
 0x48c   : > { %v5164_v28 = vsel %vm1632_vm2, %v4933_v43, -1e+30  ;;  %v5176_v35 = vsel %vm1632_vm2, %v4940_v47, -1e+30  ;;  %v5182_v43 = vsel %vm1632_vm2, %v5038_v42, -1e+30 }
 0x48d   : > { %1747 = vmax.xlane.f32.xlu1 %v5112_v18  ;;  %v5188_v22 = vsel %vm1632_vm2, %v4962_v27, -1e+30  ;;  %v5194_v47 = vsel %vm1632_vm2, %v5045_v50, -1e+30  ;;  %v5199_v42 = vsel %vm1632_vm2, %v3434_v52, -1e+30  ;;  %v5247_v52 = vpop.trf.xlu1 }
 0x48e   : > { %5864 = vst [vmem:[#allocation10_spill] sm:$0xff] %v5199_v42  ;;  %v5205_v27 = vsel %vm1632_vm2, %v5069_v14, -1e+30  ;;  %v5211_v50 = vsel %vm1632_vm2, %v4970_v46, -1e+30  ;;  %5868 = vst [vmem:[#allocation14_spill] sm:$0xff] %v5247_v52 }
 0x48f   : > { %1733 = vmax.xlane.f32.xlu0 %v5118_v33  ;;  %v5217_v25 = vsel %vm1632_vm2, %v5076_v26, -1e+30  ;;  %v5222_v14 = vsel %vm1632_vm2, %v1618_v63, -1e+30  ;;  %v5227_v15 = vsel %vm1632_vm2, %v3415_v56, -1e+30 }
 0x490   : > { %5865 = vst [vmem:[#allocation11_spill] sm:$0xff] %v5222_v14  ;;  %5866 = vst [vmem:[#allocation12_spill] sm:$0xff] %v5227_v15  ;;  %v5233_v46 = vsel %vm1632_vm2, %v4987_v29, -1e+30  ;;  %v5238_v26 = vsel %vm1632_vm2, %v1494_v4, -1e+30 }
 0x491   : > { %1819 = vmax.xlane.f32.xlu1 %v5122_v21  ;;  %5867 = vst [vmem:[#allocation13_spill] sm:$0xff] %v5238_v26  ;;  %v5244_v56 = vsel %vm1632_vm2, %v4995_v53, -1e+30  ;;  %v5252_v29 = vsel %vm1632_vm2, %v5017_v8, -1e+30 }
 0x492   : > { %v5258_v63 = vsel %vm1632_vm2, %v5024_v19, -1e+30  ;;  %v5266_v53 = vsel %vm1632_vm2, %v5047_v32, -1e+30  ;;  %v5274_v49 = vsel %vm1632_vm2, %v5055_v57, -1e+30 }
 0x493   : > { %1813 = vmax.xlane.f32.xlu0 %v5128_v3  ;;  %v5281_v32 = vsel %vm1632_vm2, %v5079_v55, -1e+30  ;;  %v5290_v57 = vsel %vm1632_vm2, %v5086_v5, -1e+30 }
 0x495   : > { %1759 = vmax.xlane.f32.xlu1 %v5134_v17 }
 0x497   : > { %1743 = vmax.xlane.f32.xlu0 %v5140_v12 }
 0x499   : > { %1755 = vmax.xlane.f32.xlu1 %v5146_v38 }
 0x49b   : > { %1739 = vmax.xlane.f32.xlu0 %v5152_v16 }
 0x49d   : > { %1767 = vmax.xlane.f32.xlu1 %v5158_v40 }
 0x49f   : > { %1745 = vmax.xlane.f32.xlu0 %v5164_v28 }
 0x4a1   : > { %1763 = vmax.xlane.f32.xlu1 %v5170_v61 }
 0x4a3   : > { %1741 = vmax.xlane.f32.xlu0 %v5176_v35 }
 0x4a5   : > { %1775 = vmax.xlane.f32.xlu1 %v5182_v43 }
 0x4a7   : > { %1753 = vmax.xlane.f32.xlu0 %v5188_v22 }
 0x4a9   : > { %1771 = vmax.xlane.f32.xlu1 %v5194_v47 }
 0x4ab   : > { %1825 = vmax.xlane.f32.xlu0 %v5199_v42  ;;  %v5260_v42 = vpop.trf.xlu1 }
 0x4ac   : > { %5869 = vst [vmem:[#allocation15_spill] sm:$0xff] %v5260_v42 }
 0x4ad   : > { %1783 = vmax.xlane.f32.xlu1 %v5205_v27 }
 0x4af   : > { %1749 = vmax.xlane.f32.xlu0 %v5211_v50  ;;  %v5269_v8 = vpop.trf.xlu1 }
 0x4b0   : > { %5870 = vst [vmem:[#allocation16_spill] sm:$0xff] %v5269_v8 }
 0x4b1   : > { %1779 = vmax.xlane.f32.xlu1 %v5217_v25 }
 0x4b3   : > { %1821 = vmax.xlane.f32.xlu0 %v5222_v14 }
 0x4b4   : > { %v1704_v4 = vpop.xlane.xlu0 %1703 }
 0x4b5   : > { %1791 = vmax.xlane.f32.xlu1 %v5227_v15  ;;  %v1829_v19 = vsub.f32 %v4868_v45, %v1704_v4 }
 0x4b7   : > { %1761 = vmax.xlane.f32.xlu0 %v5233_v46  ;;  %v1895_v8 = vmul.f32 1.442695, %v1829_v19 }
 0x4b8   : > { %v1700_v52 = vpop.xlane.xlu0 %1699 }
 0x4b9   : > { %1787 = vmax.xlane.f32.xlu1 %v5238_v26  ;;  %v5283_v26 = vpop.trf.xlu1  ;;  %v1827_v15 = vsub.f32 %v4873_v36, %v1700_v52  ;;  %4067 = vpow2.f32 %v1895_v8  ;;  %v5304_v8 = vsel %vm1632_vm2, %v5106_v2, -1e+30 }
 0x4ba   : > { %5871 = vst [vmem:[#allocation17_spill] sm:$0xff] %v5283_v26  ;;  %v5297_v26 = vsel %vm1632_vm2, %v5100_v39, -1e+30 }
 0x4bb   : > { %1757 = vmax.xlane.f32.xlu0 %v5244_v56  ;;  %v1891_v45 = vmul.f32 1.442695, %v1827_v15 }
 0x4bc   : > { %v1706_v42 = vpop.xlane.xlu0 %1705 }
 0x4bd   : > { %v1830_v55 = vsub.f32 %v4878_v30, %v1706_v42  ;;  %v1702_v4 = vpop.xlane.xlu1 %1701  ;;  %4069 = vpow2.f32 %v1891_v45 }
 0x4be   : > { %v1828_v36 = vsub.f32 %v4863_v7, %v1702_v4 }
 0x4bf   : > { %1769 = vmax.xlane.f32.xlu0 %v5252_v29  ;;  %v1897_v5 = vmul.f32 1.442695, %v1830_v55 }
 0x4c0   : > { %v1712_v14 = vpop.xlane.xlu0 %1711  ;;  %v1893_v30 = vmul.f32 1.442695, %v1828_v36 }
 0x4c1   : > { %4071 = vpow2.f32 %v1897_v5  ;;  %v1833_v42 = vsub.f32 %v4883_v10, %v1712_v14 }
 0x4c2   : > { %4073 = vpow2.f32 %v1893_v30 }
 0x4c3   : > { %1765 = vmax.xlane.f32.xlu0 %v5258_v63  ;;  %v5308_v39 = vpop.eup %4067  ;;  %v1903_v7 = vmul.f32 1.442695, %v1833_v42 }
 0x4c4   : > { %v1708_v52 = vpop.xlane.xlu0 %1707 }
 0x4c5   : > { %v1831_v19 = vsub.f32 %v4888_v13, %v1708_v52  ;;  %4075 = vpow2.f32 %v1903_v7 }
 0x4c7   : > { %1777 = vmax.xlane.f32.xlu0 %v5266_v53  ;;  %v5312_v45 = vpop.eup %4069  ;;  %v1899_v0 = vmul.f32 1.442695, %v1831_v19 }
 0x4c8   : > { %v1714_v15 = vpop.xlane.xlu0 %1713 }
 0x4c9   : > { %v1834_v2 = vsub.f32 %v4899_v48, %v1714_v15  ;;  %4077 = vpow2.f32 %v1899_v0 }
 0x4cb   : > { %1773 = vmax.xlane.f32.xlu0 %v5274_v49  ;;  %v5316_v4 = vpop.eup %4071  ;;  %v1905_v36 = vmul.f32 1.442695, %v1834_v2 }
 0x4cc   : > { %v1710_v55 = vpop.xlane.xlu0 %1709  ;;  %v5321_v30 = vpop.eup %4073 }
 0x4cd   : > { %v1832_v13 = vsub.f32 %v4906_v60, %v1710_v55 }
 0x4cf   : > { %1785 = vmax.xlane.f32.xlu0 %v5281_v32  ;;  %v1901_v15 = vmul.f32 1.442695, %v1832_v13  ;;  %v5327_v2 = vpop.eup %4075 }
 0x4d3   : > { %1781 = vmax.xlane.f32.xlu0 %v5290_v57  ;;  %v5332_v13 = vpop.eup %4077 }
 0x4d7   : > { %1793 = vmax.xlane.f32.xlu0 %v5297_v26 }
 0x4db   : > { %1789 = vmax.xlane.f32.xlu0 %v5304_v8 }
 0x4df   : > { %2023 = vadd.xlane.f32.xlu0 %v5308_v39 }
 0x4e3   : > { %2019 = vadd.xlane.f32.xlu0 %v5312_v45 }
 0x4e6   : > { %v1800_v10 = vpop.xlane.xlu1 %1799 }
 0x4e7   : > { %v1877_v14 = vsub.f32 %v4929_v59, %v1800_v10  ;;  %2025 = vadd.xlane.f32.xlu0 %v5316_v4 }
 0x4e8   : > { %v1802_v5 = vpop.xlane.xlu0 %1801 }
 0x4e9   : > { %v1991_v52 = vmul.f32 1.442695, %v1877_v14  ;;  %v1878_v59 = vsub.f32 %v4938_v24, %v1802_v5 }
 0x4ea   : > { %v1796_v42 = vpop.xlane.xlu1 %1795 }
 0x4eb   : > { %4079 = vpow2.f32 %v1991_v52  ;;  %v1875_v48 = vsub.f32 %v4944_v51, %v1796_v42  ;;  %2021 = vadd.xlane.f32.xlu0 %v5321_v30  ;;  %v1993_v51 = vmul.f32 1.442695, %v1878_v59 }
 0x4ec   : > { %4081 = vpow2.f32 %v1905_v36  ;;  %v1798_v7 = vpop.xlane.xlu0 %1797 }
 0x4ed   : > { %v1987_v19 = vmul.f32 1.442695, %v1875_v48  ;;  %v1876_v0 = vsub.f32 %v4950_v9, %v1798_v7 }
 0x4ee   : > { %v1720_v60 = vpop.xlane.xlu1 %1719 }
 0x4ef   : > { %4083 = vpow2.f32 %v1987_v19  ;;  %v1989_v55 = vmul.f32 1.442695, %v1876_v0  ;;  %v1837_v10 = vsub.f32 %v4958_v23, %v1720_v60  ;;  %2031 = vadd.xlane.f32.xlu0 %v5327_v2 }
 0x4f0   : > { %4085 = vpow2.f32 %v1901_v15  ;;  %v1716_v14 = vpop.xlane.xlu0 %1715 }
 0x4f1   : > { %v1835_v36 = vsub.f32 %v4968_v31, %v1716_v14  ;;  %4087 = vpow2.f32 %v1989_v55  ;;  %v1911_v24 = vmul.f32 1.442695, %v1837_v10 }
 0x4f2   : > { %4089 = vpow2.f32 %v1993_v51 }
 0x4f3   : > { %2027 = vadd.xlane.f32.xlu0 %v5332_v13  ;;  %v1907_v9 = vmul.f32 1.442695, %v1835_v36  ;;  %4091 = vpow2.f32 %v1911_v24 }
 0x4f4   : > { %v1722_v5 = vpop.xlane.xlu0 %1721 }
 0x4f5   : > { %v5335_v52 = vpop.eup %4079  ;;  %v1838_v23 = vsub.f32 %v4976_v44, %v1722_v5  ;;  %4093 = vpow2.f32 %v1907_v9 }
 0x4f6   : > { %v5338_v42 = vpop.eup %4081  ;;  %v1808_v48 = vpop.xlane.xlu1 %1807  ;;  %2119 = vadd.xlane.f32.xlu1 %v5335_v52 }
 0x4f7   : > { %v1881_v31 = vsub.f32 %v4983_v20, %v1808_v48  ;;  %2033 = vadd.xlane.f32.xlu0 %v5338_v42  ;;  %v1913_v15 = vmul.f32 1.442695, %v1838_v23 }
 0x4f8   : > { %v1718_v59 = vpop.xlane.xlu0 %1717 }
 0x4f9   : > { %v5343_v7 = vpop.eup %4083  ;;  %v1999_v19 = vmul.f32 1.442695, %v1881_v31  ;;  %v1836_v0 = vsub.f32 %v4993_v11, %v1718_v59 }
 0x4fa   : > { %v5346_v60 = vpop.eup %4085  ;;  %v1804_v44 = vpop.xlane.xlu1 %1803  ;;  %2115 = vadd.xlane.f32.xlu1 %v5343_v7 }
 0x4fb   : > { %4095 = vpow2.f32 %v1999_v19  ;;  %v1879_v55 = vsub.f32 %v5000_v58, %v1804_v44  ;;  %2029 = vadd.xlane.f32.xlu0 %v5346_v60  ;;  %v1909_v20 = vmul.f32 1.442695, %v1836_v0  ;;  %v5351_v51 = vpop.eup %4087 }
 0x4fc   : > { %4097 = vpow2.f32 %v1913_v15  ;;  %v1810_v10 = vpop.xlane.xlu0 %1809  ;;  %v5354_v24 = vpop.eup %4089 }
 0x4fd   : > { %v1995_v14 = vmul.f32 1.442695, %v1879_v55  ;;  %v1882_v36 = vsub.f32 %v5005_v62, %v1810_v10  ;;  %v5359_v23 = vpop.eup %4091 }
 0x4fe   : > { %v1728_v11 = vpop.xlane.xlu1 %1727  ;;  %2117 = vadd.xlane.f32.xlu1 %v5351_v51 }
 0x4ff   : > { %4099 = vpow2.f32 %v1995_v14  ;;  %v1841_v9 = vsub.f32 %v5013_v6, %v1728_v11  ;;  %2121 = vadd.xlane.f32.xlu0 %v5354_v24  ;;  %v2001_v58 = vmul.f32 1.442695, %v1882_v36  ;;  %v5362_v15 = vpop.eup %4093  ;;  %v5874_v36 = vld [vmem:[#allocation4_spill] sm:$0xff] }
 0x500   : > { %4101 = vpow2.f32 %v1909_v20  ;;  %v1806_v5 = vpop.xlane.xlu0 %1805 }
 0x501   : > { %v1919_v48 = vmul.f32 1.442695, %v1841_v9  ;;  %v1880_v31 = vsub.f32 %v5022_v37, %v1806_v5 }
 0x502   : > { %v1724_v62 = vpop.xlane.xlu1 %1723  ;;  %2039 = vadd.xlane.f32.xlu1 %v5359_v23 }
 0x503   : > { %4103 = vpow2.f32 %v1919_v48  ;;  %v1839_v59 = vsub.f32 %v5030_v1, %v1724_v62  ;;  %2035 = vadd.xlane.f32.xlu0 %v5362_v15  ;;  %v1997_v6 = vmul.f32 1.442695, %v1880_v31  ;;  %v5876_v31 = vld [vmem:[#allocation6_spill] sm:$0xff] }
 0x504   : > { %4105 = vpow2.f32 %v2001_v58  ;;  %v1730_v19 = vpop.xlane.xlu0 %1729 }
 0x505   : > { %v5367_v0 = vpop.eup %4095  ;;  %v1915_v44 = vmul.f32 1.442695, %v1839_v59  ;;  %v1842_v55 = vsub.f32 %v5036_v41, %v1730_v19 }
 0x506   : > { %5872 = vst [vmem:[#allocation18_spill] sm:$0xff] %v5367_v0  ;;  %v5370_v20 = vpop.eup %4097  ;;  %v5372_v37 = vpop.xlane.xlu1 %1815  ;;  %2127 = vadd.xlane.f32.xlu1 %v5367_v0 }
 0x507   : > { %4107 = vpow2.f32 %v1915_v44  ;;  %v1921_v10 = vmul.f32 1.442695, %v1842_v55  ;;  %2041 = vadd.xlane.f32.xlu0 %v5370_v20  ;;  %v5877_v44 = vld [vmem:[#allocation7_spill] sm:$0xff] }
 0x508   : > { %4109 = vpow2.f32 %v1997_v6  ;;  %v1726_v1 = vpop.xlane.xlu0 %1725 }
 0x509   : > { %v5376_v14 = vpop.eup %4099  ;;  %v1840_v11 = vsub.f32 %v5874_v36, %v1726_v1  ;;  %4111 = vpow2.f32 %v1921_v10 }
 0x50a   : > { %5873 = vst [vmem:[#allocation19_spill] sm:$0xff] %v5376_v14  ;;  %v5379_v9 = vpop.eup %4101  ;;  %v5381_v58 = vpop.xlane.xlu1 %1811  ;;  %2123 = vadd.xlane.f32.xlu1 %v5376_v14 }
 0x50b   : > { %v1917_v41 = vmul.f32 1.442695, %v1840_v11  ;;  %2037 = vadd.xlane.f32.xlu0 %v5379_v9  ;;  %v5878_v11 = vld [vmem:[#allocation8_spill] sm:$0xff] }
 0x50c   : > { %v1736_v5 = vpop.xlane.xlu0 %1735 }
 0x50d   : > { %v5385_v48 = vpop.eup %4103  ;;  %v1845_v62 = vsub.f32 %v5876_v31, %v1736_v5  ;;  %4113 = vpow2.f32 %v1917_v41 }
 0x50e   : > { %5875 = vst [vmem:[#allocation4_spill] sm:$0xff] %v5385_v48  ;;  %v5388_v59 = vpop.eup %4105  ;;  %v1752_v6 = vpop.xlane.xlu1 %1751  ;;  %2047 = vadd.xlane.f32.xlu1 %v5385_v48 }
 0x50f   : > { %v1927_v19 = vmul.f32 1.442695, %v1845_v62  ;;  %v1853_v55 = vsub.f32 %v5877_v44, %v1752_v6  ;;  %2129 = vadd.xlane.f32.xlu0 %v5388_v59 }
 0x510   : > { %v1732_v10 = vpop.xlane.xlu0 %1731 }
 0x511   : > { %v5393_v1 = vpop.eup %4107  ;;  %4115 = vpow2.f32 %v1927_v19  ;;  %v1943_v36 = vmul.f32 1.442695, %v1853_v55  ;;  %v1843_v14 = vsub.f32 %v5878_v11, %v1732_v10 }
 0x512   : > { %v5396_v0 = vpop.eup %4109  ;;  %2043 = vadd.xlane.f32.xlu1 %v5393_v1 }
 0x513   : > { %4117 = vpow2.f32 %v1943_v36  ;;  %v1923_v5 = vmul.f32 1.442695, %v1843_v14  ;;  %2125 = vadd.xlane.f32.xlu0 %v5396_v0  ;;  %v5400_v31 = vpop.eup %4111 }
 0x514   : > { %v1738_v41 = vpop.xlane.xlu0 %1737 }
 0x515   : > { %4119 = vpow2.f32 %v1923_v5  ;;  %v1846_v62 = vsub.f32 %v5092_v54, %v1738_v41 }
 0x516   : > { %v5403_v6 = vpop.xlane.xlu1 %1823  ;;  %2049 = vadd.xlane.f32.xlu1 %v5400_v31 }
 0x517   : > { %v1929_v19 = vmul.f32 1.442695, %v1846_v62  ;;  %v5408_v55 = vpop.eup %4113 }
 0x518   : > { %v5406_v44 = vpop.xlane.xlu0 %1817  ;;  %5879 = vst [vmem:[#allocation6_spill] sm:$0xff] %v5408_v55 }
 0x519   : > { %4121 = vpow2.f32 %v1929_v19 }
 0x51a   : > { %v1748_v10 = vpop.xlane.xlu1 %1747  ;;  %2045 = vadd.xlane.f32.xlu1 %v5408_v55 }
 0x51b   : > { %v5411_v14 = vpop.eup %4115  ;;  %v1851_v36 = vsub.f32 %v5112_v18, %v1748_v10 }
 0x51c   : > { %5880 = vst [vmem:[#allocation7_spill] sm:$0xff] %v5411_v14  ;;  %2055 = vadd.xlane.f32.xlu0 %v5411_v14  ;;  %v1734_v54 = vpop.xlane.xlu0 %1733 }
 0x51d   : > { %v5415_v11 = vpop.eup %4117  ;;  %v1939_v5 = vmul.f32 1.442695, %v1851_v36  ;;  %v1844_v41 = vsub.f32 %v5118_v33, %v1734_v54 }
 0x51e   : > { %5881 = vst [vmem:[#allocation8_spill] sm:$0xff] %v5415_v11  ;;  %2071 = vadd.xlane.f32.xlu1 %v5415_v11  ;;  %v5434_v11 = vpop.xlane.xlu1 %1819 }
 0x51f   : > { %v5419_v62 = vpop.eup %4119  ;;  %4123 = vpow2.f32 %v1939_v5  ;;  %v1925_v19 = vmul.f32 1.442695, %v1844_v41 }
 0x520   : > { %5882 = vst [vmem:[#allocation20_spill] sm:$0xff] %v5419_v62  ;;  %2051 = vadd.xlane.f32.xlu0 %v5419_v62  ;;  %v5422_v48 = vpop.xlane.xlu0 %1813 }
 0x521   : > { %4125 = vpow2.f32 %v1925_v19 }
 0x523   : > { %v5424_v18 = vpop.eup %4121 }
 0x524   : > { %5883 = vst [vmem:[#allocation21_spill] sm:$0xff] %v5424_v18  ;;  %2057 = vadd.xlane.f32.xlu0 %v5424_v18  ;;  %v1744_v10 = vpop.xlane.xlu0 %1743  ;;  %v1760_v18 = vpop.xlane.xlu1 %1759 }
 0x525   : > { %v1849_v36 = vsub.f32 %v5140_v12, %v1744_v10 }
 0x527   : > { %v1935_v14 = vmul.f32 1.442695, %v1849_v36 }
 0x528   : > { %v1740_v33 = vpop.xlane.xlu0 %1739 }
 0x529   : > { %v5428_v54 = vpop.eup %4123  ;;  %4127 = vpow2.f32 %v1935_v14  ;;  %v1847_v5 = vsub.f32 %v5152_v16, %v1740_v33 }
 0x52a   : > { %5884 = vst [vmem:[#allocation22_spill] sm:$0xff] %v5428_v54  ;;  %2067 = vadd.xlane.f32.xlu1 %v5428_v54 }
 0x52b   : > { %v5432_v41 = vpop.eup %4125  ;;  %v1931_v19 = vmul.f32 1.442695, %v1847_v5 }
 0x52c   : > { %5885 = vst [vmem:[#allocation23_spill] sm:$0xff] %v5432_v41  ;;  %2053 = vadd.xlane.f32.xlu0 %v5432_v41  ;;  %v1746_v62 = vpop.xlane.xlu0 %1745 }
 0x52d   : > { %4129 = vpow2.f32 %v1931_v19  ;;  %v1850_v12 = vsub.f32 %v5164_v28, %v1746_v62  ;;  %v1756_v19 = vpop.xlane.xlu1 %1755 }
 0x52f   : > { %v1937_v10 = vmul.f32 1.442695, %v1850_v12  ;;  %v1857_v12 = vsub.f32 %v5134_v17, %v1760_v18 }
 0x530   : > { %v1742_v36 = vpop.xlane.xlu0 %1741 }
 0x531   : > { %4131 = vpow2.f32 %v1937_v10  ;;  %v1848_v14 = vsub.f32 %v5176_v35, %v1742_v36  ;;  %v1768_v10 = vpop.xlane.xlu1 %1767 }
 0x533   : > { %v5439_v16 = vpop.eup %4127  ;;  %v1933_v33 = vmul.f32 1.442695, %v1848_v14 }
 0x534   : > { %5886 = vst [vmem:[#allocation24_spill] sm:$0xff] %v5439_v16  ;;  %2063 = vadd.xlane.f32.xlu0 %v5439_v16  ;;  %v1754_v54 = vpop.xlane.xlu0 %1753 }
 0x535   : > { %4133 = vpow2.f32 %v1933_v33  ;;  %v1854_v5 = vsub.f32 %v5188_v22, %v1754_v54  ;;  %v1951_v33 = vmul.f32 1.442695, %v1857_v12  ;;  %v1764_v16 = vpop.xlane.xlu1 %1763 }
 0x537   : > { %v5443_v41 = vpop.eup %4129  ;;  %v1945_v55 = vmul.f32 1.442695, %v1854_v5 }
 0x538   : > { %5887 = vst [vmem:[#allocation25_spill] sm:$0xff] %v5443_v41  ;;  %2059 = vadd.xlane.f32.xlu0 %v5443_v41  ;;  %v5446_v28 = vpop.xlane.xlu0 %1825 }
 0x539   : > { %4135 = vpow2.f32 %v1945_v55  ;;  %v1855_v55 = vsub.f32 %v5146_v38, %v1756_v19  ;;  %v1861_v19 = vsub.f32 %v5158_v40, %v1768_v10 }
 0x53b   : > { %v5448_v62 = vpop.eup %4131  ;;  %v1947_v18 = vmul.f32 1.442695, %v1855_v55 }
 0x53c   : > { %2065 = vadd.xlane.f32.xlu0 %v5448_v62  ;;  %v1750_v35 = vpop.xlane.xlu0 %1749 }
 0x53d   : > { %v1852_v36 = vsub.f32 %v5211_v50, %v1750_v35 }
 0x53f   : > { %v5453_v22 = vpop.eup %4133  ;;  %v1941_v54 = vmul.f32 1.442695, %v1852_v36  ;;  %v1776_v36 = vpop.xlane.xlu1 %1775 }
 0x540   : > { %5888 = vst [vmem:[#allocation26_spill] sm:$0xff] %v5453_v22  ;;  %2061 = vadd.xlane.f32.xlu0 %v5453_v22  ;;  %v5456_v14 = vpop.xlane.xlu0 %1821 }
 0x541   : > { %4137 = vpow2.f32 %v1941_v54 }
 0x542   : > { %4139 = vpow2.f32 %v1951_v33 }
 0x543   : > { %v5459_v5 = vpop.eup %4135  ;;  %4141 = vpow2.f32 %v1947_v18  ;;  %v1772_v33 = vpop.xlane.xlu1 %1771 }
 0x544   : > { %5889 = vst [vmem:[#allocation27_spill] sm:$0xff] %v5459_v5  ;;  %2073 = vadd.xlane.f32.xlu1 %v5459_v5  ;;  %v1762_v17 = vpop.xlane.xlu0 %1761 }
 0x545   : > { %v1858_v50 = vsub.f32 %v5233_v46, %v1762_v17  ;;  %v1859_v46 = vsub.f32 %v5170_v61, %v1764_v16  ;;  %v1959_v17 = vmul.f32 1.442695, %v1861_v19 }
 0x547   : > { %v1953_v22 = vmul.f32 1.442695, %v1858_v50  ;;  %v1955_v18 = vmul.f32 1.442695, %v1859_v46 }
 0x548   : > { %v1758_v35 = vpop.xlane.xlu0 %1757 }
 0x549   : > { %v1856_v41 = vsub.f32 %v5244_v56, %v1758_v35  ;;  %4143 = vpow2.f32 %v1953_v22 }
 0x54b   : > { %v5464_v12 = vpop.eup %4137  ;;  %v1949_v54 = vmul.f32 1.442695, %v1856_v41  ;;  %v1784_v41 = vpop.xlane.xlu1 %1783 }
 0x54c   : > { %2069 = vadd.xlane.f32.xlu1 %v5464_v12  ;;  %v1770_v38 = vpop.xlane.xlu0 %1769  ;;  %v5468_v5 = vpop.eup %4139  ;;  %v1869_v16 = vsub.f32 %v5205_v27, %v1784_v41 }
 0x54d   : > { %4145 = vpow2.f32 %v1949_v54  ;;  %v5472_v56 = vpop.eup %4141  ;;  %v1862_v50 = vsub.f32 %v5252_v29, %v1770_v38 }
 0x54e   : > { %4147 = vpow2.f32 %v1959_v17 }
 0x54f   : > { %4149 = vpow2.f32 %v1955_v18  ;;  %v1961_v35 = vmul.f32 1.442695, %v1862_v50  ;;  %v1865_v18 = vsub.f32 %v5182_v43, %v1776_v36  ;;  %v1780_v43 = vpop.xlane.xlu1 %1779 }
 0x550   : > { %2079 = vadd.xlane.f32.xlu1 %v5468_v5  ;;  %v1766_v55 = vpop.xlane.xlu0 %1765 }
 0x551   : > { %v1860_v54 = vsub.f32 %v5258_v63, %v1766_v55  ;;  %v1967_v41 = vmul.f32 1.442695, %v1865_v18 }
 0x553   : > { %v5477_v22 = vpop.eup %4143  ;;  %v1957_v50 = vmul.f32 1.442695, %v1860_v54 }
 0x554   : > { %2075 = vadd.xlane.f32.xlu1 %v5472_v56  ;;  %v1778_v40 = vpop.xlane.xlu0 %1777 }
 0x555   : > { %v1866_v10 = vsub.f32 %v5266_v53, %v1778_v40  ;;  %v5890_v53 = vld [vmem:[#allocation5_spill] sm:$0xff]  ;;  %v1975_v40 = vmul.f32 1.442695, %v1869_v16  ;;  %v5891_v16 = vld [vmem:[#allocation3_spill] sm:$0xff] }
 0x556   : > { %v1883_v17 = vsub.f32 %v5890_v53, %v5381_v58 }
 0x557   : > { %v1969_v61 = vmul.f32 1.442695, %v1866_v10  ;;  %v5483_v38 = vpop.eup %4145  ;;  %v1863_v10 = vsub.f32 %v5194_v47, %v1772_v33  ;;  %v1867_v47 = vsub.f32 %v5217_v25, %v1780_v43 }
 0x558   : > { %2081 = vadd.xlane.f32.xlu1 %v5477_v22  ;;  %v1774_v19 = vpop.xlane.xlu0 %1773  ;;  %v5491_v63 = vpop.eup %4147  ;;  %v2003_v55 = vmul.f32 1.442695, %v1883_v17 }
 0x559   : > { %4151 = vpow2.f32 %v1969_v61  ;;  %v1864_v29 = vsub.f32 %v5274_v49, %v1774_v19  ;;  %v1884_v49 = vsub.f32 %v5128_v3, %v5422_v48  ;;  %v5499_v61 = vpop.eup %4149  ;;  %v1963_v48 = vmul.f32 1.442695, %v1863_v10 }
 0x55a   : > { %4153 = vpow2.f32 %v1961_v35  ;;  %v1885_v35 = vsub.f32 %v5891_v16, %v5372_v37  ;;  %v1971_v53 = vmul.f32 1.442695, %v1867_v47  ;;  %v1792_v16 = vpop.xlane.xlu1 %1791 }
 0x55b   : > { %v1965_v46 = vmul.f32 1.442695, %v1864_v29  ;;  %v2005_v19 = vmul.f32 1.442695, %v1884_v49 }
 0x55c   : > { %2077 = vadd.xlane.f32.xlu1 %v5483_v38  ;;  %v5488_v27 = vpop.xlane.xlu0 %1785  ;;  %v2007_v29 = vmul.f32 1.442695, %v1885_v35 }
 0x55d   : > { %4155 = vpow2.f32 %v1965_v46  ;;  %v1886_v46 = vsub.f32 %v5104_v34, %v5406_v44  ;;  %v1870_v35 = vsub.f32 %v5281_v32, %v5488_v27  ;;  %v5893_v32 = vld [vmem:[#allocation12_spill] sm:$0xff] }
 0x55e   : > { %4157 = vpow2.f32 %v1975_v40  ;;  %v1887_v40 = vsub.f32 %v5122_v21, %v5434_v11  ;;  %v1873_v27 = vsub.f32 %v5893_v32, %v1792_v16 }
 0x55f   : > { %4159 = vpow2.f32 %v1957_v50  ;;  %v2009_v50 = vmul.f32 1.442695, %v1886_v46  ;;  %v1977_v46 = vmul.f32 1.442695, %v1870_v35 }
 0x560   : > { %2087 = vadd.xlane.f32.xlu1 %v5491_v63  ;;  %v5496_v58 = vpop.xlane.xlu0 %1781  ;;  %4161 = vpow2.f32 %v2003_v55  ;;  %v5892_v55 = vld [vmem:[#allocation11_spill] sm:$0xff] }
 0x561   : > { %4163 = vpow2.f32 %v1967_v41  ;;  %v1888_v34 = vsub.f32 %v5892_v55, %v5456_v14  ;;  %v2011_v41 = vmul.f32 1.442695, %v1887_v40 }
 0x562   : > { %4165 = vpow2.f32 %v2005_v19 }
 0x563   : > { %v5501_v36 = vpop.eup %4151  ;;  %4167 = vpow2.f32 %v1963_v48  ;;  %v2013_v11 = vmul.f32 1.442695, %v1888_v34 }
 0x564   : > { %2083 = vadd.xlane.f32.xlu1 %v5499_v61  ;;  %2097 = vadd.xlane.f32.xlu0 %v5501_v36  ;;  %v5507_v3 = vpop.xlane.xlu0 %1793  ;;  %v5510_v33 = vpop.eup %4153  ;;  %4169 = vpow2.f32 %v2007_v29 }
 0x565   : > { %4171 = vpow2.f32 %v1971_v53  ;;  %v1788_v29 = vpop.xlane.xlu1 %1787  ;;  %v1868_v53 = vsub.f32 %v5290_v57, %v5496_v58  ;;  %v1983_v57 = vmul.f32 1.442695, %v1873_v27 }
 0x566   : > { %4173 = vpow2.f32 %v2009_v50  ;;  %v5894_v50 = vld [vmem:[#allocation13_spill] sm:$0xff] }
 0x567   : > { %v5512_v54 = vpop.eup %4155  ;;  %4175 = vpow2.f32 %v2011_v41  ;;  %v1871_v55 = vsub.f32 %v5894_v50, %v1788_v29  ;;  %v1973_v34 = vmul.f32 1.442695, %v1868_v53  ;;  %v1874_v41 = vsub.f32 %v5297_v26, %v5507_v3 }
 0x568   : > { %2089 = vadd.xlane.f32.xlu1 %v5510_v33  ;;  %2093 = vadd.xlane.f32.xlu0 %v5512_v54  ;;  %v5516_v37 = vpop.xlane.xlu0 %1789  ;;  %v5520_v17 = vpop.eup %4157  ;;  %4177 = vpow2.f32 %v2013_v11 }
 0x569   : > { %v5522_v25 = vpop.eup %4159 }
 0x56a   : > { %v5530_v44 = vpop.eup %4161 }
 0x56b   : > { %v5532_v49 = vpop.eup %4163 }
 0x56c   : > { %2085 = vadd.xlane.f32.xlu1 %v5522_v25  ;;  %2103 = vadd.xlane.f32.xlu0 %v5520_v17  ;;  %v2024_v18 = vpop.xlane.xlu0 %2023  ;;  %v5536_v10 = vpop.eup %4165 }
 0x56d   : > { %v5538_v43 = vpop.eup %4167 }
 0x56e   : > { %v5544_v19 = vpop.eup %4169 }
 0x56f   : > { %v5546_v48 = vpop.eup %4171 }
 0x570   : > { %2095 = vadd.xlane.f32.xlu1 %v5532_v49  ;;  %2131 = vadd.xlane.f32.xlu0 %v5530_v44  ;;  %v2020_v21 = vpop.xlane.xlu0 %2019  ;;  %v5552_v40 = vpop.eup %4173 }
 0x574   : > { %2091 = vadd.xlane.f32.xlu1 %v5538_v43  ;;  %2133 = vadd.xlane.f32.xlu0 %v5536_v10  ;;  %v2026_v14 = vpop.xlane.xlu0 %2025 }
 0x575   : > { %4179 = vrcp.f32 %v2026_v14  ;;  %v1979_v14 = vmul.f32 1.442695, %v1871_v55 }
 0x576   : > { %4181 = vrcp.f32 %v2020_v21  ;;  %v5559_v21 = vpop.eup %4175 }
 0x577   : > { %4183 = vrcp.f32 %v2024_v18  ;;  %v5561_v11 = vpop.eup %4177 }
 0x578   : > { %2099 = vadd.xlane.f32.xlu1 %v5546_v48  ;;  %2135 = vadd.xlane.f32.xlu0 %v5544_v19  ;;  %v2022_v47 = vpop.xlane.xlu0 %2021 }
 0x579   : > { %4185 = vrcp.f32 %v2022_v47  ;;  %v1985_v47 = vmul.f32 1.442695, %v1874_v41 }
 0x57a   : > { %4187 = vpow2.f32 %v1977_v46 }
 0x57b   : > { %4189 = vpow2.f32 %v1973_v34 }
 0x57c   : > { %2137 = vadd.xlane.f32.xlu0 %v5552_v40  ;;  %v2032_v18 = vpop.xlane.xlu0 %2031  ;;  %4191 = vpow2.f32 %v1983_v57 }
 0x57d   : > { %4193 = vpow2.f32 %v1979_v14 }
 0x57e   : > { %4195 = vpow2.f32 %v1985_v47 }
 0x57f   : > { %v4180_v58 = vpop.eup %4179 }
 0x580   : > { %2139 = vadd.xlane.f32.xlu0 %v5559_v21  ;;  %v2028_v16 = vpop.xlane.xlu0 %2027  ;;  %v4182_v35 = vpop.eup %4181  ;;  %v2214_v46 = vmul.f32 %v4180_v58, %v5316_v4  ;;  %v5895_v58 = vld [vmem:[#allocation9_spill] sm:$0xff] }
 0x581   : > { %v4184_v29 = vpop.eup %4183  ;;  %v2211_v3 = vmul.f32 %v4182_v35, %v5312_v45  ;;  %v1872_v45 = vsub.f32 %v5304_v8, %v5516_v37  ;;  %v1889_v14 = vsub.f32 %v5895_v58, %v5403_v6  ;;  %v5896_v35 = vld [vmem:[#allocation10_spill] sm:$0xff] }
 0x582   : > { %v2213_v50 = vmul.f32 %v4184_v29, %v5308_v39  ;;  %v1890_v47 = vsub.f32 %v5896_v35, %v5446_v28 }
 0x583   : > { %v4186_v32 = vpop.eup %4185  ;;  %v2120_v53 = vpop.xlane.xlu1 %2119  ;;  %v1981_v8 = vmul.f32 1.442695, %v1872_v45 }
 0x584   : > { %2141 = vadd.xlane.f32.xlu0 %v5561_v11  ;;  %v2034_v26 = vpop.xlane.xlu0 %2033  ;;  %v2212_v27 = vmul.f32 %v4186_v32, %v5321_v30  ;;  %v5569_v34 = vpop.eup %4187  ;;  %v2276_v57 = vpack.c.bf16 %v2214_v46, %v2213_v50 }
 0x585   : > { %4197 = vrcp.f32 %v2034_v26  ;;  %v5574_v30 = vpop.eup %4189 }
 0x586   : > { %v2275_v55 = vpack.c.bf16 %v2212_v27, %v2211_v3  ;;  %4199 = vrcp.f32 %v2028_v16  ;;  %v5579_v16 = vpop.eup %4191  ;;  %v2017_v3 = vmul.f32 1.442695, %v1890_v47 }
 0x587   : > { %v2116_v41 = vpop.xlane.xlu1 %2115  ;;  %4201 = vrcp.f32 %v2032_v18  ;;  %v5583_v37 = vpop.eup %4193 }
 0x588   : > { %2105 = vadd.xlane.f32.xlu0 %v5569_v34  ;;  %3451 = vmatprep.mubr.bf16.mxu1 %v2275_v55  ;;  %v2030_v4 = vpop.xlane.xlu0 %2029  ;;  %v5585_v29 = vpop.eup %4195 }
 0x589   : > { %4203 = vrcp.f32 %v2030_v4  ;;  %3452 = vmatmul.mubr.bf16.vlgmr.msra.gmra.mrb[44].mxu1 %v2276_v57 }
 0x58a   : > { %4205 = vrcp.f32 %v2116_v41 }
 0x58b   : > { %4207 = vrcp.f32 %v2120_v53  ;;  %v2118_v39 = vpop.xlane.xlu1 %2117  ;;  %v2015_v53 = vmul.f32 1.442695, %v1889_v14 }
 0x58c   : > { %4209 = vrcp.f32 %v2118_v39  ;;  %2101 = vadd.xlane.f32.xlu0 %v5574_v30  ;;  %v2122_v18 = vpop.xlane.xlu0 %2121 }
 0x58d   : > { %4211 = vrcp.f32 %v2122_v18 }
 0x58e   : > { %4213 = vpow2.f32 %v1981_v8 }
 0x58f   : > { %v2040_v32 = vpop.xlane.xlu1 %2039  ;;  %v4198_v46 = vpop.eup %4197  ;;  %4215 = vpow2.f32 %v2015_v53 }
 0x590   : > { %2111 = vadd.xlane.f32.xlu0 %v5579_v16  ;;  %v2036_v6 = vpop.xlane.xlu0 %2035  ;;  %v4200_v26 = vpop.eup %4199  ;;  %v2218_v28 = vmul.f32 %v4198_v46, %v5338_v42  ;;  %4217 = vpow2.f32 %v2017_v3 }
 0x591   : > { %v4202_v27 = vpop.eup %4201  ;;  %v2215_v4 = vmul.f32 %v4200_v26, %v5332_v13 }
 0x592   : > { %v2217_v58 = vmul.f32 %v4202_v27, %v5327_v2 }
 0x593   : > { %v4204_v50 = vpop.eup %4203  ;;  %v2128_v55 = vpop.xlane.xlu1 %2127 }
 0x594   : > { %v4206_v41 = vpop.eup %4205  ;;  %2107 = vadd.xlane.f32.xlu0 %v5583_v37  ;;  %v2042_v57 = vpop.xlane.xlu0 %2041  ;;  %v2216_v45 = vmul.f32 %v4204_v50, %v5346_v60  ;;  %v2278_v42 = vpack.c.bf16 %v2218_v28, %v2217_v58 }
 0x595   : > { %v4208_v39 = vpop.eup %4207  ;;  %4219 = vrcp.f32 %v2042_v57  ;;  %v5594_v8 = vmul.f32 %v4206_v41, %v5343_v7 }
 0x596   : > { %v4210_v14 = vpop.eup %4209  ;;  %v2277_v18 = vpack.c.bf16 %v2216_v45, %v2215_v4  ;;  %4221 = vrcp.f32 %v2036_v6  ;;  %v5600_v13 = vmul.f32 %v4208_v39, %v5335_v52 }
 0x597   : > { %v4212_v35 = vpop.eup %4211  ;;  %v2124_v47 = vpop.xlane.xlu1 %2123  ;;  %v5597_v46 = vmul.f32 %v4210_v14, %v5351_v51  ;;  %4223 = vrcp.f32 %v2040_v32 }
 0x598   : > { %v5603_v60 = vmul.f32 %v4212_v35, %v5354_v24  ;;  %2113 = vadd.xlane.f32.xlu0 %v5585_v29  ;;  %v2038_v2 = vpop.xlane.xlu0 %2037  ;;  %3455 = vmatprep.mubr.bf16.mxu1 %v2277_v18  ;;  %v5610_v53 = vpop.eup %4213 }
 0x599   : > { %4225 = vrcp.f32 %v2038_v2  ;;  %3456 = vmatmul.mubr.bf16.gmra.mrb[48].mxu1 %v2278_v42  ;;  %v2299_v7 = vpack.c.bf16 %v5597_v46, %v5594_v8  ;;  %v5613_v32 = vpop.eup %4215  ;;  %v5897_v42 = vld [vmem:[#allocation18_spill] sm:$0xff] }
 0x59a   : > { %v2300_v51 = vpack.c.bf16 %v5603_v60, %v5600_v13  ;;  %4227 = vrcp.f32 %v2128_v55  ;;  %v5615_v6 = vpop.eup %4217 }
 0x59b   : > { %v2048_v52 = vpop.xlane.xlu1 %2047 }
 0x59c   : > { %2109 = vadd.xlane.f32.xlu0 %v5610_v53  ;;  %v2130_v24 = vpop.xlane.xlu0 %2129 }
 0x59d   : > { %4229 = vrcp.f32 %v2130_v24  ;;  %v5899_v24 = vld [vmem:[#allocation16_spill] sm:$0xff] }
 0x59e   : > { %4231 = vrcp.f32 %v2124_v47 }
 0x59f   : > { %v2044_v26 = vpop.xlane.xlu1 %2043  ;;  %v4220_v3 = vpop.eup %4219 }
 0x5a0   : > { %2143 = vadd.xlane.f32.xlu0 %v5613_v32  ;;  %v2126_v27 = vpop.xlane.xlu0 %2125  ;;  %v4222_v50 = vpop.eup %4221  ;;  %v2222_v57 = vmul.f32 %v4220_v3, %v5370_v20 }
 0x5a1   : > { %4233 = vrcp.f32 %v2126_v27  ;;  %v4224_v28 = vpop.eup %4223  ;;  %v2219_v4 = vmul.f32 %v4222_v50, %v5362_v15 }
 0x5a2   : > { %v2221_v58 = vmul.f32 %v4224_v28, %v5359_v23 }
 0x5a3   : > { %v4226_v41 = vpop.eup %4225  ;;  %v2050_v55 = vpop.xlane.xlu1 %2049 }
 0x5a4   : > { %2145 = vadd.xlane.f32.xlu0 %v5615_v6  ;;  %v2220_v45 = vmul.f32 %v4226_v41, %v5379_v9  ;;  %v4228_v39 = vpop.eup %4227  ;;  %4235 = vrcp.f32 %v2050_v55  ;;  %v2280_v47 = vpack.c.bf16 %v2222_v57, %v2221_v58  ;;  %v5898_v9 = vld [vmem:[#allocation14_spill] sm:$0xff]  ;;  %v5901_v41 = vld [vmem:[#allocation15_spill] sm:$0xff] }
 0x5a5   : > { %4237 = vrcp.f32 %v2044_v26  ;;  %v5624_v20 = vmul.f32 %v4228_v39, %v5897_v42  ;;  %v3851_v3 = vpack.i.bf16 %v5899_v24, %v5898_v9  ;;  %v5900_v26 = vld [vmem:[#allocation19_spill] sm:$0xff] }
 0x5a6   : > { %v2279_v14 = vpack.c.bf16 %v2220_v45, %v2219_v4  ;;  %4239 = vrcp.f32 %v2048_v52 }
 0x5a7   : > { %v4230_v18 = vpop.eup %4229  ;;  %v2046_v35 = vpop.xlane.xlu1 %2045 }
 0x5a8   : > { %4241 = vrcp.f32 %v2046_v35  ;;  %3459 = vmatprep.mubr.bf16.mxu1 %v2279_v14  ;;  %v5627_v2 = vmul.f32 %v4230_v18, %v5388_v59  ;;  %v4232_v15 = vpop.eup %4231  ;;  %v5902_v59 = vld [vmem:[#allocation17_spill] sm:$0xff] }
 0x5a9   : > { %v2056_v27 = vpop.xlane.xlu0 %2055  ;;  %3460 = vmatmul.mubr.bf16.gmra.mrb[52].mxu1 %v2280_v47  ;;  %v5634_v50 = vmul.f32 %v4232_v15, %v5900_v26  ;;  %v3853_v55 = vpack.i.bf16 %v5902_v59, %v5901_v41  ;;  %v5903_v47 = vld [vmem:[#allocation6_spill] sm:$0xff]  ;;  %v5904_v15 = vld [vmem:[#allocation4_spill] sm:$0xff] }
 0x5aa   : > { %v2302_v23 = vpack.c.bf16 %v5627_v2, %v5624_v20 }
 0x5ab   : > { %v4234_v52 = vpop.eup %4233  ;;  %3852 = vxpose.xlu1.b32.start [1/2] (short) %v3851_v3, 128 }
 0x5ac   : > { %v5637_v28 = vmul.f32 %v4234_v52, %v5396_v0 }
 0x5ad   : > { %v2052_v57 = vpop.xlane.xlu0 %2051 }
 0x5ae   : > { %v2301_v4 = vpack.c.bf16 %v5637_v28, %v5634_v50  ;;  %v4236_v45 = vpop.eup %4235 }
 0x5af   : > { %3854 = vxpose.xlu1.b32.end [2/2] (short) %v3853_v55, 128  ;;  %v4238_v39 = vpop.eup %4237  ;;  %v2226_v18 = vmul.f32 %v4236_v45, %v5400_v31 }
 0x5b0   : > { %v4240_v58 = vpop.eup %4239  ;;  %v2223_v35 = vmul.f32 %v4238_v39, %v5393_v1  ;;  %v5905_v1 = vld [vmem:[#allocation21_spill] sm:$0xff] }
 0x5b1   : > { %v2058_v0 = vpop.xlane.xlu0 %2057  ;;  %v2225_v9 = vmul.f32 %v4240_v58, %v5904_v15  ;;  %v5907_v58 = vld [vmem:[#allocation23_spill] sm:$0xff]  ;;  %v2072_v15 = vpop.xlane.xlu1 %2071 }
 0x5b2   : > { %v4242_v14 = vpop.eup %4241  ;;  %4243 = vrcp.f32 %v2058_v0 }
 0x5b3   : > { %v2224_v42 = vmul.f32 %v4242_v14, %v5903_v47  ;;  %v2282_v3 = vpack.c.bf16 %v2226_v18, %v2225_v9  ;;  %4245 = vrcp.f32 %v2052_v57  ;;  %v5906_v14 = vld [vmem:[#allocation20_spill] sm:$0xff]  ;;  %v5908_v18 = vld [vmem:[#allocation7_spill] sm:$0xff] }
 0x5b4   : > { %4247 = vrcp.f32 %v2056_v27 }
 0x5b5   : > { %v2281_v24 = vpack.c.bf16 %v2224_v42, %v2223_v35 }
 0x5b7   : > { %3463 = vmatprep.mubr.bf16.mxu1 %v2281_v24  ;;  %v2068_v24 = vpop.xlane.xlu1 %2067 }
 0x5b8   : > { %3464 = vmatmul.mubr.bf16.gmra.mrb[56].mxu1 %v2282_v3 }
 0x5b9   : > { %v2054_v52 = vpop.xlane.xlu0 %2053 }
 0x5ba   : > { %4249 = vrcp.f32 %v2054_v52 }
 0x5bc   : > { %v4244_v26 = vpop.eup %4243 }
 0x5bd   : > { %v4246_v59 = vpop.eup %4245  ;;  %v2230_v45 = vmul.f32 %v4244_v26, %v5905_v1 }
 0x5be   : > { %v4248_v31 = vpop.eup %4247  ;;  %v2227_v47 = vmul.f32 %v4246_v59, %v5906_v14 }
 0x5bf   : > { %v2229_v42 = vmul.f32 %v4248_v31, %v5908_v18 }
 0x5c1   : > { %v2064_v41 = vpop.xlane.xlu0 %2063  ;;  %v2284_v57 = vpack.c.bf16 %v2230_v45, %v2229_v42  ;;  %v5909_v45 = vld [vmem:[#allocation25_spill] sm:$0xff] }
 0x5c4   : > { %v4250_v55 = vpop.eup %4249 }
 0x5c5   : > { %v2060_v39 = vpop.xlane.xlu0 %2059  ;;  %v2228_v35 = vmul.f32 %v4250_v55, %v5907_v58 }
 0x5c7   : > { %v2283_v0 = vpack.c.bf16 %v2228_v35, %v2227_v47  ;;  %v5910_v47 = vld [vmem:[#allocation26_spill] sm:$0xff] }
 0x5c9   : > { %3483 = vmatprep.mubr.bf16.mxu0 %v2283_v0  ;;  %v2066_v27 = vpop.xlane.xlu0 %2065 }
 0x5ca   : > { %3484 = vmatmul.mubr.bf16.vlgmr.msra.gmra.mrb[52].mxu0 %v2284_v57  ;;  %4251 = vrcp.f32 %v2066_v27 }
 0x5cb   : > { %4253 = vrcp.f32 %v2060_v39 }
 0x5cc   : > { %4255 = vrcp.f32 %v2064_v41  ;;  %v5911_v41 = vld [vmem:[#allocation24_spill] sm:$0xff] }
 0x5cd   : > { %v2062_v9 = vpop.xlane.xlu0 %2061 }
 0x5ce   : > { %4257 = vrcp.f32 %v2062_v9 }
 0x5d1   : > { %v2074_v3 = vpop.xlane.xlu1 %2073 }
 0x5d2   : > { %4259 = vrcp.f32 %v2074_v3 }
 0x5d3   : > { %4261 = vrcp.f32 %v2068_v24 }
 0x5d4   : > { %v4252_v52 = vpop.eup %4251  ;;  %4263 = vrcp.f32 %v2072_v15 }
 0x5d5   : > { %v4254_v26 = vpop.eup %4253  ;;  %v2234_v31 = vmul.f32 %v4252_v52, %v5448_v62  ;;  %v5912_v62 = vld [vmem:[#allocation27_spill] sm:$0xff]  ;;  %v5913_v52 = vld [vmem:[#allocation22_spill] sm:$0xff] }
 0x5d6   : > { %v4256_v59 = vpop.eup %4255  ;;  %v2231_v14 = vmul.f32 %v4254_v26, %v5909_v45 }
 0x5d7   : > { %v2233_v39 = vmul.f32 %v4256_v59, %v5911_v41 }
 0x5d8   : > { %v4258_v55 = vpop.eup %4257 }
 0x5d9   : > { %v2070_v1 = vpop.xlane.xlu1 %2069  ;;  %v2232_v58 = vmul.f32 %v4258_v55, %v5910_v47  ;;  %v2286_v18 = vpack.c.bf16 %v2234_v31, %v2233_v39 }
 0x5da   : > { %4265 = vrcp.f32 %v2070_v1  ;;  %v5914_v1 = vld [vmem:[#allocation8_spill] sm:$0xff] }
 0x5db   : > { %v2285_v35 = vpack.c.bf16 %v2232_v58, %v2231_v14 }
 0x5dc   : > { %v4260_v0 = vpop.eup %4259 }
 0x5dd   : > { %v2080_v42 = vpop.xlane.xlu1 %2079  ;;  %3487 = vmatprep.mubr.bf16.mxu0 %v2285_v35  ;;  %v4262_v27 = vpop.eup %4261  ;;  %v2238_v15 = vmul.f32 %v4260_v0, %v5912_v62 }
 0x5de   : > { %3488 = vmatmul.mubr.bf16.gmra.mrb[56].mxu0 %v2286_v18  ;;  %v4264_v9 = vpop.eup %4263  ;;  %v2235_v26 = vmul.f32 %v4262_v27, %v5913_v52 }
 0x5df   : > { %v2237_v45 = vmul.f32 %v4264_v9, %v5914_v1 }
 0x5e1   : > { %v2076_v57 = vpop.xlane.xlu1 %2075  ;;  %v2288_v31 = vpack.c.bf16 %v2238_v15, %v2237_v45 }
 0x5e4   : > { %v4266_v24 = vpop.eup %4265 }
 0x5e5   : > { %v2082_v3 = vpop.xlane.xlu1 %2081  ;;  %v2236_v55 = vmul.f32 %v4266_v24, %v5464_v12 }
 0x5e6   : > { %4267 = vrcp.f32 %v2082_v3 }
 0x5e7   : > { %v2287_v59 = vpack.c.bf16 %v2236_v55, %v2235_v26  ;;  %4269 = vrcp.f32 %v2076_v57 }
 0x5e8   : > { %4271 = vrcp.f32 %v2080_v42 }
 0x5e9   : > { %v2078_v14 = vpop.xlane.xlu1 %2077  ;;  %3491 = vmatprep.mubr.bf16.mxu0 %v2287_v59 }
 0x5ea   : > { %4273 = vrcp.f32 %v2078_v14  ;;  %3492 = vmatmul.mubr.bf16.gmra.mrb[60].mxu0 %v2288_v31 }
 0x5ed   : > { %v2088_v47 = vpop.xlane.xlu1 %2087 }
 0x5ee   : > { %4275 = vrcp.f32 %v2088_v47 }
 0x5f0   : > { %v4268_v58 = vpop.eup %4267 }
 0x5f1   : > { %v2084_v41 = vpop.xlane.xlu1 %2083  ;;  %v4270_v39 = vpop.eup %4269  ;;  %v2242_v12 = vmul.f32 %v4268_v58, %v5477_v22 }
 0x5f2   : > { %v4272_v35 = vpop.eup %4271  ;;  %v2239_v27 = vmul.f32 %v4270_v39, %v5472_v56  ;;  %v5676_v8 = vpop.xlane.xlu0 %2097 }
 0x5f3   : > { %v2241_v42 = vmul.f32 %v4272_v35, %v5468_v5 }
 0x5f4   : > { %v4274_v18 = vpop.eup %4273 }
 0x5f5   : > { %v2090_v0 = vpop.xlane.xlu1 %2089  ;;  %v2240_v57 = vmul.f32 %v4274_v18, %v5483_v38  ;;  %v2290_v24 = vpack.c.bf16 %v2242_v12, %v2241_v42 }
 0x5f6   : > { %4277 = vrcp.f32 %v2090_v0  ;;  %v5678_v46 = vpop.xlane.xlu0 %2093 }
 0x5f7   : > { %v2289_v9 = vpack.c.bf16 %v2240_v57, %v2239_v27  ;;  %4279 = vrcp.f32 %v2084_v41 }
 0x5f8   : > { %v4276_v22 = vpop.eup %4275 }
 0x5f9   : > { %v2086_v62 = vpop.xlane.xlu1 %2085  ;;  %3495 = vmatprep.mubr.bf16.mxu0 %v2289_v9  ;;  %v5667_v56 = vmul.f32 %v4276_v22, %v5491_v63 }
 0x5fa   : > { %4281 = vrcp.f32 %v2086_v62  ;;  %3496 = vmatmul.mubr.bf16.gmra.mrb[64].mxu0 %v2290_v24 }
 0x5fb   : > { %3547 = vmatprep.mubr.bf16.mxu0 %v2299_v7  ;;  %v5682_v7 = vpop.xlane.xlu0 %2103 }
 0x5fd   : > { %v5680_v63 = vpop.xlane.xlu1 %2095 }
 0x5ff   : > { %v5686_v45 = vpop.xlane.xlu0 %2131 }
 0x600   : > { %v4278_v15 = vpop.eup %4277 }
 0x601   : > { %v5670_v38 = vmul.f32 %v4278_v15, %v5510_v33  ;;  %v4280_v5 = vpop.eup %4279  ;;  %v5684_v33 = vpop.xlane.xlu1 %2091 }
 0x602   : > { %v2243_v26 = vmul.f32 %v4280_v5, %v5499_v61  ;;  %4283 = vrcp.f32 %v5684_v33 }
 0x603   : > { %v2292_v3 = vpack.c.bf16 %v5670_v38, %v5667_v56  ;;  %v5690_v31 = vpop.xlane.xlu0 %2133  ;;  %4285 = vrcp.f32 %v5678_v46 }
 0x604   : > { %v4282_v52 = vpop.eup %4281  ;;  %4287 = vrcp.f32 %v5676_v8 }
 0x605   : > { %v2244_v55 = vmul.f32 %v4282_v52, %v5522_v25  ;;  %v5688_v59 = vpop.xlane.xlu1 %2099  ;;  %4289 = vrcp.f32 %v5680_v63 }
 0x606   : > { %4291 = vrcp.f32 %v5686_v45 }
 0x607   : > { %v2291_v1 = vpack.c.bf16 %v2244_v55, %v2243_v26  ;;  %v5692_v58 = vpop.xlane.xlu0 %2135  ;;  %4293 = vrcp.f32 %v5690_v31 }
 0x609   : > { %3515 = vmatprep.mubr.bf16.mxu1 %v2291_v1 }
 0x60b   : > { %v5694_v0 = vpop.xlane.xlu0 %2137 }
 0x60f   : > { %v5696_v5 = vpop.xlane.xlu0 %2139 }
 0x62b   : > { %v3855_v61 = vpop.trf.xlu1 }
 0x62c   : > { %v3859_v25 = vunpack.i.h.bf16 %v3855_v61  ;;  %v3856_v14 = vunpack.i.l.bf16 %v3855_v61 }
 0x62f   : > { %v3860_v47 = vpop.trf.xlu1 }
 0x630   : > { %v3864_v41 = vunpack.i.h.bf16 %v3860_v47  ;;  %v3861_v39 = vunpack.i.l.bf16 %v3860_v47 }
 0x632   : > { %v1125_v35 = vpack.c.bf16 %v3861_v39, %v3856_v14  ;;  %v1133_v18 = vpack.c.bf16 %v3864_v41, %v3859_v25  ;;  %v5698_v25 = vpop.xlane.xlu0 %2141 }
 0x633   : > { %v3865_v12 = vpop.trf.xlu1 }
 0x634   : > { %3499 = vmatprep.subr.bf16.mxu1 %v1125_v35  ;;  %3531 = vmatprep.subr.bf16.mxu0 %v1133_v18  ;;  %v3869_v27 = vunpack.i.h.bf16 %v3865_v12  ;;  %v3866_v57 = vunpack.i.l.bf16 %v3865_v12 }
 0x635   : > { %3500 = vmatpush3.bf16.msra.mxu1 %v1125_v35  ;;  %3532 = vmatpush3.bf16.msra.mxu0 %v1133_v18 }
 0x636   : > { %v5700_v12 = vpop.xlane.xlu0 %2105 }
 0x637   : > { %v3870_v42 = vpop.trf.xlu1 }
 0x638   : > { %v3874_v9 = vunpack.i.h.bf16 %v3870_v42  ;;  %v3871_v24 = vunpack.i.l.bf16 %v3870_v42 }
 0x63a   : > { %v1126_v62 = vpack.c.bf16 %v3871_v24, %v3866_v57  ;;  %v1134_v22 = vpack.c.bf16 %v3874_v9, %v3869_v27 }
 0x63b   : > { %v3875_v15 = vpop.trf.xlu1 }
 0x63c   : > { %3501 = vmatprep.subr.bf16.mxu1 %v1126_v62  ;;  %3533 = vmatprep.subr.bf16.mxu0 %v1134_v22  ;;  %v3879_v52 = vunpack.i.h.bf16 %v3875_v15  ;;  %v3876_v26 = vunpack.i.l.bf16 %v3875_v15 }
 0x63d   : > { %3502 = vmatpush3.bf16.msra.mxu1 %v1126_v62  ;;  %3534 = vmatpush3.bf16.msra.mxu0 %v1134_v22  ;;  %v2102_v62 = vpop.xlane.xlu0 %2101 }
 0x63e   : > { %4295 = vrcp.f32 %v2102_v62 }
 0x63f   : > { %v3880_v55 = vpop.trf.xlu1  ;;  %4297 = vrcp.f32 %v5688_v59 }
 0x640   : > { %v3884_v1 = vunpack.i.h.bf16 %v3880_v55  ;;  %v3881_v61 = vunpack.i.l.bf16 %v3880_v55  ;;  %4299 = vrcp.f32 %v5682_v7 }
 0x641   : > { %4301 = vrcp.f32 %v5692_v58 }
 0x642   : > { %v1127_v14 = vpack.c.bf16 %v3881_v61, %v3876_v26  ;;  %v1135_v47 = vpack.c.bf16 %v3884_v1, %v3879_v52  ;;  %4303 = vrcp.f32 %v5694_v0 }
 0x643   : > { %v3885_v41 = vpop.trf.xlu1  ;;  %4305 = vrcp.f32 %v5698_v25 }
 0x644   : > { %3503 = vmatprep.subr.bf16.mxu1 %v1127_v14  ;;  %3535 = vmatprep.subr.bf16.mxu0 %v1135_v47  ;;  %v3889_v39 = vunpack.i.h.bf16 %v3885_v41  ;;  %v3886_v35 = vunpack.i.l.bf16 %v3885_v41  ;;  %4307 = vrcp.f32 %v5700_v12 }
 0x645   : > { %3504 = vmatpush3.bf16.msra.mxu1 %v1127_v14  ;;  %3536 = vmatpush3.bf16.msra.mxu0 %v1135_v47  ;;  %v5702_v47 = vpop.xlane.xlu0 %2111 }
 0x647   : > { %v3890_v18 = vpop.trf.xlu1 }
 0x648   : > { %v3894_v27 = vunpack.i.h.bf16 %v3890_v18  ;;  %v3891_v57 = vunpack.i.l.bf16 %v3890_v18 }
 0x64a   : > { %v1128_v42 = vpack.c.bf16 %v3891_v57, %v3886_v35  ;;  %v1136_v9 = vpack.c.bf16 %v3894_v27, %v3889_v39  ;;  %v5704_v57 = vpop.xlane.xlu0 %2107 }
 0x64b   : > { %v3895_v24 = vpop.trf.xlu1 }
 0x64c   : > { %3505 = vmatprep.subr.bf16.mxu1 %v1128_v42  ;;  %3537 = vmatprep.subr.bf16.mxu0 %v1136_v9  ;;  %v3899_v22 = vunpack.i.h.bf16 %v3895_v24  ;;  %v3896_v15 = vunpack.i.l.bf16 %v3895_v24 }
 0x64d   : > { %3506 = vmatpush3.bf16.msra.mxu1 %v1128_v42  ;;  %3538 = vmatpush3.bf16.msra.mxu0 %v1136_v9 }
 0x64f   : > { %v3900_v52 = vpop.trf.xlu1 }
 0x650   : > { %v3904_v26 = vunpack.i.h.bf16 %v3900_v52  ;;  %v3901_v55 = vunpack.i.l.bf16 %v3900_v52 }
 0x652   : > { %v1129_v1 = vpack.c.bf16 %v3901_v55, %v3896_v15  ;;  %v1137_v61 = vpack.c.bf16 %v3904_v26, %v3899_v22 }
 0x653   : > { %v3905_v14 = vpop.trf.xlu1 }
 0x654   : > { %3507 = vmatprep.subr.bf16.mxu1 %v1129_v1  ;;  %3539 = vmatprep.subr.bf16.mxu0 %v1137_v61  ;;  %v3909_v41 = vunpack.i.h.bf16 %v3905_v14  ;;  %v3906_v39 = vunpack.i.l.bf16 %v3905_v14  ;;  %v2114_v14 = vpop.xlane.xlu0 %2113 }
 0x655   : > { %3508 = vmatpush3.bf16.msra.mxu1 %v1129_v1  ;;  %3540 = vmatpush3.bf16.msra.mxu0 %v1137_v61 }
 0x657   : > { %v3910_v35 = vpop.trf.xlu1 }
 0x658   : > { %v3914_v18 = vunpack.i.h.bf16 %v3910_v35  ;;  %v3911_v27 = vunpack.i.l.bf16 %v3910_v35  ;;  %v2110_v46 = vpop.xlane.xlu0 %2109 }
 0x659   : > { %4309 = vrcp.f32 %v2110_v46 }
 0x65a   : > { %v1130_v42 = vpack.c.bf16 %v3911_v27, %v3906_v39  ;;  %v1138_v9 = vpack.c.bf16 %v3914_v18, %v3909_v41  ;;  %4311 = vrcp.f32 %v5696_v5 }
 0x65b   : > { %v3915_v24 = vpop.trf.xlu1  ;;  %4313 = vrcp.f32 %v5704_v57 }
 0x65c   : > { %v5706_v52 = vpop.f32.mrb[44].mxu1  ;;  %3509 = vmatprep.subr.bf16.mxu1 %v1130_v42  ;;  %3541 = vmatprep.subr.bf16.mxu0 %v1138_v9  ;;  %v3919_v26 = vunpack.i.h.bf16 %v3915_v24  ;;  %v3916_v55 = vunpack.i.l.bf16 %v3915_v24  ;;  %v2144_v59 = vpop.xlane.xlu0 %2143 }
 0x65d   : > { %v5708_v22 = vpop.f32.mrb[45].mxu1  ;;  %3510 = vmatpush3.bf16.msra.mxu1 %v1130_v42  ;;  %3542 = vmatpush3.bf16.msra.mxu0 %v1138_v9  ;;  %v4284_v9 = vpop.eup %4283  ;;  %4315 = vrcp.f32 %v2114_v14 }
 0x65e   : > { %v5711_v15 = vpop.f32.mrb[46].mxu1  ;;  %v4286_v63 = vpop.eup %4285  ;;  %v2247_v31 = vmul.f32 %v4284_v9, %v5538_v43 }
 0x65f   : > { %v3920_v1 = vpop.trf.xlu1  ;;  %v5714_v61 = vpop.f32.mrb[47].mxu1  ;;  %v2248_v58 = vmul.f32 %v4286_v63, %v5512_v54 }
 0x660   : > { %v3924_v41 = vunpack.i.h.bf16 %v3920_v1  ;;  %v3921_v39 = vunpack.i.l.bf16 %v3920_v1  ;;  %v4288_v62 = vpop.eup %4287  ;;  %v2146_v5 = vpop.xlane.xlu0 %2145 }
 0x661   : > { %v2250_v38 = vmul.f32 %v4288_v62, %v5501_v36  ;;  %4317 = vrcp.f32 %v2146_v5 }
 0x662   : > { %v1131_v35 = vpack.c.bf16 %v3921_v39, %v3916_v55  ;;  %v1139_v18 = vpack.c.bf16 %v3924_v41, %v3919_v26  ;;  %v4290_v41 = vpop.eup %4289  ;;  %4319 = vrcp.f32 %v5702_v47 }
 0x663   : > { %v3925_v27 = vpop.trf.xlu1  ;;  %v4292_v0 = vpop.eup %4291  ;;  %v2249_v12 = vmul.f32 %v4290_v41, %v5532_v49  ;;  %4321 = vrcp.f32 %v2144_v59 }
 0x664   : > { %3511 = vmatprep.subr.bf16.mxu1 %v1131_v35  ;;  %3543 = vmatprep.subr.bf16.mxu0 %v1139_v18  ;;  %v3929_v33 = vunpack.i.h.bf16 %v3925_v27  ;;  %v3926_v42 = vunpack.i.l.bf16 %v3925_v27  ;;  %v4294_v39 = vpop.eup %4293 }
 0x665   : > { %3512 = vmatpush3.bf16.msra.mxu1 %v1131_v35  ;;  %3544 = vmatpush3.bf16.msra.mxu0 %v1139_v18  ;;  %v2293_v35 = vpack.c.bf16 %v2248_v58, %v2247_v31  ;;  %v4296_v18 = vpop.eup %4295  ;;  %v2268_v46 = vmul.f32 %v4294_v39, %v5536_v10  ;;  %v2294_v28 = vpack.c.bf16 %v2250_v38, %v2249_v12 }
 0x666   : > { %v4298_v54 = vpop.eup %4297  ;;  %v2252_v57 = vmul.f32 %v4296_v18, %v5574_v30 }
 0x667   : > { %v3930_v8 = vpop.trf.xlu1  ;;  %v4300_v27 = vpop.eup %4299  ;;  %v2251_v60 = vmul.f32 %v4298_v54, %v5546_v48 }
 0x668   : > { %v3934_v24 = vunpack.i.h.bf16 %v3930_v8  ;;  %v3931_v26 = vunpack.i.l.bf16 %v3930_v8  ;;  %v4302_v56 = vpop.eup %4301 }
 0x669   : > { %v4304_v13 = vpop.eup %4303  ;;  %v2269_v8 = vmul.f32 %v4302_v56, %v5544_v19 }
 0x66a   : > { %v1132_v45 = vpack.c.bf16 %v3931_v26, %v3926_v42  ;;  %v1140_v55 = vpack.c.bf16 %v3934_v24, %v3929_v33  ;;  %v4306_v50 = vpop.eup %4305  ;;  %v2270_v48 = vmul.f32 %v4304_v13, %v5552_v40  ;;  %v2253_v42 = vmul.f32 %v4300_v27, %v5520_v17 }
 0x66b   : > { %v4308_v49 = vpop.eup %4307  ;;  %v2272_v14 = vmul.f32 %v4306_v50, %v5561_v11 }
 0x66c   : > { %v5726_v1 = vpop.f32.mrb[48].mxu1  ;;  %3513 = vmatprep.subr.bf16.mxu1 %v1132_v45  ;;  %3545 = vmatprep.subr.bf16.mxu0 %v1140_v55  ;;  %v2304_v40 = vpack.c.bf16 %v2270_v48, %v2269_v8 }
 0x66d   : > { %v5729_v7 = vpop.f32.mrb[49].mxu1  ;;  %3514 = vmatpush3.bf16.msra.mxu1 %v1132_v45  ;;  %3546 = vmatpush3.bf16.msra.mxu0 %v1140_v55 }
 0x66e   : > { %v5732_v43 = vpop.f32.mrb[50].mxu1 }
 0x66f   : > { %v5735_v25 = vpop.f32.mrb[51].mxu1 }
 0x670   : > { %3516 = vmatmul.mubr.bf16.vlgmr.msra.gmra.mrb[60].mxu1 %v2292_v3  ;;  %3548 = vmatmul.mubr.bf16.vlgmr.msra.gmra.mrb[68].mxu0 %v2300_v51  ;;  %v2267_v51 = vmul.f32 %v4292_v0, %v5530_v44  ;;  %v4310_v3 = vpop.eup %4309  ;;  %v2254_v44 = vmul.f32 %v4308_v49, %v5569_v34 }
 0x671   : > { %3519 = vmatprep.mubr.bf16.mxu1 %v2293_v35  ;;  %3551 = vmatprep.mubr.bf16.mxu0 %v2301_v4  ;;  %v2295_v4 = vpack.c.bf16 %v2252_v57, %v2251_v60  ;;  %v4312_v36 = vpop.eup %4311  ;;  %v2256_v47 = vmul.f32 %v4310_v3, %v5610_v53 }
 0x672   : > { %v2303_v30 = vpack.c.bf16 %v2268_v46, %v2267_v51  ;;  %v4314_v10 = vpop.eup %4313  ;;  %v2296_v34 = vpack.c.bf16 %v2254_v44, %v2253_v42 }
 0x673   : > { %v2255_v2 = vmul.f32 %v4314_v10, %v5583_v37  ;;  %v4316_v9 = vpop.eup %4315 }
 0x674   : > { %v4318_v26 = vpop.eup %4317  ;;  %v2258_v19 = vmul.f32 %v4316_v9, %v5585_v29 }
 0x675   : > { %v2297_v63 = vpack.c.bf16 %v2256_v47, %v2255_v2  ;;  %v4320_v45 = vpop.eup %4319  ;;  %v2274_v37 = vmul.f32 %v4318_v26, %v5615_v6 }
 0x676   : > { %v4322_v17 = vpop.eup %4321 }
 0x677   : > { %v2273_v55 = vmul.f32 %v4322_v17, %v5613_v32 }
 0x678   : > { %3520 = vmatmul.mubr.bf16.gmra.mrb[64].mxu1 %v2294_v28  ;;  %3552 = vmatmul.mubr.bf16.gmra.mrb[72].mxu0 %v2302_v23  ;;  %v2271_v23 = vmul.f32 %v4312_v36, %v5559_v21  ;;  %v2257_v21 = vmul.f32 %v4320_v45, %v5579_v16 }
 0x679   : > { %3523 = vmatprep.mubr.bf16.mxu1 %v2295_v4  ;;  %3555 = vmatprep.mubr.bf16.mxu0 %v2303_v30  ;;  %v2306_v62 = vpack.c.bf16 %v2274_v37, %v2273_v55 }
 0x67a   : > { %v2305_v11 = vpack.c.bf16 %v2272_v14, %v2271_v23  ;;  %v2298_v31 = vpack.c.bf16 %v2258_v19, %v2257_v21 }
 0x67c   : > { %v5761_v33 = vpop.f32.mrb[52].mxu1 }
 0x67d   : > { %v2373_v20 = vpop.f32.mrb[53].mxu1 }
 0x67e   : > { %v5767_v24 = vpop.f32.mrb[54].mxu1 }
 0x67f   : > { %v2376_v53 = vpop.f32.mrb[55].mxu1 }
 0x680   : > { %3524 = vmatmul.mubr.bf16.gmra.mrb[68].mxu1 %v2296_v34  ;;  %3556 = vmatmul.mubr.bf16.gmra.mrb[76].mxu0 %v2304_v40 }
 0x681   : > { %3527 = vmatprep.mubr.bf16.mxu1 %v2297_v63  ;;  %3559 = vmatprep.mubr.bf16.mxu0 %v2305_v11 }
 0x688   : > { %3528 = vmatmul.mubr.bf16.gmra.mrb[72].mxu1 %v2298_v31  ;;  %3560 = vmatmul.mubr.bf16.gmra.mrb[80].mxu0 %v2306_v62 }
 0x68b   : > { %v3465_v59 = vpop.f32.mrb[56].mxu1 }
 0x68c   : > { %v2389_v41 = vpop.f32.mrb[57].mxu1 }
 0x68d   : > { %v3466_v58 = vpop.f32.mrb[58].mxu1 }
 0x68e   : > { %v2392_v0 = vpop.f32.mrb[59].mxu1 }
 0x69d   : > { %v3485_v39 = vpop.f32.mrb[52].mxu0 }
 0x69e   : > { %v3939_v35 = vpack.i.bf16 %v3485_v39, %v5706_v52  ;;  %v2438_v18 = vpop.f32.mrb[53].mxu0 }
 0x69f   : > { %v3935_v29 = vpack.i.bf16 %v2438_v18, %v5708_v22  ;;  %v3486_v54 = vpop.f32.mrb[54].mxu0 }
 0x6a0   : > { %v3941_v6 = vpack.i.bf16 %v3486_v54, %v5711_v15  ;;  %v2441_v16 = vpop.f32.mrb[55].mxu0 }
 0x6a1   : > { %v3937_v32 = vpack.i.bf16 %v2441_v16, %v5714_v61  ;;  %3936 = vxpose.xlu1.b32.start [1/16] (narrow) %v3935_v29, 16 }
 0x6a5   : > { %3938 = vxpose.xlu1.b32.cont [2/16] (narrow) %v3937_v32, 16 }
 0x6a9   : > { %3940 = vxpose.xlu1.b32.cont [3/16] (narrow) %v3939_v35, 16 }
 0x6ad   : > { %3942 = vxpose.xlu1.b32.cont [4/16] (narrow) %v3941_v6, 16  ;;  %v4031_v6 = vld [vmem:[%s5827_s5] sm:$0xff]  }
 0x6ae   : > { %3563 = vmatprep.subr.bf16.mxu1 %v4031_v6 }
 0x6af   : > { %3564 = vmatpush3.bf16.msra.mxu1 %v4031_v6 }
 0x6b1   : > { %v3489_v5 = vpop.f32.mrb[56].mxu0 }
 0x6b2   : > { %v3947_v12 = vpack.i.bf16 %v3489_v5, %v5726_v1  ;;  %v2454_v27 = vpop.f32.mrb[57].mxu0 }
 0x6b3   : > { %v3943_v57 = vpack.i.bf16 %v2454_v27, %v5729_v7  ;;  %v3490_v52 = vpop.f32.mrb[58].mxu0 }
 0x6b4   : > { %v3949_v46 = vpack.i.bf16 %v3490_v52, %v5732_v43  ;;  %v2457_v22 = vpop.f32.mrb[59].mxu0 }
 0x6b5   : > { %v3945_v56 = vpack.i.bf16 %v2457_v22, %v5735_v25  ;;  %3944 = vxpose.xlu1.b32.cont [5/16] (narrow) %v3943_v57, 16 }
 0x6b9   : > { %3946 = vxpose.xlu1.b32.cont [6/16] (narrow) %v3945_v56, 16 }
 0x6bd   : > { %v3493_v15 = vpop.f32.mrb[60].mxu0  ;;  %3948 = vxpose.xlu1.b32.cont [7/16] (narrow) %v3947_v12, 16 }
 0x6be   : > { %v3955_v61 = vpack.i.bf16 %v3493_v15, %v5761_v33  ;;  %v2470_v38 = vpop.f32.mrb[61].mxu0 }
 0x6bf   : > { %v3951_v13 = vpack.i.bf16 %v2470_v38, %v2373_v20  ;;  %v3494_v60 = vpop.f32.mrb[62].mxu0 }
 0x6c0   : > { %v3957_v1 = vpack.i.bf16 %v3494_v60, %v5767_v24  ;;  %v2473_v51 = vpop.f32.mrb[63].mxu0 }
 0x6c1   : > { %v3953_v50 = vpack.i.bf16 %v2473_v51, %v2376_v53  ;;  %3950 = vxpose.xlu1.b32.cont [8/16] (narrow) %v3949_v46, 16 }
 0x6c5   : > { %3952 = vxpose.xlu1.b32.cont [9/16] (narrow) %v3951_v13, 16 }
 0x6c9   : > { %3954 = vxpose.xlu1.b32.cont [10/16] (narrow) %v3953_v50, 16  ;;  %v4032_v50 = vld [vmem:[%s5827_s5 + $0x8] sm:$0xff]  }
 0x6ca   : > { %3565 = vmatprep.subr.bf16.mxu1 %v4032_v50 }
 0x6cb   : > { %3566 = vmatpush3.bf16.msra.mxu1 %v4032_v50 }
 0x6cd   : > { %v3497_v7 = vpop.f32.mrb[64].mxu0  ;;  %3956 = vxpose.xlu1.b32.cont [11/16] (narrow) %v3955_v61, 16 }
 0x6ce   : > { %v3963_v43 = vpack.i.bf16 %v3497_v7, %v3465_v59  ;;  %v2486_v25 = vpop.f32.mrb[65].mxu0  ;;  %v4033_v7 = vld [vmem:[%s5827_s5 + $0x10] sm:$0xff]  }
 0x6cf   : > { %v3959_v28 = vpack.i.bf16 %v2486_v25, %v2389_v41  ;;  %v3498_v49 = vpop.f32.mrb[66].mxu0  ;;  %3567 = vmatprep.subr.bf16.mxu1 %v4033_v7 }
 0x6d0   : > { %v3965_v4 = vpack.i.bf16 %v3498_v49, %v3466_v58  ;;  %v2489_v30 = vpop.f32.mrb[67].mxu0  ;;  %3568 = vmatpush3.bf16.msra.mxu1 %v4033_v7 }
 0x6d1   : > { %v3961_v3 = vpack.i.bf16 %v2489_v30, %v2392_v0  ;;  %3958 = vxpose.xlu1.b32.cont [12/16] (narrow) %v3957_v1, 16 }
 0x6d5   : > { %3960 = vxpose.xlu1.b32.cont [13/16] (narrow) %v3959_v28, 16 }
 0x6d9   : > { %3962 = vxpose.xlu1.b32.cont [14/16] (narrow) %v3961_v3, 16 }
 0x6dd   : > { %3964 = vxpose.xlu1.b32.cont [15/16] (narrow) %v3963_v43, 16  ;;  %v4034_v43 = vld [vmem:[%s5827_s5 + $0x18] sm:$0xff]  }
 0x6de   : > { %3569 = vmatprep.subr.bf16.mxu1 %v4034_v43 }
 0x6df   : > { %3570 = vmatpush3.bf16.msra.mxu1 %v4034_v43 }
 0x6e1   : > { %3966 = vxpose.xlu1.b32.end [16/16] (narrow) %v3965_v4, 16 }
 0x725   : > { %v5783_v36 = vpop.trf.xlu1 }
 0x726   : > { %v3968_v13 = vunpack.i.l.bf16 %v5783_v36  ;;  %v3971_v1 = vunpack.i.h.bf16 %v5783_v36 }
 0x729   : > { %v5785_v10 = vpop.trf.xlu1 }
 0x72a   : > { %v3973_v60 = vunpack.i.l.bf16 %v5785_v10  ;;  %v3976_v51 = vunpack.i.h.bf16 %v5785_v10 }
 0x743   : > { %v3517_v44 = vpop.f32.mrb[60].mxu1  ;;  %v3549_v48 = vpop.f32.mrb[68].mxu0 }
 0x744   : > { %v3981_v47 = vpack.i.bf16 %v3549_v48, %v3517_v44  ;;  %v2535_v14 = vpop.f32.mrb[61].mxu1  ;;  %v2632_v33 = vpop.f32.mrb[69].mxu0 }
 0x745   : > { %v3977_v42 = vpack.i.bf16 %v2632_v33, %v2535_v14  ;;  %v3518_v8 = vpop.f32.mrb[62].mxu1  ;;  %v3550_v20 = vpop.f32.mrb[70].mxu0 }
 0x746   : > { %v3983_v2 = vpack.i.bf16 %v3550_v20, %v3518_v8  ;;  %v2538_v23 = vpop.f32.mrb[63].mxu1  ;;  %v2635_v9 = vpop.f32.mrb[71].mxu0 }
 0x747   : > { %v3979_v24 = vpack.i.bf16 %v2635_v9, %v2538_v23  ;;  %3978 = vxpose.xlu0.b32.start [1/16] (narrow) %v3977_v42, 16 }
 0x74b   : > { %v3553_v34 = vpop.f32.mrb[72].mxu0  ;;  %3980 = vxpose.xlu0.b32.cont [2/16] (narrow) %v3979_v24, 16  ;;  %v3521_v40 = vpop.f32.mrb[64].mxu1 }
 0x74c   : > { %v3989_v26 = vpack.i.bf16 %v3553_v34, %v3521_v40  ;;  %v2551_v53 = vpop.f32.mrb[65].mxu1  ;;  %v2648_v63 = vpop.f32.mrb[73].mxu0 }
 0x74d   : > { %v3985_v11 = vpack.i.bf16 %v2648_v63, %v2551_v53  ;;  %v3522_v45 = vpop.f32.mrb[66].mxu1  ;;  %v3554_v17 = vpop.f32.mrb[74].mxu0 }
 0x74e   : > { %v3991_v19 = vpack.i.bf16 %v3554_v17, %v3522_v45  ;;  %v2554_v37 = vpop.f32.mrb[67].mxu1  ;;  %v2651_v21 = vpop.f32.mrb[75].mxu0 }
 0x74f   : > { %v3987_v55 = vpack.i.bf16 %v2651_v21, %v2554_v37  ;;  %3982 = vxpose.xlu0.b32.cont [3/16] (narrow) %v3981_v47, 16  ;;  %v3234_v21 = vld [vmem:[%s5828_s6] ss:$0 sm:$0xff] }
 0x753   : > { %v3557_v31 = vpop.f32.mrb[76].mxu0  ;;  %3984 = vxpose.xlu0.b32.cont [4/16] (narrow) %v3983_v2, 16  ;;  %v3525_v62 = vpop.f32.mrb[68].mxu1 }
 0x754   : > { %v3997_v59 = vpack.i.bf16 %v3557_v31, %v3525_v62  ;;  %v2567_v41 = vpop.f32.mrb[69].mxu1  ;;  %v2664_v58 = vpop.f32.mrb[77].mxu0 }
 0x755   : > { %v3993_v0 = vpack.i.bf16 %v2664_v58, %v2567_v41  ;;  %v3526_v39 = vpop.f32.mrb[70].mxu1  ;;  %v3558_v35 = vpop.f32.mrb[78].mxu0 }
 0x756   : > { %v3999_v18 = vpack.i.bf16 %v3558_v35, %v3526_v39  ;;  %v2570_v29 = vpop.f32.mrb[71].mxu1  ;;  %v2667_v54 = vpop.f32.mrb[79].mxu0 }
 0x757   : > { %v3995_v16 = vpack.i.bf16 %v2667_v54, %v2570_v29  ;;  %3986 = vxpose.xlu0.b32.cont [5/16] (narrow) %v3985_v11, 16 }
 0x75b   : > { %v3561_v32 = vpop.f32.mrb[80].mxu0  ;;  %3988 = vxpose.xlu0.b32.cont [6/16] (narrow) %v3987_v55, 16  ;;  %v3529_v5 = vpop.f32.mrb[72].mxu1  ;;  %v5915_v55 = vld [vmem:[#allocation2_spill] sm:$0xff] }
 0x75c   : > { %v4005_v12 = vpack.i.bf16 %v3561_v32, %v3529_v5  ;;  %v2583_v27 = vpop.f32.mrb[73].mxu1  ;;  %v2680_v57 = vpop.f32.mrb[81].mxu0  ;;  %v3025_v31 = vadd.s32 8, %v5915_v55 }
 0x75d   : > { %v4001_v52 = vpack.i.bf16 %v2680_v57, %v2583_v27  ;;  %v3530_v46 = vpop.f32.mrb[74].mxu1  ;;  %v3562_v22 = vpop.f32.mrb[82].mxu0 }
 0x75e   : > { %v4007_v56 = vpack.i.bf16 %v3562_v22, %v3530_v46  ;;  %v2586_v15 = vpop.f32.mrb[75].mxu1  ;;  %v2683_v61 = vpop.f32.mrb[83].mxu0  ;;  %vm3041_vm3 = vcmp.lt.s32.totalorder %v3025_v31, 13 }
 0x75f   : > { %v4003_v38 = vpack.i.bf16 %v2683_v61, %v2586_v15  ;;  %3990 = vxpose.xlu0.b32.cont [7/16] (narrow) %v3989_v26, 16 }
 0x763   : > { %3992 = vxpose.xlu0.b32.cont [8/16] (narrow) %v3991_v19, 16 }
 0x767   : > { %3994 = vxpose.xlu0.b32.cont [9/16] (narrow) %v3993_v0, 16 }
 0x76b   : > { %3996 = vxpose.xlu0.b32.cont [10/16] (narrow) %v3995_v16, 16 }
 0x76f   : > { %3998 = vxpose.xlu0.b32.cont [11/16] (narrow) %v3997_v59, 16 }
 0x773   : > { %4000 = vxpose.xlu0.b32.cont [12/16] (narrow) %v3999_v18, 16 }
 0x777   : > { %4002 = vxpose.xlu0.b32.cont [13/16] (narrow) %v4001_v52, 16 }
 0x77b   : > { %4004 = vxpose.xlu0.b32.cont [14/16] (narrow) %v4003_v38, 16 }
 0x77f   : > { %4006 = vxpose.xlu0.b32.cont [15/16] (narrow) %v4005_v12, 16 }
 0x783   : > { %4008 = vxpose.xlu0.b32.end [16/16] (narrow) %v4007_v56, 16 }
 0x787   : > { %2823 = vxpose.xlu0.b32.start [1/8] (short) %v3968_v13, 128 }
 0x78b   : > { %2824 = vxpose.xlu0.b32.cont [2/8] (short) %v3973_v60, 128 }
 0x78f   : > { %2825 = vxpose.xlu0.b32.cont [3/8] (short) %v3971_v1, 128 }
 0x793   : > { %2826 = vxpose.xlu0.b32.cont [4/8] (short) %v3976_v51, 128 }
 0x7c7   : > { %v4009_v25 = vpop.trf.xlu0 }
 0x7c8   : > { %v4010_v28 = vunpack.i.l.bf16 %v4009_v25  ;;  %v4013_v30 = vunpack.i.h.bf16 %v4009_v25 }
 0x7ca   : > { %2827 = vxpose.xlu0.b32.cont [5/8] (short) %v4010_v28, 128 }
 0x7cb   : > { %v4014_v49 = vpop.trf.xlu0 }
 0x7cc   : > { %v4015_v4 = vunpack.i.l.bf16 %v4014_v49  ;;  %v4018_v3 = vunpack.i.h.bf16 %v4014_v49 }
 0x7ce   : > { %2828 = vxpose.xlu0.b32.cont [6/8] (short) %v4015_v4, 128 }
 0x7d2   : > { %2829 = vxpose.xlu0.b32.cont [7/8] (short) %v4013_v30, 128 }
 0x7d6   : > { %2830 = vxpose.xlu0.b32.end [8/8] (short) %v4018_v3, 128 }
 0x83a   : > { %v2839_v36 = vpop.trf.xlu0 }
 0x83e   : > { %v2840_v10 = vpop.trf.xlu0 }
 0x83f   : > { %v2855_v44 = vpack.c.bf16 %v2840_v10, %v2839_v36 }
 0x841   : > { %3571 = vmatprep.mubr.msk.bf16.mxu1 %vm296_vm0, %v2855_v44 }
 0x842   : > { %v2841_v48 = vpop.trf.xlu0 }
 0x846   : > { %v2842_v47 = vpop.trf.xlu0 }
 0x847   : > { %v2856_v14 = vpack.c.bf16 %v2842_v47, %v2841_v48 }
 0x849   : > { %3572 = vmatmul.mubr.msk.bf16.vlgmr.msra.gmra.mrb[76].mxu1 %vm296_vm0, %v2856_v14 }
 0x84a   : > { %v2843_v33 = vpop.trf.xlu0 }
 0x84e   : > { %v2844_v42 = vpop.trf.xlu0 }
 0x84f   : > { %v2857_v8 = vpack.c.bf16 %v2844_v42, %v2843_v33 }
 0x851   : > { %3575 = vmatprep.mubr.msk.bf16.mxu1 %vm296_vm0, %v2857_v8 }
 0x852   : > { %v2845_v20 = vpop.trf.xlu0 }
 0x856   : > { %v2846_v2 = vpop.trf.xlu0 }
 0x857   : > { %v2858_v23 = vpack.c.bf16 %v2846_v2, %v2845_v20 }
 0x859   : > { %3576 = vmatmul.mubr.msk.bf16.gmra.mrb[80].mxu1 %vm296_vm0, %v2858_v23 }
 0x85a   : > { %v2847_v9 = vpop.trf.xlu0 }
 0x85e   : > { %v2848_v24 = vpop.trf.xlu0 }
 0x85f   : > { %v2859_v34 = vpack.c.bf16 %v2848_v24, %v2847_v9 }
 0x861   : > { %3579 = vmatprep.mubr.msk.bf16.mxu1 %vm296_vm0, %v2859_v34 }
 0x862   : > { %v2849_v40 = vpop.trf.xlu0 }
 0x866   : > { %v2850_v26 = vpop.trf.xlu0 }
 0x867   : > { %v2860_v53 = vpack.c.bf16 %v2850_v26, %v2849_v40 }
 0x869   : > { %3580 = vmatmul.mubr.msk.bf16.gmra.mrb[84].mxu1 %vm296_vm0, %v2860_v53 }
 0x86a   : > { %v2851_v63 = vpop.trf.xlu0 }
 0x86e   : > { %v2852_v11 = vpop.trf.xlu0 }
 0x86f   : > { %v2861_v45 = vpack.c.bf16 %v2852_v11, %v2851_v63 }
 0x871   : > { %3583 = vmatprep.mubr.msk.bf16.mxu1 %vm296_vm0, %v2861_v45 }
 0x872   : > { %v2853_v17 = vpop.trf.xlu0 }
 0x876   : > { %v2854_v19 = vpop.trf.xlu0 }
 0x877   : > { %v2862_v37 = vpack.c.bf16 %v2854_v19, %v2853_v17 }
 0x879   : > { %3584 = vmatmul.mubr.msk.bf16.gmra.mrb[88].mxu1 %vm296_vm0, %v2862_v37 }
 0x91c   : > { %v3573_v62 = vpop.f32.mrb[76].mxu1 }
 0x91d   : > { %v2960_v59 = vpop.f32.mrb[77].mxu1 }
 0x91e   : > { %v2961_v41 = vadd.f32 %v3234_v21, %v2960_v59  ;;  %v3574_v58 = vpop.f32.mrb[78].mxu1 }
 0x91f   : > { %v2963_v0 = vpop.f32.mrb[79].mxu1 }
 0x920   : > { %3104 = vst.msk [vmem:[%s4389_s9] sm:$0xff] %vm296_vm0, %v2961_v41  ;;  %v2964_v39 = vadd.f32 %v3234_v21, %v2963_v0 }
 0x922   : > { %v3089_v35 = vsel %vm3041_vm3, %v2964_v39, 0.0 }
 0x923   : > { %3105 = vst.msk [vmem:[%s4389_s9 + $0x8] sm:$0xff] %vm296_vm0, %v3089_v35 }
 0x92c   : > { %v3577_v18 = vpop.f32.mrb[80].mxu1 }
 0x92d   : > { %v2976_v29 = vpop.f32.mrb[81].mxu1 }
 0x92e   : > { %v3578_v54 = vpop.f32.mrb[82].mxu1 }
 0x92f   : > { %v2979_v6 = vpop.f32.mrb[83].mxu1 }
 0x93c   : > { %v3581_v16 = vpop.f32.mrb[84].mxu1 }
 0x93d   : > { %v2992_v32 = vpop.f32.mrb[85].mxu1 }
 0x93e   : > { %v3582_v5 = vpop.f32.mrb[86].mxu1 }
 0x93f   : > { %v2995_v12 = vpop.f32.mrb[87].mxu1 }
 0x94c   : > { %v3585_v27 = vpop.f32.mrb[88].mxu1 }
 0x94d   : > { %v3008_v57 = vpop.f32.mrb[89].mxu1 }
 0x94e   : > { %v3586_v52 = vpop.f32.mrb[90].mxu1 }
 0x94f   : > { %v3011_v46 = vpop.f32.mrb[91].mxu1 }
 0x950 PF: > { %s17_s24 = sadd.s32 1, %s4329_s24  }
 0x951   : > { %p14_p4 = scmp.ge.s32.totalorder %s17_s24, 4  }
 0x953   :  { %16 = sbr.rel (!%p14_p4) target bundleno = 1 (0x1), region = 78 }

</bundles_post_ra>
